<compile_context>
chip_gen: v7x
topology: tpu7x:2x2x1
jax: 0.10.0
libtpu: 0.0.40
codegen_flags: <defaults>
</compile_context>

<pallas_src>
import functools

import jax
import jax.numpy as jnp
from jax.experimental import pallas as pl
from jax.experimental.pallas import tpu as pltpu

LN_EPS = 1e-6


# ----------------------------- Pallas kernel ---------------------------------
def _conv3x3_ln_kernel(p_ref, w_ref, b_ref, g_ref, beta_ref, o_ref, *, c_real, eps):
    """Fused im2col-conv + bias + LayerNorm.

    p_ref:    (TM, 9*Cin)  im2col patches for TM output pixels (B folded in)
    w_ref:    (9*Cin, Cp)  tap-major conv weight, Cout zero-padded to Cp lanes
    b_ref:    (1, Cp)      conv bias   (zero in pad lanes)
    g_ref:    (1, Cp)      LN weight   (zero in pad lanes)
    beta_ref: (1, Cp)      LN bias     (zero in pad lanes)
    o_ref:    (TM, Cp)     float32 output (pad lanes are written as 0)
    """
    # Single MXU matmul: K = 9*Cin, f32 accumulation.
    y = jnp.dot(p_ref[...], w_ref[...], preferred_element_type=jnp.float32)
    y = y + b_ref[...]

    cp = y.shape[-1]
    inv_c = 1.0 / float(c_real)
    # Pad lanes [c_real:cp) have zero weight columns and zero bias, so y is
    # exactly 0 there and contributes nothing to the channel sum.
    mean = jnp.sum(y, axis=-1, keepdims=True) * inv_c
    d = y - mean
    if cp != c_real:
        lane = jax.lax.broadcasted_iota(jnp.int32, y.shape, 1)
        d = jnp.where(lane < c_real, d, 0.0)          # mask pads out of the variance
    var = jnp.sum(d * d, axis=-1, keepdims=True) * inv_c  # biased var, like torch LN
    o = d * jax.lax.rsqrt(var + eps) * g_ref[...] + beta_ref[...]
    o_ref[...] = o.astype(o_ref.dtype)


# ----------------------------- wrapper ----------------------------------------
def _round_up(x, m):
    return (x + m - 1) // m * m


def _im2col_3x3(x):
    """x: (B, H, W, C) -> (B*H*W, 9*C) patches, tap-major (dy, dx, c) order."""
    B, H, W, C = x.shape
    xp = jnp.pad(x, ((0, 0), (1, 1), (1, 1), (0, 0)))
    taps = [xp[:, dy:dy + H, dx:dx + W, :] for dy in range(3) for dx in range(3)]
    return jnp.concatenate(taps, axis=-1).reshape(B * H * W, 9 * C)


def downsample_layer(x, w, b, gamma, beta, *, eps=LN_EPS, row_block=256,
                     mxu_dtype=None):
    """DownsampleLayer forward.

    x:     (B, H, W, Cin)    channels-last, exactly like the module's forward()
    w:     (Cout, Cin, 3, 3) PyTorch Conv2d weight layout (OIHW)
    b:     (Cout,)           Conv2d bias
    gamma: (Cout,)           LayerNorm weight
    beta:  (Cout,)           LayerNorm bias
    mxu_dtype: e.g. jnp.bfloat16 to run the matmul operands in bf16 (f32 acc).
    returns (B, H, W, Cout) float32
    """
    B, H, W, Cin = x.shape
    Cout = w.shape[0]

    # Layout-only prep (done by XLA, outside the kernel):
    #   im2col patches (B*H*W, 9*Cin) and tap-major weight (9*Cin, Cout).
    patches = _im2col_3x3(x.astype(jnp.float32))
    w_mat = jnp.transpose(w.astype(jnp.float32), (2, 3, 1, 0)).reshape(9 * Cin, Cout)

    M, K = patches.shape
    Cp = _round_up(Cout, 128)                 # lane-dense output slab
    TM = min(row_block, _round_up(M, 8))      # row tile: multiple of 8 sublanes
    Mp = _round_up(M, TM)

    if Mp != M:                               # zero rows; sliced off below
        patches = jnp.pad(patches, ((0, Mp - M), (0, 0)))
    if Cp != Cout:
        w_mat = jnp.pad(w_mat, ((0, 0), (0, Cp - Cout)))
    b_p = jnp.pad(b.astype(jnp.float32), (0, Cp - Cout)).reshape(1, Cp)
    g_p = jnp.pad(gamma.astype(jnp.float32), (0, Cp - Cout)).reshape(1, Cp)
    beta_p = jnp.pad(beta.astype(jnp.float32), (0, Cp - Cout)).reshape(1, Cp)

    if mxu_dtype is not None:                 # optional bf16 MXU path
        patches = patches.astype(mxu_dtype)
        w_mat = w_mat.astype(mxu_dtype)

    # VMEM budget from actual block sizes (double-buffered) + 1 MiB headroom,
    # capped well below v7x's 64 MiB physical VMEM.
    itm = patches.dtype.itemsize
    vmem_bytes = 2 * (TM * K * itm + K * Cp * itm + TM * Cp * 4 + 3 * Cp * 4) + (1 << 20)
    vmem_limit = int(min(32 * 1024 * 1024, max(4 * 1024 * 1024, vmem_bytes)))

    out = pl.pallas_call(
        functools.partial(_conv3x3_ln_kernel, c_real=Cout, eps=eps),
        out_shape=jax.ShapeDtypeStruct((Mp, Cp), jnp.float32),
        grid=(Mp // TM,),
        in_specs=[
            pl.BlockSpec((TM, K), lambda i: (i, 0)),   # patches: tiled over rows
            pl.BlockSpec((K, Cp), lambda i: (0, 0)),   # weight: grid-invariant
            pl.BlockSpec((1, Cp), lambda i: (0, 0)),   # conv bias
            pl.BlockSpec((1, Cp), lambda i: (0, 0)),   # LN gamma
            pl.BlockSpec((1, Cp), lambda i: (0, 0)),   # LN beta
        ],
        out_specs=pl.BlockSpec((TM, Cp), lambda i: (i, 0)),  # dense 128-wide stores
        compiler_params=pltpu.CompilerParams(
            dimension_semantics=("parallel",),
            vmem_limit_bytes=vmem_limit),
    )(patches, w_mat, b_p, g_p, beta_p)

    return out[:M, :Cout].reshape(B, H, W, Cout)


# ----------------------------- pure-JAX reference ----------------------------
def downsample_layer_ref(x, w, b, gamma, beta, eps=LN_EPS):
    y = jax.lax.conv_general_dilated(
        x, jnp.transpose(w, (2, 3, 1, 0)),             # OIHW -> HWIO
        window_strides=(1, 1), padding=((1, 1), (1, 1)),
        dimension_numbers=('NHWC', 'HWIO', 'NHWC'))
    y = y + b
    mean = jnp.mean(y, axis=-1, keepdims=True)
    var = jnp.mean(jnp.square(y - mean), axis=-1, keepdims=True)
    return (y - mean) * jax.lax.rsqrt(var + eps) * gamma + beta


# ----------------------------- main -------------------------------------------
if __name__ == "__main__":
    key = jax.random.PRNGKey(0)
    kx, kw, kb, kg, kbe = jax.random.split(key, 5)

    # Module defaults: in_channels=96 -> out_channels=198, 3x3 stride-1 conv.
    B, H, W, Cin, Cout = 2, 16, 16, 96, 198
    x = jax.random.normal(kx, (B, H, W, Cin), jnp.float32)            # channels-last
    w = 0.02 * jax.random.normal(kw, (Cout, Cin, 3, 3), jnp.float32)  # torch OIHW
    b = 0.02 * jax.random.normal(kb, (Cout,), jnp.float32)
    gamma = 1.0 + 0.02 * jax.random.normal(kg, (Cout,), jnp.float32)
    beta = 0.02 * jax.random.normal(kbe, (Cout,), jnp.float32)

    fwd = jax.jit(downsample_layer)
    out = jax.block_until_ready(fwd(x, w, b, gamma, beta))
    assert out.shape == (B, H, W, Cout), out.shape
    assert bool(jnp.isfinite(out).all())

    ref = downsample_layer_ref(x, w, b, gamma, beta)
    err = float(jnp.max(jnp.abs(out - ref)))
    assert err < 5e-2, f"f32 path max abs err {err}"

    # Optional bf16 MXU path (f32 accumulation; LayerNorm stats stay in f32).
    fwd_bf16 = jax.jit(functools.partial(downsample_layer, mxu_dtype=jnp.bfloat16))
    out16 = jax.block_until_ready(fwd_bf16(x, w, b, gamma, beta))
    err16 = float(jnp.max(jnp.abs(out16 - ref)))
    assert err16 < 2e-1, f"bf16 path max abs err {err16}"

    print("KERNEL_OK")
</pallas_src>

<mosaic_0001>
module attributes {stable_mosaic.version = 11 : i64} {
  func.func @_conv3x3_ln_kernel(%arg0: i32, %arg1: memref<256x864xf32, #tpu.memory_space<vmem>>, %arg2: memref<864x256xf32, #tpu.memory_space<vmem>>, %arg3: memref<1x256xf32, #tpu.memory_space<vmem>>, %arg4: memref<1x256xf32, #tpu.memory_space<vmem>>, %arg5: memref<1x256xf32, #tpu.memory_space<vmem>>, %arg6: memref<256x256xf32, #tpu.memory_space<vmem>>) attributes {dimension_semantics = [#tpu.dimension_semantics<parallel>], iteration_bounds = array<i64: 2>, scalar_prefetch = 0 : i64, scratch_operands = 0 : i64, tpu.core_type = #tpu.core_type<tc>, window_params = [{transform_indices = @transform_0, window_bounds = array<i64: 256, 864>}, {pipeline_mode = #tpu.pipeline_mode<synchronous>, transform_indices = @transform_1, window_bounds = array<i64: 864, 256>}, {pipeline_mode = #tpu.pipeline_mode<synchronous>, transform_indices = @transform_2, window_bounds = array<i64: 1, 256>}, {pipeline_mode = #tpu.pipeline_mode<synchronous>, transform_indices = @transform_3, window_bounds = array<i64: 1, 256>}, {pipeline_mode = #tpu.pipeline_mode<synchronous>, transform_indices = @transform_4, window_bounds = array<i64: 1, 256>}, {transform_indices = @transform_5, window_bounds = array<i64: 256, 256>}]} {
    %c0 = arith.constant 0 : index
    %c0_0 = arith.constant 0 : index
    %0 = vector.load %arg1[%c0, %c0_0] : memref<256x864xf32, #tpu.memory_space<vmem>>, vector<256x864xf32>
    %c0_1 = arith.constant 0 : index
    %c0_2 = arith.constant 0 : index
    %1 = vector.load %arg2[%c0_1, %c0_2] : memref<864x256xf32, #tpu.memory_space<vmem>>, vector<864x256xf32>
    %cst = arith.constant dense<0.000000e+00> : vector<256x256xf32>
    %2 = tpu.matmul %0, %1, %cst {dimension_numbers = #tpu.dot_dimension_numbers<[1], [0], [0], [1], [0, 0, 1, 1], [], []>} : vector<256x864xf32>, vector<864x256xf32>, vector<256x256xf32> -> vector<256x256xf32>
    %c0_3 = arith.constant 0 : index
    %c0_4 = arith.constant 0 : index
    %3 = vector.load %arg3[%c0_3, %c0_4] : memref<1x256xf32, #tpu.memory_space<vmem>>, vector<1x256xf32>
    %4 = vector.broadcast %3 : vector<1x256xf32> to vector<256x256xf32>
    %5 = arith.addf %2, %4 : vector<256x256xf32>
    %cst_5 = arith.constant dense<0.000000e+00> : vector<256xf32>
    %6 = vector.multi_reduction <add>, %5, %cst_5 [1] : vector<256x256xf32> to vector<256xf32>
    %7 = vector.shape_cast %6 : vector<256xf32> to vector<256x1xf32>
    %cst_6 = arith.constant 0.00505050505 : f32
    %8 = vector.broadcast %cst_6 : f32 to vector<256x1xf32>
    %9 = arith.mulf %7, %8 : vector<256x1xf32>
    %10 = vector.broadcast %9 : vector<256x1xf32> to vector<256x256xf32>
    %11 = arith.subf %5, %10 : vector<256x256xf32>
    %12 = tpu.iota {dimensions = array<i32: 1>} : vector<256x256xi32>
    %c198_i32 = arith.constant 198 : i32
    %13 = vector.broadcast %c198_i32 : i32 to vector<256x256xi32>
    %14 = arith.cmpi slt, %12, %13 : vector<256x256xi32>
    %cst_7 = arith.constant 0.000000e+00 : f32
    %15 = vector.broadcast %cst_7 : f32 to vector<256x256xf32>
    %16 = arith.select %14, %11, %15 : vector<256x256xi1>, vector<256x256xf32>
    %17 = arith.mulf %16, %16 : vector<256x256xf32>
    %cst_8 = arith.constant dense<0.000000e+00> : vector<256xf32>
    %18 = vector.multi_reduction <add>, %17, %cst_8 [1] : vector<256x256xf32> to vector<256xf32>
    %19 = vector.shape_cast %18 : vector<256xf32> to vector<256x1xf32>
    %cst_9 = arith.constant 0.00505050505 : f32
    %20 = vector.broadcast %cst_9 : f32 to vector<256x1xf32>
    %21 = arith.mulf %19, %20 : vector<256x1xf32>
    %cst_10 = arith.constant 9.99999997E-7 : f32
    %22 = vector.broadcast %cst_10 : f32 to vector<256x1xf32>
    %23 = arith.addf %21, %22 : vector<256x1xf32>
    %24 = math.rsqrt %23 : vector<256x1xf32>
    %25 = vector.broadcast %24 : vector<256x1xf32> to vector<256x256xf32>
    %26 = arith.mulf %16, %25 : vector<256x256xf32>
    %c0_11 = arith.constant 0 : index
    %c0_12 = arith.constant 0 : index
    %27 = vector.load %arg4[%c0_11, %c0_12] : memref<1x256xf32, #tpu.memory_space<vmem>>, vector<1x256xf32>
    %28 = vector.broadcast %27 : vector<1x256xf32> to vector<256x256xf32>
    %29 = arith.mulf %26, %28 : vector<256x256xf32>
    %c0_13 = arith.constant 0 : index
    %c0_14 = arith.constant 0 : index
    %30 = vector.load %arg5[%c0_13, %c0_14] : memref<1x256xf32, #tpu.memory_space<vmem>>, vector<1x256xf32>
    %31 = vector.broadcast %30 : vector<1x256xf32> to vector<256x256xf32>
    %32 = arith.addf %29, %31 : vector<256x256xf32>
    %c0_15 = arith.constant 0 : index
    %c0_16 = arith.constant 0 : index
    %33 = vector.load %arg6[%c0_15, %c0_16] : memref<256x256xf32, #tpu.memory_space<vmem>>, vector<256x256xf32>
    tpu.vector_store %arg6[%c0_15, %c0_16], %32 {strides = array<i32>} : memref<256x256xf32, #tpu.memory_space<vmem>>, vector<256x256xf32>,
    return
  }
  func.func @transform_0(%arg0: i32) -> (i32, i32) {
    %c0_i32 = arith.constant 0 : i32
    %c0_i32_0 = arith.constant 0 : i32
    return %arg0, %c0_i32 : i32, i32
  }
  func.func @transform_1(%arg0: i32) -> (i32, i32) {
    %c0_i32 = arith.constant 0 : i32
    %c0_i32_0 = arith.constant 0 : i32
    %c0_i32_1 = arith.constant 0 : i32
    return %c0_i32, %c0_i32_0 : i32, i32
  }
  func.func @transform_2(%arg0: i32) -> (i32, i32) {
    %c0_i32 = arith.constant 0 : i32
    %c0_i32_0 = arith.constant 0 : i32
    %c0_i32_1 = arith.constant 0 : i32
    return %c0_i32, %c0_i32_0 : i32, i32
  }
  func.func @transform_3(%arg0: i32) -> (i32, i32) {
    %c0_i32 = arith.constant 0 : i32
    %c0_i32_0 = arith.constant 0 : i32
    %c0_i32_1 = arith.constant 0 : i32
    return %c0_i32, %c0_i32_0 : i32, i32
  }
  func.func @transform_4(%arg0: i32) -> (i32, i32) {
    %c0_i32 = arith.constant 0 : i32
    %c0_i32_0 = arith.constant 0 : i32
    %c0_i32_1 = arith.constant 0 : i32
    return %c0_i32, %c0_i32_0 : i32, i32
  }
  func.func @transform_5(%arg0: i32) -> (i32, i32) {
    %c0_i32 = arith.constant 0 : i32
    %c0_i32_0 = arith.constant 0 : i32
    return %arg0, %c0_i32 : i32, i32
  }
}

</mosaic_0001>

<bundles_post_ra>
// kernel: downsample_layer.1
= control target key start
LH: loop header
LB: loop body
LE: loop exit
PB: predicated region body
PF: predicated region fallthrough
CT: control target
= control target key end

     0   :  { %10 = vsyncpa [#allocation3], 0  ;;  %s5396_s0 = inlined_call_operand.vmem [shape: f32[512,864], index: 0, kind: input, shape index: {}]   ;;  %s5397_s1 = inlined_call_operand.vmem [shape: f32[864,256], index: 1, kind: input, shape index: {}]   ;;  %s5398_s2 = inlined_call_operand.vmem [shape: f32[1,256], index: 2, kind: input, shape index: {}]   ;;  %s5399_s3 = inlined_call_operand.vmem [shape: f32[1,256], index: 3, kind: input, shape index: {}]   ;;  %s5400_s4 = inlined_call_operand.vmem [shape: f32[1,256], index: 4, kind: input, shape index: {}]   ;;  %s5401_s5 = inlined_call_operand.hbm [shape: f32[512,256], index: 5, kind: output, shape index: {}]  }
   0x1   :  { %12 = vsyncpa [#allocation3 + $0x1], 0  ;;  %s3404_s18 = smov 0   ;;  %s3406_s19 = smov 0  }
   0x2   :  { %s3408_s20 = smov 0   ;;  %s3410_s21 = smov 0  }
   0x3 LB: > { %s3425_s22 = sadd.s32 4294967295, %s3368_s21   ;;  %s2680_s23 = sadd.s32 4294967294, %s3368_s21   ;;  %s3368_s21 = sphi %s3410_s21, %s5514_s21   ;;  %s3364_s20 = sphi %s3408_s20, %s5513_s20   ;;  %s3360_s19 = sphi %s3406_s19, %s5512_s19   ;;  %s3356_s18 = sphi %s3404_s18, %s5511_s18  }
   0x4   : > { %s3429_s24 = sadd.s32 1, %s3368_s21   ;;  %s135_s25 = sadd.s32 1, %s3364_s20 }
   0x5   : > { %s132_s26 = ssub.s32 %s3368_s21, %s3429_s24  ;;  %p145_p0 = scmp.ne.s32.totalorder %s3364_s20, %s3360_s19 }
   0x6   : > { %p133_p1 = scmp.eq.s32.totalorder %s132_s26, 0  ;;  %p146_p2 = scmp.eq.s32.totalorder %s3425_s22, 1 }
   0x7   : > { %p151_p3 = scmp.ne.s32.totalorder %s3360_s19, %s3356_s18  ;;  %p152_p4 = scmp.eq.s32.totalorder %s2680_s23, 1 }
   0x8   : > { %s3440_s27 = scalar_select %p133_p1, %s3364_s20, %s135_s25  }
   0x9   : > { %p3442_p5 = por %p146_p2, %p145_p0  ;;  %p3446_p6 = por %p152_p4, %p151_p3 }
   0xa   : > { %p2683_p7 = scmp.ge.s32.totalorder %s3368_s21, 1  ;;  %p192_p8 = scmp.lt.s32.totalorder %s3368_s21, 3 }
   0xc   : > { %p193_p9 = pnand %p2683_p7, %p192_p8 }
   0xe   : > { %196 = sbr.rel (%p193_p9) target bundleno = 888 (0x378), region = 40 }
  0x15   : > { %v454_v0 = vld [vmem:[%s5397_s1 + $0x8] sm:$0xff]  ;;  %v456_v1 = vld [vmem:[%s5397_s1 + $0x18] sm:$0xff]  ;;  %v453_v5 = vld [vmem:[%s5397_s1] sm:$0xff]  ;;  %s2685_s13 = sshll.u32 %s3425_s22, 5  ;;  %vm681_vm0 = vcmask 785408   ;;  %s218_s30 = sand.u32 1, %s3360_s19  }
  0x16   : > { %v582_v2 = vld [vmem:[%s5397_s1 + $0x408] sm:$0xff]  ;;  %v2727_v3 = vpack.c.bf16 %v456_v1, %v454_v0  ;;  %v584_v4 = vld [vmem:[%s5397_s1 + $0x418] sm:$0xff]  ;;  %v455_v6 = vld [vmem:[%s5397_s1 + $0x10] sm:$0xff]  ;;  %p3659_p10 = scmp.lt.s32.totalorder %s2685_s13, 63  ;;  %s2684_s6 = sshll.u32 %s218_s30, 9 }
  0x17   : > { %v2855_v7 = vpack.c.bf16 %v584_v4, %v582_v2  ;;  %v2729_v8 = vpack.c.bf16 %v455_v6, %v453_v5  ;;  %v581_v9 = vld [vmem:[%s5397_s1 + $0x400] sm:$0xff]  ;;  %v583_v10 = vld [vmem:[%s5397_s1 + $0x410] sm:$0xff]  ;;  %v458_v11 = vld [vmem:[%s5397_s1 + $0x28] sm:$0xff]  ;;  %s5094_s15 = scalar_lea.vmem [#allocation2], %s2684_s6  ;;  %s2726_s8 = sshll.u32 %s3425_s22, 13 }
  0x18   : > { %2728 = vmatprep.subr.bf16.mxu1 %v2727_v3  ;;  %v2857_v12 = vpack.c.bf16 %v583_v10, %v581_v9  ;;  %v460_v13 = vld [vmem:[%s5397_s1 + $0x38] sm:$0xff]  ;;  %v586_v14 = vld [vmem:[%s5397_s1 + $0x428] sm:$0xff]  ;;  %v457_v18 = vld [vmem:[%s5397_s1 + $0x20] sm:$0xff]  ;;  %s5516_s13 = smov (!%p3659_p10, %s2685_s13), 63  ;;  %s5345_s11 = scalar_lea.hbm %s5401_s5, %s2726_s8 }
  0x19   : > { %v588_v15 = vld [vmem:[%s5397_s1 + $0x438] sm:$0xff]  ;;  %2856 = vmatprep.subr.bf16.mxu0 %v2855_v7  ;;  %2730 = vmatpush1.bf16.msra.mxu1 %v2729_v8  ;;  %v2731_v16 = vpack.c.bf16 %v460_v13, %v458_v11  ;;  %v459_v19 = vld [vmem:[%s5397_s1 + $0x30] sm:$0xff]  ;;  %v585_v20 = vld [vmem:[%s5397_s1 + $0x420] sm:$0xff]  ;;  %s3199_s25 = smul.u32 56, %s5516_s13  ;;  %s2618_s13 = sshll.u32 %s5094_s15, 4  ;;  %s5347_s13 = int_to_ptr.vmem [resolvable:$true] %s2618_s13 }
  0x1a   : > { %v2859_v17 = vpack.c.bf16 %v588_v15, %v586_v14  ;;  %2858 = vmatpush1.bf16.msra.mxu0 %v2857_v12  ;;  %v2733_v21 = vpack.c.bf16 %v459_v19, %v457_v18  ;;  %v587_v22 = vld [vmem:[%s5397_s1 + $0x430] sm:$0xff]  ;;  %v462_v23 = vld [vmem:[%s5397_s1 + $0x48] sm:$0xff]  ;;  %v464_v24 = vld [vmem:[%s5397_s1 + $0x58] sm:$0xff]  ;;  %s5355_s22 = scalar_lea.sflag [#allocation3], %s218_s30  ;;  %s3371_s12 = smov [#allocation2]  }
  0x1b   : > { %2732 = vmatprep.subr.bf16.mxu1 %v2731_v16  ;;  %v2861_v25 = vpack.c.bf16 %v587_v22, %v585_v20  ;;  %v2735_v26 = vpack.c.bf16 %v464_v24, %v462_v23  ;;  %v590_v27 = vld [vmem:[%s5397_s1 + $0x448] sm:$0xff]  ;;  %v592_v28 = vld [vmem:[%s5397_s1 + $0x458] sm:$0xff]  ;;  %v461_v29 = vld [vmem:[%s5397_s1 + $0x40] sm:$0xff]  ;;  %s3745_s7 = scalar_lea.vmem %s5396_s0, %s3199_s25  ;;  %s3306_s25 = scalar_lea.vmem %s5347_s13, 8192 }
  0x1c   : > { %2860 = vmatprep.subr.bf16.mxu0 %v2859_v17  ;;  %v2863_v30 = vpack.c.bf16 %v592_v28, %v590_v27  ;;  %v463_v31 = vld [vmem:[%s5397_s1 + $0x50] sm:$0xff]  ;;  %v589_v32 = vld [vmem:[%s5397_s1 + $0x440] sm:$0xff]  ;;  %v466_v35 = vld [vmem:[%s5397_s1 + $0x68] sm:$0xff]  ;;  %p3307_p11 = scmp.ne.s32.totalorder %s5347_s13, %s3306_s25  ;;  %s3310_s14 = sshll.u32 %s3371_s12, 4  ;;  %s3311_s14 = int_to_ptr.vmem [resolvable:$false] %s3310_s14 }
  0x1d   : > { %v591_v33 = vld [vmem:[%s5397_s1 + $0x450] sm:$0xff]  ;;  %2734 = vmatpush1.bf16.msra.mxu1 %v2733_v21  ;;  %v2737_v34 = vpack.c.bf16 %v463_v31, %v461_v29  ;;  %v468_v36 = vld [vmem:[%s5397_s1 + $0x78] sm:$0xff]  ;;  %v594_v37 = vld [vmem:[%s5397_s1 + $0x468] sm:$0xff]  ;;  %s3312_s16 = scalar_lea.vmem %s3311_s14, 16384  ;;  %p3313_p0 = scmp.lt.s32.totalorder %s5347_s13, %s3311_s14 }
  0x1e   : > { %2862 = vmatpush1.bf16.msra.mxu0 %v2861_v25  ;;  %2736 = vmatprep.subr.bf16.mxu1 %v2735_v26  ;;  %v2865_v38 = vpack.c.bf16 %v591_v33, %v589_v32  ;;  %v2739_v39 = vpack.c.bf16 %v468_v36, %v466_v35  ;;  %v596_v40 = vld [vmem:[%s5397_s1 + $0x478] sm:$0xff]  ;;  %v465_v41 = vld [vmem:[%s5397_s1 + $0x60] sm:$0xff]  ;;  %v467_v42 = vld [vmem:[%s5397_s1 + $0x70] sm:$0xff]  ;;  %p3308_p12 = pnand %p3307_p11, %p3442_p5  ;;  %p3314_p1 = scmp.lt.s32.totalorder %s3312_s16, %s3306_s25 }
  0x1f   : > { %2864 = vmatprep.subr.bf16.mxu0 %v2863_v30  ;;  %v2867_v43 = vpack.c.bf16 %v596_v40, %v594_v37  ;;  %v593_v44 = vld [vmem:[%s5397_s1 + $0x460] sm:$0xff]  ;;  %v595_v45 = vld [vmem:[%s5397_s1 + $0x470] sm:$0xff]  ;;  %v470_v46 = vld [vmem:[%s5397_s1 + $0x88] sm:$0xff]  ;;  %v2741_v50 = vpack.c.bf16 %v467_v42, %v465_v41 }
  0x20   : > { %v472_v47 = vld [vmem:[%s5397_s1 + $0x98] sm:$0xff]  ;;  %v598_v48 = vld [vmem:[%s5397_s1 + $0x488] sm:$0xff]  ;;  %v2869_v51 = vpack.c.bf16 %v595_v45, %v593_v44  ;;  %v469_v53 = vld [vmem:[%s5397_s1 + $0x80] sm:$0xff]  ;;  %p3309_p13 = pneg %p3308_p12  ;;  %p3315_p2 = por %p3314_p1, %p3313_p0 }
  0x21   : > { %v600_v49 = vld [vmem:[%s5397_s1 + $0x498] sm:$0xff]  ;;  %2738 = vmatpush1.bf16.msra.mxu1 %v2737_v34  ;;  %v2743_v52 = vpack.c.bf16 %v472_v47, %v470_v46  ;;  %v471_v54 = vld [vmem:[%s5397_s1 + $0x90] sm:$0xff]  ;;  %v597_v55 = vld [vmem:[%s5397_s1 + $0x480] sm:$0xff] }
  0x22   : > { %2866 = vmatpush1.bf16.msra.mxu0 %v2865_v38  ;;  %2740 = vmatprep.subr.bf16.mxu1 %v2739_v39  ;;  %v2871_v56 = vpack.c.bf16 %v600_v49, %v598_v48  ;;  %v599_v57 = vld [vmem:[%s5397_s1 + $0x490] sm:$0xff]  ;;  %v474_v58 = vld [vmem:[%s5397_s1 + $0xa8] sm:$0xff]  ;;  %v476_v59 = vld [vmem:[%s5397_s1 + $0xb8] sm:$0xff]  ;;  %v2745_v62 = vpack.c.bf16 %v471_v54, %v469_v53  ;;  %p3316_p3 = pnand %p3315_p2, %p3309_p13 }
  0x23   : > { %2868 = vmatprep.subr.bf16.mxu0 %v2867_v43  ;;  %v602_v60 = vld [vmem:[%s5397_s1 + $0x4a8] sm:$0xff]  ;;  %v604_v61 = vld [vmem:[%s5397_s1 + $0x4b8] sm:$0xff]  ;;  %v2873_v63 = vpack.c.bf16 %v599_v57, %v597_v55  ;;  %v2747_v0 = vpack.c.bf16 %v476_v59, %v474_v58  ;;  %v473_v1 = vld [vmem:[%s5397_s1 + $0xa0] sm:$0xff] }
  0x24   : > { %v475_v2 = vld [vmem:[%s5397_s1 + $0xb0] sm:$0xff]  ;;  %v601_v3 = vld [vmem:[%s5397_s1 + $0x4a0] sm:$0xff]  ;;  %v2875_v4 = vpack.c.bf16 %v604_v61, %v602_v60  ;;  %v478_v6 = vld [vmem:[%s5397_s1 + $0xc8] sm:$0xff] }
  0x25   : > { %2742 = vmatpush1.bf16.msra.mxu1 %v2741_v50  ;;  %v603_v5 = vld [vmem:[%s5397_s1 + $0x4b0] sm:$0xff]  ;;  %v480_v7 = vld [vmem:[%s5397_s1 + $0xd8] sm:$0xff]  ;;  %v606_v8 = vld [vmem:[%s5397_s1 + $0x4c8] sm:$0xff]  ;;  %v2749_v10 = vpack.c.bf16 %v475_v2, %v473_v1 }
  0x26   : > { %2870 = vmatpush1.bf16.msra.mxu0 %v2869_v51  ;;  %2744 = vmatprep.subr.bf16.mxu1 %v2743_v52  ;;  %v608_v9 = vld [vmem:[%s5397_s1 + $0x4d8] sm:$0xff]  ;;  %v2877_v11 = vpack.c.bf16 %v603_v5, %v601_v3  ;;  %v2751_v12 = vpack.c.bf16 %v480_v7, %v478_v6  ;;  %v477_v13 = vld [vmem:[%s5397_s1 + $0xc0] sm:$0xff]  ;;  %v479_v14 = vld [vmem:[%s5397_s1 + $0xd0] sm:$0xff] }
  0x27   : > { %2872 = vmatprep.subr.bf16.mxu0 %v2871_v56  ;;  %v605_v15 = vld [vmem:[%s5397_s1 + $0x4c0] sm:$0xff]  ;;  %v2879_v16 = vpack.c.bf16 %v608_v9, %v606_v8  ;;  %v607_v17 = vld [vmem:[%s5397_s1 + $0x4d0] sm:$0xff]  ;;  %v482_v18 = vld [vmem:[%s5397_s1 + $0xe8] sm:$0xff]  ;;  %v2753_v22 = vpack.c.bf16 %v479_v14, %v477_v13 }
  0x28   : > { %v484_v19 = vld [vmem:[%s5397_s1 + $0xf8] sm:$0xff]  ;;  %v610_v20 = vld [vmem:[%s5397_s1 + $0x4e8] sm:$0xff]  ;;  %v2881_v23 = vpack.c.bf16 %v607_v17, %v605_v15  ;;  %v481_v25 = vld [vmem:[%s5397_s1 + $0xe0] sm:$0xff] }
  0x29   : > { %2746 = vmatpush1.bf16.msra.mxu1 %v2745_v62  ;;  %v612_v21 = vld [vmem:[%s5397_s1 + $0x4f8] sm:$0xff]  ;;  %v2755_v24 = vpack.c.bf16 %v484_v19, %v482_v18  ;;  %v483_v26 = vld [vmem:[%s5397_s1 + $0xf0] sm:$0xff]  ;;  %v609_v27 = vld [vmem:[%s5397_s1 + $0x4e0] sm:$0xff] }
  0x2a   : > { %2874 = vmatpush1.bf16.msra.mxu0 %v2873_v63  ;;  %2748 = vmatprep.subr.bf16.mxu1 %v2747_v0  ;;  %v2883_v28 = vpack.c.bf16 %v612_v21, %v610_v20  ;;  %v611_v29 = vld [vmem:[%s5397_s1 + $0x4f0] sm:$0xff]  ;;  %v486_v30 = vld [vmem:[%s5397_s1 + $0x108] sm:$0xff]  ;;  %v488_v31 = vld [vmem:[%s5397_s1 + $0x118] sm:$0xff]  ;;  %v2757_v34 = vpack.c.bf16 %v483_v26, %v481_v25 }
  0x2b   : > { %2876 = vmatprep.subr.bf16.mxu0 %v2875_v4  ;;  %v614_v32 = vld [vmem:[%s5397_s1 + $0x508] sm:$0xff]  ;;  %v616_v33 = vld [vmem:[%s5397_s1 + $0x518] sm:$0xff]  ;;  %v2885_v35 = vpack.c.bf16 %v611_v29, %v609_v27  ;;  %v2759_v36 = vpack.c.bf16 %v488_v31, %v486_v30  ;;  %v485_v37 = vld [vmem:[%s5397_s1 + $0x100] sm:$0xff] }
  0x2c   : > { %v487_v38 = vld [vmem:[%s5397_s1 + $0x110] sm:$0xff]  ;;  %v613_v39 = vld [vmem:[%s5397_s1 + $0x500] sm:$0xff]  ;;  %v2887_v40 = vpack.c.bf16 %v616_v33, %v614_v32  ;;  %v490_v42 = vld [vmem:[%s5397_s1 + $0x128] sm:$0xff] }
  0x2d   : > { %2750 = vmatpush1.bf16.msra.mxu1 %v2749_v10  ;;  %v615_v41 = vld [vmem:[%s5397_s1 + $0x510] sm:$0xff]  ;;  %v492_v43 = vld [vmem:[%s5397_s1 + $0x138] sm:$0xff]  ;;  %v618_v44 = vld [vmem:[%s5397_s1 + $0x528] sm:$0xff]  ;;  %v2761_v46 = vpack.c.bf16 %v487_v38, %v485_v37 }
  0x2e   : > { %2878 = vmatpush1.bf16.msra.mxu0 %v2877_v11  ;;  %2752 = vmatprep.subr.bf16.mxu1 %v2751_v12  ;;  %v620_v45 = vld [vmem:[%s5397_s1 + $0x538] sm:$0xff]  ;;  %v2889_v47 = vpack.c.bf16 %v615_v41, %v613_v39  ;;  %v2763_v48 = vpack.c.bf16 %v492_v43, %v490_v42  ;;  %v489_v49 = vld [vmem:[%s5397_s1 + $0x120] sm:$0xff]  ;;  %v491_v50 = vld [vmem:[%s5397_s1 + $0x130] sm:$0xff] }
  0x2f   : > { %2880 = vmatprep.subr.bf16.mxu0 %v2879_v16  ;;  %v617_v51 = vld [vmem:[%s5397_s1 + $0x520] sm:$0xff]  ;;  %v2891_v52 = vpack.c.bf16 %v620_v45, %v618_v44  ;;  %v619_v53 = vld [vmem:[%s5397_s1 + $0x530] sm:$0xff]  ;;  %v494_v54 = vld [vmem:[%s5397_s1 + $0x148] sm:$0xff]  ;;  %v2765_v58 = vpack.c.bf16 %v491_v50, %v489_v49 }
  0x30   : > { %v496_v55 = vld [vmem:[%s5397_s1 + $0x158] sm:$0xff]  ;;  %v622_v56 = vld [vmem:[%s5397_s1 + $0x548] sm:$0xff]  ;;  %v2893_v59 = vpack.c.bf16 %v619_v53, %v617_v51  ;;  %v493_v61 = vld [vmem:[%s5397_s1 + $0x140] sm:$0xff] }
  0x31   : > { %2754 = vmatpush1.bf16.msra.mxu1 %v2753_v22  ;;  %v624_v57 = vld [vmem:[%s5397_s1 + $0x558] sm:$0xff]  ;;  %v2767_v60 = vpack.c.bf16 %v496_v55, %v494_v54  ;;  %v495_v62 = vld [vmem:[%s5397_s1 + $0x150] sm:$0xff]  ;;  %v621_v63 = vld [vmem:[%s5397_s1 + $0x540] sm:$0xff] }
  0x32   : > { %2882 = vmatpush1.bf16.msra.mxu0 %v2881_v23  ;;  %2756 = vmatprep.subr.bf16.mxu1 %v2755_v24  ;;  %v2895_v0 = vpack.c.bf16 %v624_v57, %v622_v56  ;;  %v623_v1 = vld [vmem:[%s5397_s1 + $0x550] sm:$0xff]  ;;  %v498_v2 = vld [vmem:[%s5397_s1 + $0x168] sm:$0xff]  ;;  %v500_v3 = vld [vmem:[%s5397_s1 + $0x178] sm:$0xff]  ;;  %v2769_v6 = vpack.c.bf16 %v495_v62, %v493_v61 }
  0x33   : > { %2884 = vmatprep.subr.bf16.mxu0 %v2883_v28  ;;  %v626_v4 = vld [vmem:[%s5397_s1 + $0x568] sm:$0xff]  ;;  %v628_v5 = vld [vmem:[%s5397_s1 + $0x578] sm:$0xff]  ;;  %v497_v7 = vld [vmem:[%s5397_s1 + $0x160] sm:$0xff]  ;;  %v2897_v8 = vpack.c.bf16 %v623_v1, %v621_v63  ;;  %v2771_v9 = vpack.c.bf16 %v500_v3, %v498_v2 }
  0x34   : > { %v499_v10 = vld [vmem:[%s5397_s1 + $0x170] sm:$0xff]  ;;  %v625_v11 = vld [vmem:[%s5397_s1 + $0x560] sm:$0xff]  ;;  %v2899_v13 = vpack.c.bf16 %v628_v5, %v626_v4  ;;  %v502_v14 = vld [vmem:[%s5397_s1 + $0x188] sm:$0xff] }
  0x35   : > { %2758 = vmatpush1.bf16.msra.mxu1 %v2757_v34  ;;  %v627_v12 = vld [vmem:[%s5397_s1 + $0x570] sm:$0xff]  ;;  %v504_v15 = vld [vmem:[%s5397_s1 + $0x198] sm:$0xff]  ;;  %v230_v16 = vld [vmem:[%s3745_s7 + $0x8] sm:$0xff]  ;;  %v2773_v20 = vpack.c.bf16 %v499_v10, %v497_v7 }
  0x36   : > { %2886 = vmatpush1.bf16.msra.mxu0 %v2885_v35  ;;  %2760 = vmatprep.subr.bf16.mxu1 %v2759_v36  ;;  %v630_v17 = vld [vmem:[%s5397_s1 + $0x588] sm:$0xff]  ;;  %v632_v18 = vld [vmem:[%s5397_s1 + $0x598] sm:$0xff]  ;;  %v2901_v21 = vpack.c.bf16 %v627_v12, %v625_v11  ;;  %v2775_v22 = vpack.c.bf16 %v504_v15, %v502_v14  ;;  %v501_v23 = vld [vmem:[%s5397_s1 + $0x180] sm:$0xff] }
  0x37   : > { %2888 = vmatprep.subr.bf16.mxu0 %v2887_v40  ;;  %842 = vmatprep.mubr.f32.mxu1 %v230_v16  ;;  %v234_v19 = vld [vmem:[%s3745_s7 + $0x28] sm:$0xff]  ;;  %v503_v24 = vld [vmem:[%s5397_s1 + $0x190] sm:$0xff]  ;;  %v629_v25 = vld [vmem:[%s5397_s1 + $0x580] sm:$0xff]  ;;  %v2903_v26 = vpack.c.bf16 %v632_v18, %v630_v17 }
  0x38   : > { %1356 = vmatprep.mubr.f32.mxu0 %v234_v19  ;;  %v631_v27 = vld [vmem:[%s5397_s1 + $0x590] sm:$0xff]  ;;  %v506_v28 = vld [vmem:[%s5397_s1 + $0x1a8] sm:$0xff]  ;;  %v508_v29 = vld [vmem:[%s5397_s1 + $0x1b8] sm:$0xff]  ;;  %v2777_v32 = vpack.c.bf16 %v503_v24, %v501_v23 }
  0x39   : > { %2762 = vmatpush1.bf16.msra.mxu1 %v2761_v46  ;;  %v634_v30 = vld [vmem:[%s5397_s1 + $0x5a8] sm:$0xff]  ;;  %v636_v31 = vld [vmem:[%s5397_s1 + $0x5b8] sm:$0xff]  ;;  %v2905_v33 = vpack.c.bf16 %v631_v27, %v629_v25  ;;  %v2779_v34 = vpack.c.bf16 %v508_v29, %v506_v28  ;;  %v505_v35 = vld [vmem:[%s5397_s1 + $0x1a0] sm:$0xff] }
  0x3a   : > { %2890 = vmatpush1.bf16.msra.mxu0 %v2889_v47  ;;  %2764 = vmatprep.subr.bf16.mxu1 %v2763_v48  ;;  %v507_v36 = vld [vmem:[%s5397_s1 + $0x1b0] sm:$0xff]  ;;  %v633_v37 = vld [vmem:[%s5397_s1 + $0x5a0] sm:$0xff]  ;;  %v2907_v38 = vpack.c.bf16 %v636_v31, %v634_v30  ;;  %v510_v40 = vld [vmem:[%s5397_s1 + $0x1c8] sm:$0xff] }
  0x3b   : > { %2892 = vmatprep.subr.bf16.mxu0 %v2891_v52  ;;  %v635_v39 = vld [vmem:[%s5397_s1 + $0x5b0] sm:$0xff]  ;;  %v512_v41 = vld [vmem:[%s5397_s1 + $0x1d8] sm:$0xff]  ;;  %v638_v42 = vld [vmem:[%s5397_s1 + $0x5c8] sm:$0xff]  ;;  %v2781_v44 = vpack.c.bf16 %v507_v36, %v505_v35 }
  0x3c   : > { %v640_v43 = vld [vmem:[%s5397_s1 + $0x5d8] sm:$0xff]  ;;  %v2909_v45 = vpack.c.bf16 %v635_v39, %v633_v37  ;;  %v2783_v46 = vpack.c.bf16 %v512_v41, %v510_v40  ;;  %v509_v47 = vld [vmem:[%s5397_s1 + $0x1c0] sm:$0xff]  ;;  %v511_v48 = vld [vmem:[%s5397_s1 + $0x1d0] sm:$0xff] }
  0x3d   : > { %2766 = vmatpush1.bf16.msra.mxu1 %v2765_v58  ;;  %v637_v49 = vld [vmem:[%s5397_s1 + $0x5c0] sm:$0xff]  ;;  %v2911_v50 = vpack.c.bf16 %v640_v43, %v638_v42  ;;  %v639_v51 = vld [vmem:[%s5397_s1 + $0x5d0] sm:$0xff]  ;;  %v514_v52 = vld [vmem:[%s5397_s1 + $0x1e8] sm:$0xff]  ;;  %v2785_v56 = vpack.c.bf16 %v511_v48, %v509_v47 }
  0x3e   : > { %2894 = vmatpush1.bf16.msra.mxu0 %v2893_v59  ;;  %2768 = vmatprep.subr.bf16.mxu1 %v2767_v60  ;;  %v516_v53 = vld [vmem:[%s5397_s1 + $0x1f8] sm:$0xff]  ;;  %v642_v54 = vld [vmem:[%s5397_s1 + $0x5e8] sm:$0xff]  ;;  %v2913_v57 = vpack.c.bf16 %v639_v51, %v637_v49  ;;  %v513_v59 = vld [vmem:[%s5397_s1 + $0x1e0] sm:$0xff] }
  0x3f   : > { %2896 = vmatprep.subr.bf16.mxu0 %v2895_v0  ;;  %v644_v55 = vld [vmem:[%s5397_s1 + $0x5f8] sm:$0xff]  ;;  %v2787_v58 = vpack.c.bf16 %v516_v53, %v514_v52  ;;  %v515_v60 = vld [vmem:[%s5397_s1 + $0x1f0] sm:$0xff]  ;;  %v641_v61 = vld [vmem:[%s5397_s1 + $0x5e0] sm:$0xff] }
  0x40   : > { %v2915_v62 = vpack.c.bf16 %v644_v55, %v642_v54  ;;  %v643_v63 = vld [vmem:[%s5397_s1 + $0x5f0] sm:$0xff]  ;;  %v518_v0 = vld [vmem:[%s5397_s1 + $0x208] sm:$0xff]  ;;  %v520_v1 = vld [vmem:[%s5397_s1 + $0x218] sm:$0xff]  ;;  %v2789_v4 = vpack.c.bf16 %v515_v60, %v513_v59 }
  0x41   : > { %2770 = vmatpush1.bf16.msra.mxu1 %v2769_v6  ;;  %v646_v2 = vld [vmem:[%s5397_s1 + $0x608] sm:$0xff]  ;;  %v648_v3 = vld [vmem:[%s5397_s1 + $0x618] sm:$0xff]  ;;  %v2917_v5 = vpack.c.bf16 %v643_v63, %v641_v61  ;;  %v2791_v6 = vpack.c.bf16 %v520_v1, %v518_v0  ;;  %v517_v7 = vld [vmem:[%s5397_s1 + $0x200] sm:$0xff] }
  0x42   : > { %2898 = vmatpush1.bf16.msra.mxu0 %v2897_v8  ;;  %2772 = vmatprep.subr.bf16.mxu1 %v2771_v9  ;;  %v519_v8 = vld [vmem:[%s5397_s1 + $0x210] sm:$0xff]  ;;  %v2919_v9 = vpack.c.bf16 %v648_v3, %v646_v2  ;;  %v645_v10 = vld [vmem:[%s5397_s1 + $0x600] sm:$0xff]  ;;  %v522_v12 = vld [vmem:[%s5397_s1 + $0x228] sm:$0xff] }
  0x43   : > { %2900 = vmatprep.subr.bf16.mxu0 %v2899_v13  ;;  %v647_v11 = vld [vmem:[%s5397_s1 + $0x610] sm:$0xff]  ;;  %v524_v13 = vld [vmem:[%s5397_s1 + $0x238] sm:$0xff]  ;;  %v229_v14 = vld [vmem:[%s3745_s7] sm:$0xff]  ;;  %v2793_v15 = vpack.c.bf16 %v519_v8, %v517_v7 }
  0x44   : > { %v650_v16 = vld [vmem:[%s5397_s1 + $0x628] sm:$0xff]  ;;  %v652_v17 = vld [vmem:[%s5397_s1 + $0x638] sm:$0xff]  ;;  %v233_v18 = vld [vmem:[%s3745_s7 + $0x20] sm:$0xff] }
  0x45   : > { %2774 = vmatpush1.bf16.msra.mxu1 %v2773_v20  ;;  %v237_v19 = vld [vmem:[%s3745_s7 + $0x40] sm:$0xff]  ;;  %v523_v24 = vld [vmem:[%s5397_s1 + $0x230] sm:$0xff]  ;;  %v526_v25 = vld [vmem:[%s5397_s1 + $0x248] sm:$0xff]  ;;  %v2923_v27 = vpack.c.bf16 %v652_v17, %v650_v16 }
  0x46   : > { %2902 = vmatpush1.bf16.msra.mxu0 %v2901_v21  ;;  %2776 = vmatprep.subr.bf16.mxu1 %v2775_v22  ;;  %v241_v20 = vld [vmem:[%s3745_s7 + $0x60] sm:$0xff]  ;;  %v2921_v21 = vpack.c.bf16 %v647_v11, %v645_v10  ;;  %v2795_v22 = vpack.c.bf16 %v524_v13, %v522_v12  ;;  %v651_v29 = vld [vmem:[%s5397_s1 + $0x630] sm:$0xff]  ;;  %v236_v30 = vld [vmem:[%s3745_s7 + $0x38] sm:$0xff] }
  0x47   : > { %2904 = vmatprep.subr.bf16.mxu0 %v2903_v26  ;;  %v521_v23 = vld [vmem:[%s5397_s1 + $0x220] sm:$0xff]  ;;  %v528_v26 = vld [vmem:[%s5397_s1 + $0x258] sm:$0xff]  ;;  %v654_v35 = vld [vmem:[%s5397_s1 + $0x648] sm:$0xff] }
  0x48   : > { %v649_v28 = vld [vmem:[%s5397_s1 + $0x620] sm:$0xff]  ;;  %v240_v31 = vld [vmem:[%s3745_s7 + $0x58] sm:$0xff]  ;;  %v2799_v37 = vpack.c.bf16 %v528_v26, %v526_v25  ;;  %v527_v39 = vld [vmem:[%s5397_s1 + $0x250] sm:$0xff] }
  0x49   : > { %2778 = vmatpush1.bf16.msra.mxu1 %v2777_v32  ;;  %v244_v32 = vld [vmem:[%s3745_s7 + $0x78] sm:$0xff]  ;;  %v530_v40 = vld [vmem:[%s5397_s1 + $0x268] sm:$0xff]  ;;  %v2925_v41 = vpack.c.bf16 %v651_v29, %v649_v28  ;;  %v247_v47 = vld [vmem:[%s3745_s7 + $0x90] sm:$0xff] }
  0x4a   : > { %2906 = vmatpush1.bf16.msra.mxu0 %v2905_v33  ;;  %2780 = vmatprep.subr.bf16.mxu1 %v2779_v34  ;;  %v248_v33 = vld [vmem:[%s3745_s7 + $0x98] sm:$0xff]  ;;  %v2797_v34 = vpack.c.bf16 %v523_v24, %v521_v23  ;;  %v251_v48 = vld [vmem:[%s3745_s7 + $0xb0] sm:$0xff]  ;;  %v529_v52 = vld [vmem:[%s5397_s1 + $0x260] sm:$0xff] }
  0x4b   : > { %2908 = vmatprep.subr.bf16.mxu0 %v2907_v38  ;;  %v656_v36 = vld [vmem:[%s5397_s1 + $0x658] sm:$0xff]  ;;  %v525_v38 = vld [vmem:[%s5397_s1 + $0x240] sm:$0xff]  ;;  %v531_v53 = vld [vmem:[%s5397_s1 + $0x270] sm:$0xff] }
  0x4c   : > { %v532_v42 = vld [vmem:[%s5397_s1 + $0x278] sm:$0xff]  ;;  %v2927_v43 = vpack.c.bf16 %v656_v36, %v654_v35  ;;  %v2801_v49 = vpack.c.bf16 %v527_v39, %v525_v38  ;;  %v534_v55 = vld [vmem:[%s5397_s1 + $0x288] sm:$0xff]  ;;  %v2805_v60 = vpack.c.bf16 %v531_v53, %v529_v52  ;;  %v533_v63 = vld [vmem:[%s5397_s1 + $0x280] sm:$0xff] }
  0x4d   : > { %2782 = vmatpush1.bf16.msra.mxu1 %v2781_v44  ;;  %v653_v44 = vld [vmem:[%s5397_s1 + $0x640] sm:$0xff]  ;;  %v2803_v51 = vpack.c.bf16 %v532_v42, %v530_v40  ;;  %v258_v59 = vld [vmem:[%s3745_s7 + $0xe8] sm:$0xff]  ;;  %v535_v0 = vld [vmem:[%s5397_s1 + $0x290] sm:$0xff] }
  0x4e   : > { %2910 = vmatpush1.bf16.msra.mxu0 %v2909_v45  ;;  %2784 = vmatprep.subr.bf16.mxu1 %v2783_v46  ;;  %v655_v45 = vld [vmem:[%s5397_s1 + $0x650] sm:$0xff]  ;;  %v262_v61 = vld [vmem:[%s3745_s7 + $0x108] sm:$0xff]  ;;  %v540_v2 = vld [vmem:[%s5397_s1 + $0x2b8] sm:$0xff]  ;;  %v2809_v7 = vpack.c.bf16 %v535_v0, %v533_v63 }
  0x4f   : > { %2912 = vmatprep.subr.bf16.mxu0 %v2911_v50  ;;  %v243_v46 = vld [vmem:[%s3745_s7 + $0x70] sm:$0xff]  ;;  %v2929_v54 = vpack.c.bf16 %v655_v45, %v653_v44  ;;  %v538_v1 = vld [vmem:[%s5397_s1 + $0x2a8] sm:$0xff]  ;;  %v257_v3 = vld [vmem:[%s3745_s7 + $0xe0] sm:$0xff] }
  0x50   : > { %v255_v50 = vld [vmem:[%s3745_s7 + $0xd0] sm:$0xff]  ;;  %v658_v8 = vld [vmem:[%s5397_s1 + $0x668] sm:$0xff]  ;;  %v2811_v10 = vpack.c.bf16 %v540_v2, %v538_v1  ;;  %v537_v11 = vld [vmem:[%s5397_s1 + $0x2a0] sm:$0xff] }
  0x51   : > { %2786 = vmatpush1.bf16.msra.mxu1 %v2785_v56  ;;  %v536_v56 = vld [vmem:[%s5397_s1 + $0x298] sm:$0xff]  ;;  %v539_v12 = vld [vmem:[%s5397_s1 + $0x2b0] sm:$0xff]  ;;  %v541_v25 = vld [vmem:[%s5397_s1 + $0x2c0] sm:$0xff] }
  0x52   : > { %2914 = vmatpush1.bf16.msra.mxu0 %v2913_v57  ;;  %2788 = vmatprep.subr.bf16.mxu1 %v2787_v58  ;;  %v250_v57 = vld [vmem:[%s3745_s7 + $0xa8] sm:$0xff]  ;;  %v544_v16 = vld [vmem:[%s5397_s1 + $0x2d8] sm:$0xff]  ;;  %v659_v17 = vld [vmem:[%s5397_s1 + $0x670] sm:$0xff] }
  0x53   : > { %2916 = vmatprep.subr.bf16.mxu0 %v2915_v62  ;;  %v254_v58 = vld [vmem:[%s3745_s7 + $0xc8] sm:$0xff]  ;;  %v2807_v62 = vpack.c.bf16 %v536_v56, %v534_v55  ;;  %v276_v23 = vld [vmem:[%s3745_s7 + $0x178] sm:$0xff]  ;;  %v543_v26 = vld [vmem:[%s5397_s1 + $0x2d0] sm:$0xff] }
  0x54   : > { %v548_v28 = vld [vmem:[%s5397_s1 + $0x2f8] sm:$0xff]  ;;  %v271_v29 = vld [vmem:[%s3745_s7 + $0x150] sm:$0xff]  ;;  %v545_v35 = vld [vmem:[%s5397_s1 + $0x2e0] sm:$0xff] }
  0x55   : > { %2790 = vmatpush1.bf16.msra.mxu1 %v2789_v4  ;;  %v261_v4 = vld [vmem:[%s3745_s7 + $0x100] sm:$0xff]  ;;  %v547_v36 = vld [vmem:[%s5397_s1 + $0x2f0] sm:$0xff]  ;;  %v552_v38 = vld [vmem:[%s5397_s1 + $0x318] sm:$0xff] }
  0x56   : > { %2918 = vmatpush1.bf16.msra.mxu0 %v2917_v5  ;;  %2792 = vmatprep.subr.bf16.mxu1 %v2791_v6  ;;  %v265_v5 = vld [vmem:[%s3745_s7 + $0x120] sm:$0xff]  ;;  %v278_v39 = vld [vmem:[%s3745_s7 + $0x188] sm:$0xff]  ;;  %v551_v45 = vld [vmem:[%s5397_s1 + $0x310] sm:$0xff] }
  0x57   : > { %2920 = vmatprep.subr.bf16.mxu0 %v2919_v9  ;;  %v269_v6 = vld [vmem:[%s3745_s7 + $0x140] sm:$0xff]  ;;  %v660_v9 = vld [vmem:[%s5397_s1 + $0x678] sm:$0xff]  ;;  %v282_v40 = vld [vmem:[%s3745_s7 + $0x1a8] sm:$0xff] }
  0x58   : > { %843 = vmatmul.mubr.f32.vlgmr.msra.gmra.mrb[0].mxu1 %v229_v14  ;;  %v2931_v13 = vpack.c.bf16 %v660_v9, %v658_v8  ;;  %v657_v14 = vld [vmem:[%s5397_s1 + $0x660] sm:$0xff]  ;;  %v290_v42 = vld [vmem:[%s3745_s7 + $0x1e8] sm:$0xff]  ;;  %v663_v53 = vld [vmem:[%s5397_s1 + $0x690] sm:$0xff] }
  0x59   : > { %1357 = vmatmul.mubr.f32.vlgmr.msra.gmra.mrb[0].mxu0 %v233_v18  ;;  %2794 = vmatpush1.bf16.msra.mxu1 %v2793_v15  ;;  %v542_v15 = vld [vmem:[%s5397_s1 + $0x2c8] sm:$0xff]  ;;  %v264_v18 = vld [vmem:[%s3745_s7 + $0x118] sm:$0xff]  ;;  %v549_v44 = vld [vmem:[%s5397_s1 + $0x300] sm:$0xff] }
  0x5a   : > { %848 = vmatprep.mubr.f32.mxu1 %v237_v19  ;;  %1362 = vmatprep.mubr.f32.mxu0 %v241_v20  ;;  %v2933_v19 = vpack.c.bf16 %v659_v17, %v657_v14  ;;  %v268_v20 = vld [vmem:[%s3745_s7 + $0x138] sm:$0xff]  ;;  %v2815_v24 = vpack.c.bf16 %v544_v16, %v542_v15  ;;  %v661_v52 = vld [vmem:[%s5397_s1 + $0x680] sm:$0xff]  ;;  %v558_v63 = vld [vmem:[%s5397_s1 + $0x348] sm:$0xff] }
  0x5b   : > { %2922 = vmatpush1.bf16.msra.mxu0 %v2921_v21  ;;  %2796 = vmatprep.subr.bf16.mxu1 %v2795_v22  ;;  %v272_v21 = vld [vmem:[%s3745_s7 + $0x158] sm:$0xff]  ;;  %v2813_v22 = vpack.c.bf16 %v539_v12, %v537_v11  ;;  %v2937_v55 = vpack.c.bf16 %v663_v53, %v661_v52  ;;  %v289_v56 = vld [vmem:[%s3745_s7 + $0x1e0] sm:$0xff]  ;;  %v559_v8 = vld [vmem:[%s5397_s1 + $0x350] sm:$0xff] }
  0x5c   : > { %849 = vmatmul.mubr.f32.gmra.mrb[2].mxu1 %v236_v30  ;;  %2924 = vmatprep.subr.bf16.mxu0 %v2923_v27  ;;  %v546_v27 = vld [vmem:[%s5397_s1 + $0x2e8] sm:$0xff]  ;;  %v275_v30 = vld [vmem:[%s3745_s7 + $0x170] sm:$0xff]  ;;  %v560_v0 = vld [vmem:[%s5397_s1 + $0x358] sm:$0xff] }
  0x5d   : > { %1363 = vmatmul.mubr.f32.gmra.mrb[2].mxu0 %v240_v31  ;;  %854 = vmatprep.mubr.f32.mxu1 %v244_v32  ;;  %v279_v31 = vld [vmem:[%s3745_s7 + $0x190] sm:$0xff]  ;;  %v2817_v32 = vpack.c.bf16 %v543_v26, %v541_v25  ;;  %v292_v1 = vld [vmem:[%s3745_s7 + $0x1f8] sm:$0xff]  ;;  %v561_v16 = vld [vmem:[%s5397_s1 + $0x360] sm:$0xff] }
  0x5e   : > { %1368 = vmatprep.mubr.f32.mxu0 %v248_v33  ;;  %2798 = vmatpush1.bf16.msra.mxu1 %v2797_v34  ;;  %v283_v33 = vld [vmem:[%s3745_s7 + $0x1b0] sm:$0xff]  ;;  %v2819_v34 = vpack.c.bf16 %v548_v28, %v546_v27  ;;  %v296_v2 = vld [vmem:[%s3745_s7 + $0x218] sm:$0xff]  ;;  %v666_v17 = vld [vmem:[%s5397_s1 + $0x6a8] sm:$0xff] }
  0x5f   : > { %2800 = vmatprep.subr.bf16.mxu1 %v2799_v37  ;;  %2926 = vmatpush1.bf16.msra.mxu0 %v2925_v41  ;;  %v550_v37 = vld [vmem:[%s5397_s1 + $0x308] sm:$0xff]  ;;  %v299_v9 = vld [vmem:[%s3745_s7 + $0x230] sm:$0xff]  ;;  %v564_v11 = vld [vmem:[%s5397_s1 + $0x378] sm:$0xff] }
  0x60   : > { %855 = vmatmul.mubr.f32.gmra.mrb[4].mxu1 %v243_v46  ;;  %2928 = vmatprep.subr.bf16.mxu0 %v2927_v43  ;;  %v286_v41 = vld [vmem:[%s3745_s7 + $0x1c8] sm:$0xff]  ;;  %v2821_v43 = vpack.c.bf16 %v547_v36, %v545_v35  ;;  %v2823_v46 = vpack.c.bf16 %v552_v38, %v550_v37  ;;  %v303_v12 = vld [vmem:[%s3745_s7 + $0x250] sm:$0xff]  ;;  %v568_v25 = vld [vmem:[%s5397_s1 + $0x398] sm:$0xff] }
  0x61   : > { %1369 = vmatmul.mubr.f32.gmra.mrb[4].mxu0 %v247_v47  ;;  %860 = vmatprep.mubr.f32.mxu1 %v251_v48  ;;  %v554_v47 = vld [vmem:[%s5397_s1 + $0x328] sm:$0xff]  ;;  %v311_v14 = vld [vmem:[%s3745_s7 + $0x290] sm:$0xff]  ;;  %v572_v36 = vld [vmem:[%s5397_s1 + $0x3b8] sm:$0xff] }
  0x62   : > { %1374 = vmatprep.mubr.f32.mxu0 %v255_v50  ;;  %2802 = vmatpush1.bf16.msra.mxu1 %v2801_v49  ;;  %v662_v48 = vld [vmem:[%s5397_s1 + $0x688] sm:$0xff]  ;;  %v664_v49 = vld [vmem:[%s5397_s1 + $0x698] sm:$0xff]  ;;  %v313_v37 = vld [vmem:[%s3745_s7 + $0x2a0] sm:$0xff] }
  0x63   : > { %2804 = vmatprep.subr.bf16.mxu1 %v2803_v51  ;;  %2930 = vmatpush1.bf16.msra.mxu0 %v2929_v54  ;;  %v556_v50 = vld [vmem:[%s5397_s1 + $0x338] sm:$0xff]  ;;  %v2935_v51 = vpack.c.bf16 %v664_v49, %v662_v48  ;;  %v285_v54 = vld [vmem:[%s3745_s7 + $0x1c0] sm:$0xff]  ;;  %v306_v27 = vld [vmem:[%s3745_s7 + $0x268] sm:$0xff] }
  0x64   : > { %861 = vmatmul.mubr.f32.gmra.mrb[6].mxu1 %v250_v57  ;;  %2932 = vmatprep.subr.bf16.mxu0 %v2931_v13  ;;  %v293_v57 = vld [vmem:[%s3745_s7 + $0x200] sm:$0xff]  ;;  %v307_v13 = vld [vmem:[%s3745_s7 + $0x270] sm:$0xff]  ;;  %v310_v28 = vld [vmem:[%s3745_s7 + $0x288] sm:$0xff] }
  0x65   : > { %1375 = vmatmul.mubr.f32.gmra.mrb[6].mxu0 %v254_v58  ;;  %866 = vmatprep.mubr.f32.mxu1 %v258_v59  ;;  %v2825_v58 = vpack.c.bf16 %v551_v45, %v549_v44  ;;  %v297_v59 = vld [vmem:[%s3745_s7 + $0x220] sm:$0xff]  ;;  %v570_v35 = vld [vmem:[%s5397_s1 + $0x3a8] sm:$0xff]  ;;  %v571_v44 = vld [vmem:[%s5397_s1 + $0x3b0] sm:$0xff] }
  0x66   : > { %1380 = vmatprep.mubr.f32.mxu0 %v262_v61  ;;  %2806 = vmatpush1.bf16.msra.mxu1 %v2805_v60  ;;  %v2827_v60 = vpack.c.bf16 %v556_v50, %v554_v47  ;;  %v553_v61 = vld [vmem:[%s5397_s1 + $0x320] sm:$0xff]  ;;  %v574_v45 = vld [vmem:[%s5397_s1 + $0x3c8] sm:$0xff]  ;;  %v320_v47 = vld [vmem:[%s3745_s7 + $0x2d8] sm:$0xff] }
  0x67   : > { %2808 = vmatprep.subr.bf16.mxu1 %v2807_v62  ;;  %2934 = vmatpush1.bf16.msra.mxu0 %v2933_v19  ;;  %v555_v62 = vld [vmem:[%s5397_s1 + $0x330] sm:$0xff]  ;;  %v317_v38 = vld [vmem:[%s3745_s7 + $0x2c0] sm:$0xff]  ;;  %v324_v48 = vld [vmem:[%s3745_s7 + $0x2f8] sm:$0xff] }
  0x68   : > { %867 = vmatmul.mubr.f32.gmra.mrb[8].mxu1 %v257_v3  ;;  %2936 = vmatprep.subr.bf16.mxu0 %v2935_v51  ;;  %v300_v3 = vld [vmem:[%s3745_s7 + $0x238] sm:$0xff]  ;;  %v573_v53 = vld [vmem:[%s5397_s1 + $0x3c0] sm:$0xff] }
  0x69   : > { %1381 = vmatmul.mubr.f32.gmra.mrb[8].mxu0 %v261_v4  ;;  %872 = vmatprep.mubr.f32.mxu1 %v265_v5  ;;  %v2829_v4 = vpack.c.bf16 %v555_v62, %v553_v61  ;;  %v304_v5 = vld [vmem:[%s3745_s7 + $0x258] sm:$0xff]  ;;  %v339_v61 = vld [vmem:[%s3745_s7 + $0x370] sm:$0xff] }
  0x6a   : > { %1386 = vmatprep.mubr.f32.mxu0 %v269_v6  ;;  %2810 = vmatpush1.bf16.msra.mxu1 %v2809_v7  ;;  %v2831_v6 = vpack.c.bf16 %v560_v0, %v558_v63  ;;  %v557_v7 = vld [vmem:[%s5397_s1 + $0x340] sm:$0xff]  ;;  %v328_v49 = vld [vmem:[%s3745_s7 + $0x318] sm:$0xff]  ;;  %v579_v0 = vld [vmem:[%s5397_s1 + $0x3f0] sm:$0xff] }
  0x6b   : > { %2812 = vmatprep.subr.bf16.mxu1 %v2811_v10  ;;  %2938 = vmatpush1.bf16.msra.mxu0 %v2937_v55  ;;  %v562_v10 = vld [vmem:[%s5397_s1 + $0x368] sm:$0xff]  ;;  %v2833_v15 = vpack.c.bf16 %v559_v8, %v557_v7  ;;  %v332_v51 = vld [vmem:[%s3745_s7 + $0x338] sm:$0xff]  ;;  %v577_v63 = vld [vmem:[%s5397_s1 + $0x3e0] sm:$0xff] }
  0x6c   : > { %873 = vmatmul.mubr.f32.gmra.mrb[10].mxu1 %v264_v18  ;;  %v668_v18 = vld [vmem:[%s5397_s1 + $0x6b8] sm:$0xff]  ;;  %v2835_v19 = vpack.c.bf16 %v564_v11, %v562_v10  ;;  %v578_v55 = vld [vmem:[%s5397_s1 + $0x3e8] sm:$0xff]  ;;  %v345_v7 = vld [vmem:[%s3745_s7 + $0x3a0] sm:$0xff] }
  0x6d   : > { %1387 = vmatmul.mubr.f32.gmra.mrb[10].mxu0 %v268_v20  ;;  %878 = vmatprep.mubr.f32.mxu1 %v272_v21  ;;  %v563_v20 = vld [vmem:[%s5397_s1 + $0x370] sm:$0xff]  ;;  %v2939_v21 = vpack.c.bf16 %v668_v18, %v666_v17  ;;  %v349_v8 = vld [vmem:[%s3745_s7 + $0x3c0] sm:$0xff]  ;;  %v348_v10 = vld [vmem:[%s3745_s7 + $0x3b8] sm:$0xff] }
  0x6e   : > { %1392 = vmatprep.mubr.f32.mxu0 %v276_v23  ;;  %2814 = vmatpush1.bf16.msra.mxu1 %v2813_v22  ;;  %v665_v22 = vld [vmem:[%s5397_s1 + $0x6a0] sm:$0xff]  ;;  %v667_v23 = vld [vmem:[%s5397_s1 + $0x6b0] sm:$0xff]  ;;  %v352_v11 = vld [vmem:[%s3745_s7 + $0x3d8] sm:$0xff] }
  0x6f   : > { %2816 = vmatprep.subr.bf16.mxu1 %v2815_v24  ;;  %v566_v24 = vld [vmem:[%s5397_s1 + $0x388] sm:$0xff]  ;;  %v2941_v26 = vpack.c.bf16 %v667_v23, %v665_v22  ;;  %2940 = vmatprep.subr.bf16.mxu0 %v2939_v21  ;;  %v367_v17 = vld [vmem:[%s3745_s7 + $0x450] sm:$0xff]  ;;  %v369_v22 = vld [vmem:[%s3745_s7 + $0x460] sm:$0xff] }
  0x70   : > { %879 = vmatmul.mubr.f32.gmra.mrb[12].mxu1 %v271_v29  ;;  %v314_v29 = vld [vmem:[%s3745_s7 + $0x2a8] sm:$0xff]  ;;  %v373_v23 = vld [vmem:[%s3745_s7 + $0x480] sm:$0xff] }
  0x71   : > { %1393 = vmatmul.mubr.f32.gmra.mrb[12].mxu0 %v275_v30  ;;  %884 = vmatprep.mubr.f32.mxu1 %v279_v31  ;;  %v2837_v30 = vpack.c.bf16 %v563_v20, %v561_v16  ;;  %v318_v31 = vld [vmem:[%s3745_s7 + $0x2c8] sm:$0xff]  ;;  %v363_v16 = vld [vmem:[%s3745_s7 + $0x430] sm:$0xff] }
  0x72   : > { %1398 = vmatprep.mubr.f32.mxu0 %v283_v33  ;;  %2818 = vmatpush1.bf16.msra.mxu1 %v2817_v32  ;;  %v2839_v32 = vpack.c.bf16 %v568_v25, %v566_v24  ;;  %v565_v33 = vld [vmem:[%s5397_s1 + $0x380] sm:$0xff]  ;;  %v362_v18 = vld [vmem:[%s3745_s7 + $0x428] sm:$0xff] }
  0x73   : > { %2820 = vmatprep.subr.bf16.mxu1 %v2819_v34  ;;  %v567_v34 = vld [vmem:[%s5397_s1 + $0x390] sm:$0xff]  ;;  %2942 = vmatpush1.bf16.msra.mxu0 %v2941_v26  ;;  %v370_v20 = vld [vmem:[%s3745_s7 + $0x468] sm:$0xff]  ;;  %v377_v24 = vld [vmem:[%s3745_s7 + $0x4a0] sm:$0xff] }
  0x74   : > { %885 = vmatmul.mubr.f32.gmra.mrb[14].mxu1 %v278_v39  ;;  %v321_v39 = vld [vmem:[%s3745_s7 + $0x2e0] sm:$0xff]  ;;  %v374_v21 = vld [vmem:[%s3745_s7 + $0x488] sm:$0xff]  ;;  %v376_v26 = vld [vmem:[%s3745_s7 + $0x498] sm:$0xff] }
  0x75   : > { %1399 = vmatmul.mubr.f32.gmra.mrb[14].mxu0 %v282_v40  ;;  %890 = vmatprep.mubr.f32.mxu1 %v286_v41  ;;  %v2841_v40 = vpack.c.bf16 %v567_v34, %v565_v33  ;;  %v325_v41 = vld [vmem:[%s3745_s7 + $0x300] sm:$0xff]  ;;  %v395_v33 = vld [vmem:[%s3745_s7 + $0x530] sm:$0xff]  ;;  %v390_v34 = vld [vmem:[%s3745_s7 + $0x508] sm:$0xff] }
  0x76   : > { %1404 = vmatprep.mubr.f32.mxu0 %v290_v42  ;;  %2822 = vmatpush1.bf16.msra.mxu1 %v2821_v43  ;;  %v2843_v42 = vpack.c.bf16 %v572_v36, %v570_v35  ;;  %v569_v43 = vld [vmem:[%s5397_s1 + $0x3a0] sm:$0xff]  ;;  %v394_v35 = vld [vmem:[%s3745_s7 + $0x528] sm:$0xff] }
  0x77   : > { %2824 = vmatprep.subr.bf16.mxu1 %v2823_v46  ;;  %v576_v46 = vld [vmem:[%s5397_s1 + $0x3d8] sm:$0xff]  ;;  %v2845_v50 = vpack.c.bf16 %v571_v44, %v569_v43  ;;  %v381_v25 = vld [vmem:[%s3745_s7 + $0x4c0] sm:$0xff]  ;;  %v398_v36 = vld [vmem:[%s3745_s7 + $0x548] sm:$0xff] }
  0x78   : > { %891 = vmatmul.mubr.f32.gmra.mrb[16].mxu1 %v285_v54  ;;  %v2847_v52 = vpack.c.bf16 %v576_v46, %v574_v45  ;;  %v575_v54 = vld [vmem:[%s5397_s1 + $0x3d0] sm:$0xff]  ;;  %v408_v43 = vld [vmem:[%s3745_s7 + $0x598] sm:$0xff] }
  0x79   : > { %1405 = vmatmul.mubr.f32.gmra.mrb[16].mxu0 %v289_v56  ;;  %896 = vmatprep.mubr.f32.mxu1 %v293_v57  ;;  %v580_v56 = vld [vmem:[%s5397_s1 + $0x3f8] sm:$0xff]  ;;  %v327_v57 = vld [vmem:[%s3745_s7 + $0x310] sm:$0xff] }
  0x7a   : > { %1410 = vmatprep.mubr.f32.mxu0 %v297_v59  ;;  %2826 = vmatpush1.bf16.msra.mxu1 %v2825_v58  ;;  %v331_v58 = vld [vmem:[%s3745_s7 + $0x330] sm:$0xff]  ;;  %v2851_v62 = vpack.c.bf16 %v580_v56, %v578_v55  ;;  %v412_v44 = vld [vmem:[%s3745_s7 + $0x5b8] sm:$0xff]  ;;  %v429_v55 = vld [vmem:[%s3745_s7 + $0x640] sm:$0xff] }
  0x7b   : > { %2828 = vmatprep.subr.bf16.mxu1 %v2827_v60  ;;  %v335_v59 = vld [vmem:[%s3745_s7 + $0x350] sm:$0xff]  ;;  %v2849_v60 = vpack.c.bf16 %v575_v54, %v573_v53  ;;  %v416_v45 = vld [vmem:[%s3745_s7 + $0x5d8] sm:$0xff]  ;;  %v430_v53 = vld [vmem:[%s3745_s7 + $0x648] sm:$0xff] }
  0x7c   : > { %897 = vmatmul.mubr.f32.gmra.mrb[18].mxu1 %v292_v1  ;;  %v334_v1 = vld [vmem:[%s3745_s7 + $0x348] sm:$0xff]  ;;  %v411_v46 = vld [vmem:[%s3745_s7 + $0x5b0] sm:$0xff]  ;;  %v425_v54 = vld [vmem:[%s3745_s7 + $0x620] sm:$0xff] }
  0x7d   : > { %1411 = vmatmul.mubr.f32.gmra.mrb[18].mxu0 %v296_v2  ;;  %902 = vmatprep.mubr.f32.mxu1 %v300_v3  ;;  %v338_v2 = vld [vmem:[%s3745_s7 + $0x368] sm:$0xff]  ;;  %v433_v56 = vld [vmem:[%s3745_s7 + $0x660] sm:$0xff] }
  0x7e   : > { %1416 = vmatprep.mubr.f32.mxu0 %v304_v5  ;;  %2830 = vmatpush1.bf16.msra.mxu1 %v2829_v4  ;;  %v342_v3 = vld [vmem:[%s3745_s7 + $0x388] sm:$0xff]  ;;  %v2853_v4 = vpack.c.bf16 %v579_v0, %v577_v63  ;;  %v443_v63 = vld [vmem:[%s3745_s7 + $0x6b0] sm:$0xff] }
  0x7f   : > { %2832 = vmatprep.subr.bf16.mxu1 %v2831_v6  ;;  %v346_v5 = vld [vmem:[%s3745_s7 + $0x3a8] sm:$0xff]  ;;  %v341_v6 = vld [vmem:[%s3745_s7 + $0x380] sm:$0xff]  ;;  %v447_v0 = vld [vmem:[%s3745_s7 + $0x6d0] sm:$0xff] }
  0x80   : > { %903 = vmatmul.mubr.f32.gmra.mrb[20].mxu1 %v299_v9  ;;  %v353_v9 = vld [vmem:[%s3745_s7 + $0x3e0] sm:$0xff] }
  0x81   : > { %1417 = vmatmul.mubr.f32.gmra.mrb[20].mxu0 %v303_v12  ;;  %908 = vmatprep.mubr.f32.mxu1 %v307_v13  ;;  %v356_v12 = vld [vmem:[%s3745_s7 + $0x3f8] sm:$0xff] }
  0x82   : > { %1422 = vmatprep.mubr.f32.mxu0 %v311_v14  ;;  %2834 = vmatpush1.bf16.msra.mxu1 %v2833_v15  ;;  %v360_v13 = vld [vmem:[%s3745_s7 + $0x418] sm:$0xff]  ;;  %v355_v14 = vld [vmem:[%s3745_s7 + $0x3f0] sm:$0xff] }
  0x83   : > { %2836 = vmatprep.subr.bf16.mxu1 %v2835_v19  ;;  %v359_v15 = vld [vmem:[%s3745_s7 + $0x410] sm:$0xff]  ;;  %v366_v19 = vld [vmem:[%s3745_s7 + $0x448] sm:$0xff] }
  0x84   : > { %909 = vmatmul.mubr.f32.gmra.mrb[22].mxu1 %v306_v27  ;;  %v380_v27 = vld [vmem:[%s3745_s7 + $0x4b8] sm:$0xff] }
  0x85   : > { %1423 = vmatmul.mubr.f32.gmra.mrb[22].mxu0 %v310_v28  ;;  %914 = vmatprep.mubr.f32.mxu1 %v314_v29  ;;  %v384_v28 = vld [vmem:[%s3745_s7 + $0x4d8] sm:$0xff] }
  0x86   : > { %1428 = vmatprep.mubr.f32.mxu0 %v318_v31  ;;  %2838 = vmatpush1.bf16.msra.mxu1 %v2837_v30  ;;  %v388_v29 = vld [vmem:[%s3745_s7 + $0x4f8] sm:$0xff]  ;;  %v383_v30 = vld [vmem:[%s3745_s7 + $0x4d0] sm:$0xff] }
  0x87   : > { %2840 = vmatprep.subr.bf16.mxu1 %v2839_v32  ;;  %v387_v31 = vld [vmem:[%s3745_s7 + $0x4f0] sm:$0xff] }
  0x88   : > { %915 = vmatmul.mubr.f32.gmra.mrb[24].mxu1 %v313_v37  ;;  %v391_v32 = vld [vmem:[%s3745_s7 + $0x510] sm:$0xff]  ;;  %v402_v37 = vld [vmem:[%s3745_s7 + $0x568] sm:$0xff] }
  0x89   : > { %1429 = vmatmul.mubr.f32.gmra.mrb[24].mxu0 %v317_v38  ;;  %920 = vmatprep.mubr.f32.mxu1 %v321_v39  ;;  %v397_v38 = vld [vmem:[%s3745_s7 + $0x540] sm:$0xff] }
  0x8a   : > { %1434 = vmatprep.mubr.f32.mxu0 %v325_v41  ;;  %2842 = vmatpush1.bf16.msra.mxu1 %v2841_v40  ;;  %v401_v39 = vld [vmem:[%s3745_s7 + $0x560] sm:$0xff] }
  0x8b   : > { %2844 = vmatprep.subr.bf16.mxu1 %v2843_v42  ;;  %v405_v40 = vld [vmem:[%s3745_s7 + $0x580] sm:$0xff]  ;;  %v404_v42 = vld [vmem:[%s3745_s7 + $0x578] sm:$0xff] }
  0x8c   : > { %921 = vmatmul.mubr.f32.gmra.mrb[26].mxu1 %v320_v47  ;;  %v409_v41 = vld [vmem:[%s3745_s7 + $0x5a0] sm:$0xff]  ;;  %v415_v47 = vld [vmem:[%s3745_s7 + $0x5d0] sm:$0xff] }
  0x8d   : > { %1435 = vmatmul.mubr.f32.gmra.mrb[26].mxu0 %v324_v48  ;;  %926 = vmatprep.mubr.f32.mxu1 %v328_v49  ;;  %v419_v48 = vld [vmem:[%s3745_s7 + $0x5f0] sm:$0xff] }
  0x8e   : > { %1440 = vmatprep.mubr.f32.mxu0 %v332_v51  ;;  %2846 = vmatpush1.bf16.msra.mxu1 %v2845_v50  ;;  %v423_v49 = vld [vmem:[%s3745_s7 + $0x610] sm:$0xff]  ;;  %v418_v50 = vld [vmem:[%s3745_s7 + $0x5e8] sm:$0xff] }
  0x8f   : > { %2848 = vmatprep.subr.bf16.mxu1 %v2847_v52  ;;  %v422_v51 = vld [vmem:[%s3745_s7 + $0x608] sm:$0xff] }
  0x90   : > { %927 = vmatmul.mubr.f32.gmra.mrb[28].mxu1 %v327_v57  ;;  %v426_v52 = vld [vmem:[%s3745_s7 + $0x628] sm:$0xff]  ;;  %v437_v57 = vld [vmem:[%s3745_s7 + $0x680] sm:$0xff] }
  0x91   : > { %1441 = vmatmul.mubr.f32.gmra.mrb[28].mxu0 %v331_v58  ;;  %932 = vmatprep.mubr.f32.mxu1 %v335_v59  ;;  %v432_v58 = vld [vmem:[%s3745_s7 + $0x658] sm:$0xff] }
  0x92   : > { %1446 = vmatprep.mubr.f32.mxu0 %v339_v61  ;;  %2850 = vmatpush1.bf16.msra.mxu1 %v2849_v60  ;;  %v436_v59 = vld [vmem:[%s3745_s7 + $0x678] sm:$0xff] }
  0x93   : > { %2852 = vmatprep.subr.bf16.mxu1 %v2851_v62  ;;  %v440_v60 = vld [vmem:[%s3745_s7 + $0x698] sm:$0xff]  ;;  %v439_v62 = vld [vmem:[%s3745_s7 + $0x690] sm:$0xff] }
  0x94   : > { %933 = vmatmul.mubr.f32.gmra.mrb[30].mxu1 %v334_v1  ;;  %v444_v61 = vld [vmem:[%s3745_s7 + $0x6b8] sm:$0xff]  ;;  %v451_v1 = vld [vmem:[%s3745_s7 + $0x6f0] sm:$0xff] }
  0x95   : > { %1447 = vmatmul.mubr.f32.gmra.mrb[30].mxu0 %v338_v2  ;;  %938 = vmatprep.mubr.f32.mxu1 %v342_v3  ;;  %v446_v2 = vld [vmem:[%s3745_s7 + $0x6c8] sm:$0xff] }
  0x96   : > { %1452 = vmatprep.mubr.f32.mxu0 %v346_v5  ;;  %2854 = vmatpush1.bf16.msra.mxu1 %v2853_v4  ;;  %v450_v3 = vld [vmem:[%s3745_s7 + $0x6e8] sm:$0xff]  ;;  %v232_v4 = vld [vmem:[%s3745_s7 + $0x18] sm:$0xff]  ;;  %v231_v5 = vld [vmem:[%s3745_s7 + $0x10] sm:$0xff] }
  0x98   : > { %939 = vmatmul.mubr.f32.gmra.mrb[32].mxu1 %v341_v6  ;;  %v3370_v6 = vmov 0.0  }
  0x99   : > { %1453 = vmatmul.mubr.f32.gmra.mrb[32].mxu0 %v345_v7  ;;  %944 = vmatprep.mubr.f32.mxu1 %v349_v8  ;;  %v235_v7 = vld [vmem:[%s3745_s7 + $0x30] sm:$0xff] }
  0x9a   : > { %1458 = vmatprep.mubr.f32.mxu0 %v353_v9  ;;  %v239_v8 = vld [vmem:[%s3745_s7 + $0x50] sm:$0xff]  ;;  %v238_v9 = vld [vmem:[%s3745_s7 + $0x48] sm:$0xff] }
  0x9c   : > { %945 = vmatmul.mubr.f32.gmra.mrb[34].mxu1 %v348_v10  ;;  %v242_v10 = vld [vmem:[%s3745_s7 + $0x68] sm:$0xff] }
  0x9d   : > { %1459 = vmatmul.mubr.f32.gmra.mrb[34].mxu0 %v352_v11  ;;  %950 = vmatprep.mubr.f32.mxu1 %v356_v12  ;;  %v246_v11 = vld [vmem:[%s3745_s7 + $0x88] sm:$0xff]  ;;  %v245_v12 = vld [vmem:[%s3745_s7 + $0x80] sm:$0xff] }
  0x9e   : > { %1464 = vmatprep.mubr.f32.mxu0 %v360_v13  ;;  %v249_v13 = vld [vmem:[%s3745_s7 + $0xa0] sm:$0xff] }
  0xa0   : > { %951 = vmatmul.mubr.f32.gmra.mrb[36].mxu1 %v355_v14  ;;  %v253_v14 = vld [vmem:[%s3745_s7 + $0xc0] sm:$0xff] }
  0xa1   : > { %1465 = vmatmul.mubr.f32.gmra.mrb[36].mxu0 %v359_v15  ;;  %956 = vmatprep.mubr.f32.mxu1 %v363_v16  ;;  %v252_v15 = vld [vmem:[%s3745_s7 + $0xb8] sm:$0xff] }
  0xa2   : > { %1470 = vmatprep.mubr.f32.mxu0 %v367_v17  ;;  %v256_v16 = vld [vmem:[%s3745_s7 + $0xd8] sm:$0xff] }
  0xa3   : > { %v260_v17 = vld [vmem:[%s3745_s7 + $0xf8] sm:$0xff] }
  0xa4   : > { %957 = vmatmul.mubr.f32.gmra.mrb[38].mxu1 %v362_v18  ;;  %v259_v18 = vld [vmem:[%s3745_s7 + $0xf0] sm:$0xff] }
  0xa5   : > { %1471 = vmatmul.mubr.f32.gmra.mrb[38].mxu0 %v366_v19  ;;  %962 = vmatprep.mubr.f32.mxu1 %v370_v20  ;;  %v263_v19 = vld [vmem:[%s3745_s7 + $0x110] sm:$0xff] }
  0xa6   : > { %1476 = vmatprep.mubr.f32.mxu0 %v374_v21  ;;  %v267_v20 = vld [vmem:[%s3745_s7 + $0x130] sm:$0xff]  ;;  %v266_v21 = vld [vmem:[%s3745_s7 + $0x128] sm:$0xff] }
  0xa8   : > { %963 = vmatmul.mubr.f32.gmra.mrb[40].mxu1 %v369_v22  ;;  %v270_v22 = vld [vmem:[%s3745_s7 + $0x148] sm:$0xff] }
  0xa9   : > { %1477 = vmatmul.mubr.f32.gmra.mrb[40].mxu0 %v373_v23  ;;  %968 = vmatprep.mubr.f32.mxu1 %v377_v24  ;;  %v274_v23 = vld [vmem:[%s3745_s7 + $0x168] sm:$0xff]  ;;  %v273_v24 = vld [vmem:[%s3745_s7 + $0x160] sm:$0xff] }
  0xaa   : > { %1482 = vmatprep.mubr.f32.mxu0 %v381_v25  ;;  %v277_v25 = vld [vmem:[%s3745_s7 + $0x180] sm:$0xff] }
  0xac   : > { %969 = vmatmul.mubr.f32.gmra.mrb[42].mxu1 %v376_v26  ;;  %v281_v26 = vld [vmem:[%s3745_s7 + $0x1a0] sm:$0xff] }
  0xad   : > { %1483 = vmatmul.mubr.f32.gmra.mrb[42].mxu0 %v380_v27  ;;  %974 = vmatprep.mubr.f32.mxu1 %v384_v28  ;;  %v280_v27 = vld [vmem:[%s3745_s7 + $0x198] sm:$0xff] }
  0xae   : > { %1488 = vmatprep.mubr.f32.mxu0 %v388_v29  ;;  %v284_v28 = vld [vmem:[%s3745_s7 + $0x1b8] sm:$0xff] }
  0xaf   : > { %v288_v29 = vld [vmem:[%s3745_s7 + $0x1d8] sm:$0xff] }
  0xb0   : > { %975 = vmatmul.mubr.f32.gmra.mrb[44].mxu1 %v383_v30  ;;  %v287_v30 = vld [vmem:[%s3745_s7 + $0x1d0] sm:$0xff] }
  0xb1   : > { %1489 = vmatmul.mubr.f32.gmra.mrb[44].mxu0 %v387_v31  ;;  %980 = vmatprep.mubr.f32.mxu1 %v391_v32  ;;  %v291_v31 = vld [vmem:[%s3745_s7 + $0x1f0] sm:$0xff] }
  0xb2   : > { %1494 = vmatprep.mubr.f32.mxu0 %v395_v33  ;;  %v295_v32 = vld [vmem:[%s3745_s7 + $0x210] sm:$0xff]  ;;  %v294_v33 = vld [vmem:[%s3745_s7 + $0x208] sm:$0xff] }
  0xb4   : > { %981 = vmatmul.mubr.f32.gmra.mrb[46].mxu1 %v390_v34  ;;  %v298_v34 = vld [vmem:[%s3745_s7 + $0x228] sm:$0xff] }
  0xb5   : > { %1495 = vmatmul.mubr.f32.gmra.mrb[46].mxu0 %v394_v35  ;;  %986 = vmatprep.mubr.f32.mxu1 %v398_v36  ;;  %v302_v35 = vld [vmem:[%s3745_s7 + $0x248] sm:$0xff]  ;;  %v301_v36 = vld [vmem:[%s3745_s7 + $0x240] sm:$0xff] }
  0xb6   : > { %1500 = vmatprep.mubr.f32.mxu0 %v402_v37  ;;  %v305_v37 = vld [vmem:[%s3745_s7 + $0x260] sm:$0xff] }
  0xb8   : > { %987 = vmatmul.mubr.f32.gmra.mrb[48].mxu1 %v397_v38  ;;  %v309_v38 = vld [vmem:[%s3745_s7 + $0x280] sm:$0xff] }
  0xb9   : > { %1501 = vmatmul.mubr.f32.gmra.mrb[48].mxu0 %v401_v39  ;;  %992 = vmatprep.mubr.f32.mxu1 %v405_v40  ;;  %v308_v39 = vld [vmem:[%s3745_s7 + $0x278] sm:$0xff] }
  0xba   : > { %1506 = vmatprep.mubr.f32.mxu0 %v409_v41  ;;  %v312_v40 = vld [vmem:[%s3745_s7 + $0x298] sm:$0xff] }
  0xbb   : > { %v316_v41 = vld [vmem:[%s3745_s7 + $0x2b8] sm:$0xff] }
  0xbc   : > { %993 = vmatmul.mubr.f32.gmra.mrb[50].mxu1 %v404_v42  ;;  %v315_v42 = vld [vmem:[%s3745_s7 + $0x2b0] sm:$0xff] }
  0xbd   : > { %1507 = vmatmul.mubr.f32.gmra.mrb[50].mxu0 %v408_v43  ;;  %998 = vmatprep.mubr.f32.mxu1 %v412_v44  ;;  %v319_v43 = vld [vmem:[%s3745_s7 + $0x2d0] sm:$0xff] }
  0xbe   : > { %1512 = vmatprep.mubr.f32.mxu0 %v416_v45  ;;  %v323_v44 = vld [vmem:[%s3745_s7 + $0x2f0] sm:$0xff]  ;;  %v322_v45 = vld [vmem:[%s3745_s7 + $0x2e8] sm:$0xff] }
  0xc0   : > { %999 = vmatmul.mubr.f32.gmra.mrb[52].mxu1 %v411_v46  ;;  %v326_v46 = vld [vmem:[%s3745_s7 + $0x308] sm:$0xff] }
  0xc1   : > { %1513 = vmatmul.mubr.f32.gmra.mrb[52].mxu0 %v415_v47  ;;  %1004 = vmatprep.mubr.f32.mxu1 %v419_v48  ;;  %v330_v47 = vld [vmem:[%s3745_s7 + $0x328] sm:$0xff]  ;;  %v329_v48 = vld [vmem:[%s3745_s7 + $0x320] sm:$0xff] }
  0xc2   : > { %1518 = vmatprep.mubr.f32.mxu0 %v423_v49  ;;  %v333_v49 = vld [vmem:[%s3745_s7 + $0x340] sm:$0xff] }
  0xc4   : > { %1005 = vmatmul.mubr.f32.gmra.mrb[54].mxu1 %v418_v50  ;;  %v337_v50 = vld [vmem:[%s3745_s7 + $0x360] sm:$0xff] }
  0xc5   : > { %1519 = vmatmul.mubr.f32.gmra.mrb[54].mxu0 %v422_v51  ;;  %1010 = vmatprep.mubr.f32.mxu1 %v426_v52  ;;  %v336_v51 = vld [vmem:[%s3745_s7 + $0x358] sm:$0xff] }
  0xc6   : > { %1524 = vmatprep.mubr.f32.mxu0 %v430_v53  ;;  %v340_v52 = vld [vmem:[%s3745_s7 + $0x378] sm:$0xff] }
  0xc7   : > { %v344_v53 = vld [vmem:[%s3745_s7 + $0x398] sm:$0xff] }
  0xc8   : > { %1011 = vmatmul.mubr.f32.gmra.mrb[56].mxu1 %v425_v54  ;;  %v343_v54 = vld [vmem:[%s3745_s7 + $0x390] sm:$0xff] }
  0xc9   : > { %1525 = vmatmul.mubr.f32.gmra.mrb[56].mxu0 %v429_v55  ;;  %1016 = vmatprep.mubr.f32.mxu1 %v433_v56  ;;  %v347_v55 = vld [vmem:[%s3745_s7 + $0x3b0] sm:$0xff] }
  0xca   : > { %1530 = vmatprep.mubr.f32.mxu0 %v437_v57  ;;  %v351_v56 = vld [vmem:[%s3745_s7 + $0x3d0] sm:$0xff]  ;;  %v350_v57 = vld [vmem:[%s3745_s7 + $0x3c8] sm:$0xff] }
  0xcc   : > { %1017 = vmatmul.mubr.f32.gmra.mrb[58].mxu1 %v432_v58  ;;  %v354_v58 = vld [vmem:[%s3745_s7 + $0x3e8] sm:$0xff] }
  0xcd   : > { %1531 = vmatmul.mubr.f32.gmra.mrb[58].mxu0 %v436_v59  ;;  %1022 = vmatprep.mubr.f32.mxu1 %v440_v60  ;;  %v358_v59 = vld [vmem:[%s3745_s7 + $0x408] sm:$0xff]  ;;  %v357_v60 = vld [vmem:[%s3745_s7 + $0x400] sm:$0xff] }
  0xce   : > { %1536 = vmatprep.mubr.f32.mxu0 %v444_v61  ;;  %v361_v61 = vld [vmem:[%s3745_s7 + $0x420] sm:$0xff] }
  0xd0   : > { %1023 = vmatmul.mubr.f32.gmra.mrb[60].mxu1 %v439_v62  ;;  %v365_v62 = vld [vmem:[%s3745_s7 + $0x440] sm:$0xff] }
  0xd1   : > { %1537 = vmatmul.mubr.f32.gmra.mrb[60].mxu0 %v443_v63  ;;  %1028 = vmatprep.mubr.f32.mxu1 %v447_v0  ;;  %v364_v63 = vld [vmem:[%s3745_s7 + $0x438] sm:$0xff] }
  0xd2   : > { %1542 = vmatprep.mubr.f32.mxu0 %v451_v1  ;;  %v368_v0 = vld [vmem:[%s3745_s7 + $0x458] sm:$0xff] }
  0xd3   : > { %v372_v1 = vld [vmem:[%s3745_s7 + $0x478] sm:$0xff] }
  0xd4   : > { %1029 = vmatmul.mubr.f32.gmra.mrb[62].mxu1 %v446_v2  ;;  %v371_v2 = vld [vmem:[%s3745_s7 + $0x470] sm:$0xff] }
  0xd5   : > { %1543 = vmatmul.mubr.f32.gmra.mrb[62].mxu0 %v450_v3  ;;  %1099 = vmatprep.mubr.f32.mxu1 %v232_v4  ;;  %v375_v3 = vld [vmem:[%s3745_s7 + $0x490] sm:$0xff] }
  0xd6   : > { %1613 = vmatprep.mubr.f32.mxu0 %v3370_v6  ;;  %v379_v4 = vld [vmem:[%s3745_s7 + $0x4b0] sm:$0xff] }
  0xd8   : > { %1100 = vmatmul.mubr.f32.vlgmr.msra.gmra.mrb[0].mxu1 %v231_v5  ;;  %v378_v5 = vld [vmem:[%s3745_s7 + $0x4a8] sm:$0xff] }
  0xd9   : > { %2687 = vmatmul.mubr.msk.f32.vlgmr.msra.gmra.mrb[0].mxu0 %vm681_vm0, %v235_v7  ;;  %1105 = vmatprep.mubr.f32.mxu1 %v239_v8  ;;  %v382_v7 = vld [vmem:[%s3745_s7 + $0x4c8] sm:$0xff] }
  0xda   : > { %1619 = vmatprep.mubr.f32.mxu0 %v3370_v6  ;;  %v386_v8 = vld [vmem:[%s3745_s7 + $0x4e8] sm:$0xff] }
  0xdc   : > { %1106 = vmatmul.mubr.f32.gmra.mrb[2].mxu1 %v238_v9  ;;  %v385_v9 = vld [vmem:[%s3745_s7 + $0x4e0] sm:$0xff] }
  0xdd   : > { %2688 = vmatmul.mubr.msk.f32.gmra.mrb[2].mxu0 %vm681_vm0, %v242_v10  ;;  %1111 = vmatprep.mubr.f32.mxu1 %v246_v11  ;;  %v389_v10 = vld [vmem:[%s3745_s7 + $0x500] sm:$0xff] }
  0xde   : > { %1625 = vmatprep.mubr.f32.mxu0 %v3370_v6  ;;  %v393_v11 = vld [vmem:[%s3745_s7 + $0x520] sm:$0xff] }
  0xe0   : > { %1112 = vmatmul.mubr.f32.gmra.mrb[4].mxu1 %v245_v12  ;;  %v392_v12 = vld [vmem:[%s3745_s7 + $0x518] sm:$0xff] }
  0xe1   : > { %2689 = vmatmul.mubr.msk.f32.gmra.mrb[4].mxu0 %vm681_vm0, %v249_v13  ;;  %1117 = vmatprep.mubr.f32.mxu1 %v253_v14  ;;  %v396_v13 = vld [vmem:[%s3745_s7 + $0x538] sm:$0xff] }
  0xe2   : > { %1631 = vmatprep.mubr.f32.mxu0 %v3370_v6  ;;  %v400_v14 = vld [vmem:[%s3745_s7 + $0x558] sm:$0xff] }
  0xe4   : > { %1118 = vmatmul.mubr.f32.gmra.mrb[6].mxu1 %v252_v15  ;;  %v399_v15 = vld [vmem:[%s3745_s7 + $0x550] sm:$0xff] }
  0xe5   : > { %2690 = vmatmul.mubr.msk.f32.gmra.mrb[6].mxu0 %vm681_vm0, %v256_v16  ;;  %1123 = vmatprep.mubr.f32.mxu1 %v260_v17  ;;  %v403_v16 = vld [vmem:[%s3745_s7 + $0x570] sm:$0xff] }
  0xe6   : > { %1637 = vmatprep.mubr.f32.mxu0 %v3370_v6  ;;  %v407_v17 = vld [vmem:[%s3745_s7 + $0x590] sm:$0xff] }
  0xe8   : > { %1124 = vmatmul.mubr.f32.gmra.mrb[8].mxu1 %v259_v18  ;;  %v406_v18 = vld [vmem:[%s3745_s7 + $0x588] sm:$0xff] }
  0xe9   : > { %2691 = vmatmul.mubr.msk.f32.gmra.mrb[8].mxu0 %vm681_vm0, %v263_v19  ;;  %1129 = vmatprep.mubr.f32.mxu1 %v267_v20  ;;  %v410_v19 = vld [vmem:[%s3745_s7 + $0x5a8] sm:$0xff] }
  0xea   : > { %1643 = vmatprep.mubr.f32.mxu0 %v3370_v6  ;;  %v414_v20 = vld [vmem:[%s3745_s7 + $0x5c8] sm:$0xff] }
  0xec   : > { %1130 = vmatmul.mubr.f32.gmra.mrb[10].mxu1 %v266_v21  ;;  %v413_v21 = vld [vmem:[%s3745_s7 + $0x5c0] sm:$0xff] }
  0xed   : > { %2692 = vmatmul.mubr.msk.f32.gmra.mrb[10].mxu0 %vm681_vm0, %v270_v22  ;;  %1135 = vmatprep.mubr.f32.mxu1 %v274_v23  ;;  %v417_v22 = vld [vmem:[%s3745_s7 + $0x5e0] sm:$0xff] }
  0xee   : > { %1649 = vmatprep.mubr.f32.mxu0 %v3370_v6  ;;  %v421_v23 = vld [vmem:[%s3745_s7 + $0x600] sm:$0xff] }
  0xf0   : > { %1136 = vmatmul.mubr.f32.gmra.mrb[12].mxu1 %v273_v24  ;;  %v420_v24 = vld [vmem:[%s3745_s7 + $0x5f8] sm:$0xff] }
  0xf1   : > { %2693 = vmatmul.mubr.msk.f32.gmra.mrb[12].mxu0 %vm681_vm0, %v277_v25  ;;  %1141 = vmatprep.mubr.f32.mxu1 %v281_v26  ;;  %v424_v25 = vld [vmem:[%s3745_s7 + $0x618] sm:$0xff] }
  0xf2   : > { %1655 = vmatprep.mubr.f32.mxu0 %v3370_v6  ;;  %v428_v26 = vld [vmem:[%s3745_s7 + $0x638] sm:$0xff] }
  0xf4   : > { %1142 = vmatmul.mubr.f32.gmra.mrb[14].mxu1 %v280_v27  ;;  %v427_v27 = vld [vmem:[%s3745_s7 + $0x630] sm:$0xff] }
  0xf5   : > { %2694 = vmatmul.mubr.msk.f32.gmra.mrb[14].mxu0 %vm681_vm0, %v284_v28  ;;  %1147 = vmatprep.mubr.f32.mxu1 %v288_v29  ;;  %v431_v28 = vld [vmem:[%s3745_s7 + $0x650] sm:$0xff] }
  0xf6   : > { %1661 = vmatprep.mubr.f32.mxu0 %v3370_v6  ;;  %v435_v29 = vld [vmem:[%s3745_s7 + $0x670] sm:$0xff] }
  0xf8   : > { %1148 = vmatmul.mubr.f32.gmra.mrb[16].mxu1 %v287_v30  ;;  %v434_v30 = vld [vmem:[%s3745_s7 + $0x668] sm:$0xff] }
  0xf9   : > { %2695 = vmatmul.mubr.msk.f32.gmra.mrb[16].mxu0 %vm681_vm0, %v291_v31  ;;  %1153 = vmatprep.mubr.f32.mxu1 %v295_v32  ;;  %v438_v31 = vld [vmem:[%s3745_s7 + $0x688] sm:$0xff] }
  0xfa   : > { %1667 = vmatprep.mubr.f32.mxu0 %v3370_v6  ;;  %v442_v32 = vld [vmem:[%s3745_s7 + $0x6a8] sm:$0xff] }
  0xfc   : > { %1154 = vmatmul.mubr.f32.gmra.mrb[18].mxu1 %v294_v33  ;;  %v441_v33 = vld [vmem:[%s3745_s7 + $0x6a0] sm:$0xff] }
  0xfd   : > { %2696 = vmatmul.mubr.msk.f32.gmra.mrb[18].mxu0 %vm681_vm0, %v298_v34  ;;  %1159 = vmatprep.mubr.f32.mxu1 %v302_v35  ;;  %v445_v34 = vld [vmem:[%s3745_s7 + $0x6c0] sm:$0xff] }
  0xfe   : > { %1673 = vmatprep.mubr.f32.mxu0 %v3370_v6  ;;  %v449_v35 = vld [vmem:[%s3745_s7 + $0x6e0] sm:$0xff] }
 0x100   : > { %1160 = vmatmul.mubr.f32.gmra.mrb[20].mxu1 %v301_v36  ;;  %v448_v36 = vld [vmem:[%s3745_s7 + $0x6d8] sm:$0xff] }
 0x101   : > { %2697 = vmatmul.mubr.msk.f32.gmra.mrb[20].mxu0 %vm681_vm0, %v305_v37  ;;  %1165 = vmatprep.mubr.f32.mxu1 %v309_v38  ;;  %v452_v37 = vld [vmem:[%s3745_s7 + $0x6f8] sm:$0xff]  ;;  %v5402_v38 = vlaneseq }
 0x102   : > { %1679 = vmatprep.mubr.f32.mxu0 %v3370_v6 }
 0x104   : > { %1166 = vmatmul.mubr.f32.gmra.mrb[22].mxu1 %v308_v39  ;;  %v672_v39 = vshrl.u32 %v5402_v38, 7 }
 0x105   : > { %2698 = vmatmul.mubr.msk.f32.gmra.mrb[22].mxu0 %vm681_vm0, %v312_v40  ;;  %1171 = vmatprep.mubr.f32.mxu1 %v316_v41  ;;  %v669_v41 = vld [vmem:[%s5398_s2] sm:$0x3] }
 0x106   : > { %1685 = vmatprep.mubr.f32.mxu0 %v3370_v6  ;;  %v4408_v40 = vsub.s32 0, %v672_v39 }
 0x108   : > { %1172 = vmatmul.mubr.f32.gmra.mrb[24].mxu1 %v315_v42  ;;  %5442 = vst [vmem:[#allocation5_spill] sm:$0xff] %v4408_v40  ;;  %v4413_v42 = vsub.s32 1, %v672_v39 }
 0x109   : > { %2699 = vmatmul.mubr.msk.f32.gmra.mrb[24].mxu0 %vm681_vm0, %v319_v43  ;;  %1177 = vmatprep.mubr.f32.mxu1 %v323_v44  ;;  %v4416_v43 = vrot.slane %v669_v41, %v4408_v40 }
 0x10a   : > { %1691 = vmatprep.mubr.f32.mxu0 %v3370_v6  ;;  %5443 = vst [vmem:[#allocation6_spill] sm:$0xff] %v4413_v42 }
 0x10c   : > { %1178 = vmatmul.mubr.f32.gmra.mrb[26].mxu1 %v322_v45 }
 0x10d   : > { %2700 = vmatmul.mubr.msk.f32.gmra.mrb[26].mxu0 %vm681_vm0, %v326_v46  ;;  %1183 = vmatprep.mubr.f32.mxu1 %v330_v47 }
 0x10e   : > { %1697 = vmatprep.mubr.f32.mxu0 %v3370_v6 }
 0x110   : > { %1184 = vmatmul.mubr.f32.gmra.mrb[28].mxu1 %v329_v48 }
 0x111   : > { %2701 = vmatmul.mubr.msk.f32.gmra.mrb[28].mxu0 %vm681_vm0, %v333_v49  ;;  %1189 = vmatprep.mubr.f32.mxu1 %v337_v50 }
 0x112   : > { %1703 = vmatprep.mubr.f32.mxu0 %v3370_v6 }
 0x114   : > { %1190 = vmatmul.mubr.f32.gmra.mrb[30].mxu1 %v336_v51 }
 0x115   : > { %2702 = vmatmul.mubr.msk.f32.gmra.mrb[30].mxu0 %vm681_vm0, %v340_v52  ;;  %1195 = vmatprep.mubr.f32.mxu1 %v344_v53 }
 0x116   : > { %1709 = vmatprep.mubr.f32.mxu0 %v3370_v6 }
 0x118   : > { %1196 = vmatmul.mubr.f32.gmra.mrb[32].mxu1 %v343_v54 }
 0x119   : > { %2703 = vmatmul.mubr.msk.f32.gmra.mrb[32].mxu0 %vm681_vm0, %v347_v55  ;;  %1201 = vmatprep.mubr.f32.mxu1 %v351_v56 }
 0x11a   : > { %1715 = vmatprep.mubr.f32.mxu0 %v3370_v6 }
 0x11c   : > { %1202 = vmatmul.mubr.f32.gmra.mrb[34].mxu1 %v350_v57 }
 0x11d   : > { %2704 = vmatmul.mubr.msk.f32.gmra.mrb[34].mxu0 %vm681_vm0, %v354_v58  ;;  %1207 = vmatprep.mubr.f32.mxu1 %v358_v59 }
 0x11e   : > { %1721 = vmatprep.mubr.f32.mxu0 %v3370_v6 }
 0x120   : > { %1208 = vmatmul.mubr.f32.gmra.mrb[36].mxu1 %v357_v60 }
 0x121   : > { %2705 = vmatmul.mubr.msk.f32.gmra.mrb[36].mxu0 %vm681_vm0, %v361_v61  ;;  %1213 = vmatprep.mubr.f32.mxu1 %v365_v62 }
 0x122   : > { %1727 = vmatprep.mubr.f32.mxu0 %v3370_v6 }
 0x124   : > { %1214 = vmatmul.mubr.f32.gmra.mrb[38].mxu1 %v364_v63 }
 0x125   : > { %2706 = vmatmul.mubr.msk.f32.gmra.mrb[38].mxu0 %vm681_vm0, %v368_v0  ;;  %1219 = vmatprep.mubr.f32.mxu1 %v372_v1 }
 0x126   : > { %1733 = vmatprep.mubr.f32.mxu0 %v3370_v6 }
 0x128   : > { %1220 = vmatmul.mubr.f32.gmra.mrb[40].mxu1 %v371_v2 }
 0x129   : > { %2707 = vmatmul.mubr.msk.f32.gmra.mrb[40].mxu0 %vm681_vm0, %v375_v3  ;;  %1225 = vmatprep.mubr.f32.mxu1 %v379_v4 }
 0x12a   : > { %1739 = vmatprep.mubr.f32.mxu0 %v3370_v6 }
 0x12c   : > { %1226 = vmatmul.mubr.f32.gmra.mrb[42].mxu1 %v378_v5 }
 0x12d   : > { %2708 = vmatmul.mubr.msk.f32.gmra.mrb[42].mxu0 %vm681_vm0, %v382_v7  ;;  %1231 = vmatprep.mubr.f32.mxu1 %v386_v8 }
 0x12e   : > { %1745 = vmatprep.mubr.f32.mxu0 %v3370_v6 }
 0x130   : > { %1232 = vmatmul.mubr.f32.gmra.mrb[44].mxu1 %v385_v9 }
 0x131   : > { %2709 = vmatmul.mubr.msk.f32.gmra.mrb[44].mxu0 %vm681_vm0, %v389_v10  ;;  %1237 = vmatprep.mubr.f32.mxu1 %v393_v11 }
 0x132   : > { %1751 = vmatprep.mubr.f32.mxu0 %v3370_v6 }
 0x134   : > { %1238 = vmatmul.mubr.f32.gmra.mrb[46].mxu1 %v392_v12 }
 0x135   : > { %2710 = vmatmul.mubr.msk.f32.gmra.mrb[46].mxu0 %vm681_vm0, %v396_v13  ;;  %1243 = vmatprep.mubr.f32.mxu1 %v400_v14 }
 0x136   : > { %1757 = vmatprep.mubr.f32.mxu0 %v3370_v6 }
 0x138   : > { %1244 = vmatmul.mubr.f32.gmra.mrb[48].mxu1 %v399_v15 }
 0x139   : > { %2711 = vmatmul.mubr.msk.f32.gmra.mrb[48].mxu0 %vm681_vm0, %v403_v16  ;;  %1249 = vmatprep.mubr.f32.mxu1 %v407_v17 }
 0x13a   : > { %1763 = vmatprep.mubr.f32.mxu0 %v3370_v6 }
 0x13c   : > { %1250 = vmatmul.mubr.f32.gmra.mrb[50].mxu1 %v406_v18 }
 0x13d   : > { %2712 = vmatmul.mubr.msk.f32.gmra.mrb[50].mxu0 %vm681_vm0, %v410_v19  ;;  %1255 = vmatprep.mubr.f32.mxu1 %v414_v20 }
 0x13e   : > { %1769 = vmatprep.mubr.f32.mxu0 %v3370_v6 }
 0x140   : > { %1256 = vmatmul.mubr.f32.gmra.mrb[52].mxu1 %v413_v21 }
 0x141   : > { %2713 = vmatmul.mubr.msk.f32.gmra.mrb[52].mxu0 %vm681_vm0, %v417_v22  ;;  %1261 = vmatprep.mubr.f32.mxu1 %v421_v23 }
 0x142   : > { %1775 = vmatprep.mubr.f32.mxu0 %v3370_v6 }
 0x144   : > { %1262 = vmatmul.mubr.f32.gmra.mrb[54].mxu1 %v420_v24 }
 0x145   : > { %2714 = vmatmul.mubr.msk.f32.gmra.mrb[54].mxu0 %vm681_vm0, %v424_v25  ;;  %1267 = vmatprep.mubr.f32.mxu1 %v428_v26 }
 0x146   : > { %1781 = vmatprep.mubr.f32.mxu0 %v3370_v6 }
 0x148   : > { %1268 = vmatmul.mubr.f32.gmra.mrb[56].mxu1 %v427_v27 }
 0x149   : > { %2715 = vmatmul.mubr.msk.f32.gmra.mrb[56].mxu0 %vm681_vm0, %v431_v28  ;;  %1273 = vmatprep.mubr.f32.mxu1 %v435_v29 }
 0x14a   : > { %1787 = vmatprep.mubr.f32.mxu0 %v3370_v6 }
 0x14c   : > { %1274 = vmatmul.mubr.f32.gmra.mrb[58].mxu1 %v434_v30 }
 0x14d   : > { %2716 = vmatmul.mubr.msk.f32.gmra.mrb[58].mxu0 %vm681_vm0, %v438_v31  ;;  %1279 = vmatprep.mubr.f32.mxu1 %v442_v32 }
 0x14e   : > { %1793 = vmatprep.mubr.f32.mxu0 %v3370_v6 }
 0x150   : > { %1280 = vmatmul.mubr.f32.gmra.mrb[60].mxu1 %v441_v33 }
 0x151   : > { %2717 = vmatmul.mubr.msk.f32.gmra.mrb[60].mxu0 %vm681_vm0, %v445_v34  ;;  %1285 = vmatprep.mubr.f32.mxu1 %v449_v35 }
 0x152   : > { %1799 = vmatprep.mubr.f32.mxu0 %v3370_v6  ;;  %v4419_v6 = vrot.slane %v669_v41, %v4413_v42 }
 0x154   : > { %1286 = vmatmul.mubr.f32.gmra.mrb[62].mxu1 %v448_v36 }
 0x155   : > { %2718 = vmatmul.mubr.msk.f32.gmra.mrb[62].mxu0 %vm681_vm0, %v452_v37 }
 0x1ab   : > { %v1101_v44 = vpop.f32.mrb[0].mxu1 }
 0x1ac   : > { %v2943_v45 = vadd.f32 %v1101_v44, %v4416_v43  ;;  %v1615_v46 = vpop.f32.mrb[0].mxu0  ;;  %v1103_v47 = vpop.f32.mrb[1].mxu1 }
 0x1ad   : > { %v2945_v48 = vadd.f32 %v1103_v47, %v4419_v6  ;;  %v1617_v49 = vpop.f32.mrb[1].mxu0 }
 0x1ae   : > { %v4423_v50 = vadd.f32 %v2943_v45, %v1615_v46 }
 0x1af   : > { %v4425_v51 = vadd.f32 %v2945_v48, %v1617_v49  ;;  %v1107_v52 = vpop.f32.mrb[2].mxu1 }
 0x1b0   : > { %v2947_v53 = vadd.f32 %v1107_v52, %v4416_v43  ;;  %v1621_v54 = vpop.f32.mrb[2].mxu0  ;;  %v1109_v55 = vpop.f32.mrb[3].mxu1 }
 0x1b1   : > { %v2949_v56 = vadd.f32 %v1109_v55, %v4419_v6  ;;  %v1623_v57 = vpop.f32.mrb[3].mxu0  ;;  %v1806_v58 = vadd.f32 %v4425_v51, %v4423_v50 }
 0x1b2   : > { %v4431_v59 = vadd.f32 %v2947_v53, %v1621_v54 }
 0x1b3   : > { %v4433_v60 = vadd.f32 %v2949_v56, %v1623_v57  ;;  %1807 = vadd.xlane.f32.xlu0 %v1806_v58  ;;  %v1113_v61 = vpop.f32.mrb[4].mxu1 }
 0x1b4   : > { %v1627_v62 = vpop.f32.mrb[4].mxu0  ;;  %v2951_v63 = vadd.f32 %v1113_v61, %v4416_v43  ;;  %v1115_v0 = vpop.f32.mrb[5].mxu1 }
 0x1b5   : > { %v2953_v1 = vadd.f32 %v1115_v0, %v4419_v6  ;;  %v1629_v2 = vpop.f32.mrb[5].mxu0  ;;  %v1809_v3 = vadd.f32 %v4433_v60, %v4431_v59 }
 0x1b6   : > { %v4439_v4 = vadd.f32 %v2951_v63, %v1627_v62 }
 0x1b7   : > { %v4441_v5 = vadd.f32 %v2953_v1, %v1629_v2  ;;  %1810 = vadd.xlane.f32.xlu0 %v1809_v3  ;;  %v1119_v7 = vpop.f32.mrb[6].mxu1 }
 0x1b8   : > { %v1633_v8 = vpop.f32.mrb[6].mxu0  ;;  %v2955_v9 = vadd.f32 %v1119_v7, %v4416_v43  ;;  %v1121_v10 = vpop.f32.mrb[7].mxu1 }
 0x1b9   : > { %v2957_v11 = vadd.f32 %v1121_v10, %v4419_v6  ;;  %v1635_v12 = vpop.f32.mrb[7].mxu0  ;;  %v1812_v13 = vadd.f32 %v4441_v5, %v4439_v4 }
 0x1ba   : > { %v4447_v14 = vadd.f32 %v2955_v9, %v1633_v8 }
 0x1bb   : > { %v4449_v15 = vadd.f32 %v2957_v11, %v1635_v12  ;;  %1813 = vadd.xlane.f32.xlu1 %v1812_v13  ;;  %v1125_v16 = vpop.f32.mrb[8].mxu1 }
 0x1bc   : > { %v1639_v17 = vpop.f32.mrb[8].mxu0  ;;  %v2959_v18 = vadd.f32 %v1125_v16, %v4416_v43  ;;  %v1127_v19 = vpop.f32.mrb[9].mxu1 }
 0x1bd   : > { %v2961_v20 = vadd.f32 %v1127_v19, %v4419_v6  ;;  %v1641_v21 = vpop.f32.mrb[9].mxu0  ;;  %v1815_v22 = vadd.f32 %v4449_v15, %v4447_v14 }
 0x1be   : > { %v4455_v23 = vadd.f32 %v2959_v18, %v1639_v17 }
 0x1bf   : > { %v4457_v24 = vadd.f32 %v2961_v20, %v1641_v21  ;;  %1816 = vadd.xlane.f32.xlu1 %v1815_v22  ;;  %v1131_v25 = vpop.f32.mrb[10].mxu1 }
 0x1c0   : > { %v1645_v26 = vpop.f32.mrb[10].mxu0  ;;  %v2963_v27 = vadd.f32 %v1131_v25, %v4416_v43  ;;  %v1133_v28 = vpop.f32.mrb[11].mxu1 }
 0x1c1   : > { %v2965_v29 = vadd.f32 %v1133_v28, %v4419_v6  ;;  %v1647_v30 = vpop.f32.mrb[11].mxu0  ;;  %v1818_v31 = vadd.f32 %v4457_v24, %v4455_v23 }
 0x1c2   : > { %v4463_v32 = vadd.f32 %v2963_v27, %v1645_v26 }
 0x1c3   : > { %v4465_v33 = vadd.f32 %v2965_v29, %v1647_v30  ;;  %1819 = vadd.xlane.f32.xlu0 %v1818_v31  ;;  %v1137_v34 = vpop.f32.mrb[12].mxu1 }
 0x1c4   : > { %v1651_v35 = vpop.f32.mrb[12].mxu0  ;;  %v2967_v36 = vadd.f32 %v1137_v34, %v4416_v43  ;;  %v1139_v37 = vpop.f32.mrb[13].mxu1 }
 0x1c5   : > { %v2969_v39 = vadd.f32 %v1139_v37, %v4419_v6  ;;  %v1653_v41 = vpop.f32.mrb[13].mxu0  ;;  %v1821_v44 = vadd.f32 %v4465_v33, %v4463_v32 }
 0x1c6   : > { %v4471_v45 = vadd.f32 %v2967_v36, %v1651_v35 }
 0x1c7   : > { %v4473_v46 = vadd.f32 %v2969_v39, %v1653_v41  ;;  %1822 = vadd.xlane.f32.xlu1 %v1821_v44  ;;  %v1143_v47 = vpop.f32.mrb[14].mxu1 }
 0x1c8   : > { %v1657_v48 = vpop.f32.mrb[14].mxu0  ;;  %v2971_v49 = vadd.f32 %v1143_v47, %v4416_v43  ;;  %v1145_v52 = vpop.f32.mrb[15].mxu1 }
 0x1c9   : > { %v2973_v53 = vadd.f32 %v1145_v52, %v4419_v6  ;;  %v1659_v54 = vpop.f32.mrb[15].mxu0  ;;  %v1824_v55 = vadd.f32 %v4473_v46, %v4471_v45 }
 0x1ca   : > { %v4479_v56 = vadd.f32 %v2971_v49, %v1657_v48 }
 0x1cb   : > { %v4481_v57 = vadd.f32 %v2973_v53, %v1659_v54  ;;  %1825 = vadd.xlane.f32.xlu0 %v1824_v55  ;;  %v1149_v58 = vpop.f32.mrb[16].mxu1 }
 0x1cc   : > { %v1663_v61 = vpop.f32.mrb[16].mxu0  ;;  %v2975_v62 = vadd.f32 %v1149_v58, %v4416_v43  ;;  %v1151_v63 = vpop.f32.mrb[17].mxu1 }
 0x1cd   : > { %v2977_v0 = vadd.f32 %v1151_v63, %v4419_v6  ;;  %v1665_v1 = vpop.f32.mrb[17].mxu0  ;;  %v1827_v2 = vadd.f32 %v4481_v57, %v4479_v56 }
 0x1ce   : > { %v4487_v3 = vadd.f32 %v2975_v62, %v1663_v61 }
 0x1cf   : > { %v4489_v7 = vadd.f32 %v2977_v0, %v1665_v1  ;;  %1828 = vadd.xlane.f32.xlu1 %v1827_v2  ;;  %v1155_v8 = vpop.f32.mrb[18].mxu1 }
 0x1d0   : > { %v1669_v9 = vpop.f32.mrb[18].mxu0  ;;  %v2979_v10 = vadd.f32 %v1155_v8, %v4416_v43  ;;  %v1157_v11 = vpop.f32.mrb[19].mxu1 }
 0x1d1   : > { %v2981_v12 = vadd.f32 %v1157_v11, %v4419_v6  ;;  %v1671_v13 = vpop.f32.mrb[19].mxu0  ;;  %v1830_v16 = vadd.f32 %v4489_v7, %v4487_v3 }
 0x1d2   : > { %v4495_v17 = vadd.f32 %v2979_v10, %v1669_v9 }
 0x1d3   : > { %v4497_v18 = vadd.f32 %v2981_v12, %v1671_v13  ;;  %1831 = vadd.xlane.f32.xlu0 %v1830_v16  ;;  %v1161_v19 = vpop.f32.mrb[20].mxu1 }
 0x1d4   : > { %v1675_v20 = vpop.f32.mrb[20].mxu0  ;;  %v2983_v21 = vadd.f32 %v1161_v19, %v4416_v43  ;;  %v1163_v22 = vpop.f32.mrb[21].mxu1 }
 0x1d5   : > { %v2985_v25 = vadd.f32 %v1163_v22, %v4419_v6  ;;  %v1677_v26 = vpop.f32.mrb[21].mxu0  ;;  %v1833_v27 = vadd.f32 %v4497_v18, %v4495_v17 }
 0x1d6   : > { %v4503_v28 = vadd.f32 %v2983_v21, %v1675_v20 }
 0x1d7   : > { %v4505_v29 = vadd.f32 %v2985_v25, %v1677_v26  ;;  %1834 = vadd.xlane.f32.xlu1 %v1833_v27  ;;  %v1167_v30 = vpop.f32.mrb[22].mxu1 }
 0x1d8   : > { %v1681_v31 = vpop.f32.mrb[22].mxu0  ;;  %v2987_v34 = vadd.f32 %v1167_v30, %v4416_v43  ;;  %v1169_v35 = vpop.f32.mrb[23].mxu1 }
 0x1d9   : > { %v2989_v36 = vadd.f32 %v1169_v35, %v4419_v6  ;;  %v1683_v37 = vpop.f32.mrb[23].mxu0  ;;  %v1836_v39 = vadd.f32 %v4505_v29, %v4503_v28 }
 0x1da   : > { %v4511_v41 = vadd.f32 %v2987_v34, %v1681_v31 }
 0x1db   : > { %v4513_v44 = vadd.f32 %v2989_v36, %v1683_v37  ;;  %1837 = vadd.xlane.f32.xlu0 %v1836_v39  ;;  %v1173_v47 = vpop.f32.mrb[24].mxu1 }
 0x1dc   : > { %v1687_v48 = vpop.f32.mrb[24].mxu0  ;;  %v2991_v49 = vadd.f32 %v1173_v47, %v4416_v43  ;;  %v1175_v52 = vpop.f32.mrb[25].mxu1 }
 0x1dd   : > { %v2993_v53 = vadd.f32 %v1175_v52, %v4419_v6  ;;  %v1689_v54 = vpop.f32.mrb[25].mxu0  ;;  %v1839_v55 = vadd.f32 %v4513_v44, %v4511_v41 }
 0x1de   : > { %v4519_v58 = vadd.f32 %v2991_v49, %v1687_v48 }
 0x1df   : > { %v4521_v61 = vadd.f32 %v2993_v53, %v1689_v54  ;;  %1840 = vadd.xlane.f32.xlu1 %v1839_v55  ;;  %v1179_v62 = vpop.f32.mrb[26].mxu1 }
 0x1e0   : > { %v1693_v63 = vpop.f32.mrb[26].mxu0  ;;  %v2995_v0 = vadd.f32 %v1179_v62, %v4416_v43  ;;  %v1181_v1 = vpop.f32.mrb[27].mxu1 }
 0x1e1   : > { %v2997_v2 = vadd.f32 %v1181_v1, %v4419_v6  ;;  %v1695_v8 = vpop.f32.mrb[27].mxu0  ;;  %v1842_v9 = vadd.f32 %v4521_v61, %v4519_v58 }
 0x1e2   : > { %v4527_v10 = vadd.f32 %v2995_v0, %v1693_v63 }
 0x1e3   : > { %v4529_v11 = vadd.f32 %v2997_v2, %v1695_v8  ;;  %1843 = vadd.xlane.f32.xlu0 %v1842_v9  ;;  %v1185_v12 = vpop.f32.mrb[28].mxu1 }
 0x1e4   : > { %v1699_v13 = vpop.f32.mrb[28].mxu0  ;;  %v2999_v16 = vadd.f32 %v1185_v12, %v4416_v43  ;;  %v1187_v19 = vpop.f32.mrb[29].mxu1 }
 0x1e5   : > { %v3001_v20 = vadd.f32 %v1187_v19, %v4419_v6  ;;  %v1701_v21 = vpop.f32.mrb[29].mxu0  ;;  %v1845_v22 = vadd.f32 %v4529_v11, %v4527_v10 }
 0x1e6   : > { %v4535_v25 = vadd.f32 %v2999_v16, %v1699_v13 }
 0x1e7   : > { %v4537_v26 = vadd.f32 %v3001_v20, %v1701_v21  ;;  %1846 = vadd.xlane.f32.xlu1 %v1845_v22  ;;  %v1191_v27 = vpop.f32.mrb[30].mxu1 }
 0x1e8   : > { %v1705_v30 = vpop.f32.mrb[30].mxu0  ;;  %v3003_v31 = vadd.f32 %v1191_v27, %v4416_v43  ;;  %v1193_v34 = vpop.f32.mrb[31].mxu1 }
 0x1e9   : > { %v3005_v35 = vadd.f32 %v1193_v34, %v4419_v6  ;;  %v1707_v36 = vpop.f32.mrb[31].mxu0  ;;  %v1848_v37 = vadd.f32 %v4537_v26, %v4535_v25 }
 0x1ea   : > { %v4543_v39 = vadd.f32 %v3003_v31, %v1705_v30 }
 0x1eb   : > { %v4545_v47 = vadd.f32 %v3005_v35, %v1707_v36  ;;  %1849 = vadd.xlane.f32.xlu0 %v1848_v37  ;;  %v1197_v48 = vpop.f32.mrb[32].mxu1 }
 0x1ec   : > { %v1711_v49 = vpop.f32.mrb[32].mxu0  ;;  %v3007_v52 = vadd.f32 %v1197_v48, %v4416_v43  ;;  %v1199_v53 = vpop.f32.mrb[33].mxu1 }
 0x1ed   : > { %v3009_v54 = vadd.f32 %v1199_v53, %v4419_v6  ;;  %v1713_v55 = vpop.f32.mrb[33].mxu0  ;;  %v1851_v62 = vadd.f32 %v4545_v47, %v4543_v39 }
 0x1ee   : > { %v4551_v63 = vadd.f32 %v3007_v52, %v1711_v49 }
 0x1ef   : > { %v4553_v0 = vadd.f32 %v3009_v54, %v1713_v55  ;;  %1852 = vadd.xlane.f32.xlu1 %v1851_v62  ;;  %v1203_v1 = vpop.f32.mrb[34].mxu1 }
 0x1f0   : > { %v1717_v2 = vpop.f32.mrb[34].mxu0  ;;  %v3011_v8 = vadd.f32 %v1203_v1, %v4416_v43  ;;  %v1205_v9 = vpop.f32.mrb[35].mxu1 }
 0x1f1   : > { %v3013_v12 = vadd.f32 %v1205_v9, %v4419_v6  ;;  %v1719_v13 = vpop.f32.mrb[35].mxu0  ;;  %v1854_v16 = vadd.f32 %v4553_v0, %v4551_v63 }
 0x1f2   : > { %v4559_v19 = vadd.f32 %v3011_v8, %v1717_v2 }
 0x1f3   : > { %v4561_v20 = vadd.f32 %v3013_v12, %v1719_v13  ;;  %1855 = vadd.xlane.f32.xlu0 %v1854_v16  ;;  %v1209_v21 = vpop.f32.mrb[36].mxu1 }
 0x1f4   : > { %v1723_v22 = vpop.f32.mrb[36].mxu0  ;;  %v3015_v27 = vadd.f32 %v1209_v21, %v4416_v43  ;;  %v1211_v30 = vpop.f32.mrb[37].mxu1 }
 0x1f5   : > { %v3017_v31 = vadd.f32 %v1211_v30, %v4419_v6  ;;  %v1725_v34 = vpop.f32.mrb[37].mxu0  ;;  %v1857_v35 = vadd.f32 %v4561_v20, %v4559_v19 }
 0x1f6   : > { %v4567_v36 = vadd.f32 %v3015_v27, %v1723_v22 }
 0x1f7   : > { %v4569_v37 = vadd.f32 %v3017_v31, %v1725_v34  ;;  %1858 = vadd.xlane.f32.xlu1 %v1857_v35  ;;  %v1215_v48 = vpop.f32.mrb[38].mxu1 }
 0x1f8   : > { %v1729_v49 = vpop.f32.mrb[38].mxu0  ;;  %v3019_v52 = vadd.f32 %v1215_v48, %v4416_v43  ;;  %v1217_v53 = vpop.f32.mrb[39].mxu1 }
 0x1f9   : > { %v3021_v54 = vadd.f32 %v1217_v53, %v4419_v6  ;;  %v1731_v55 = vpop.f32.mrb[39].mxu0  ;;  %v1860_v62 = vadd.f32 %v4569_v37, %v4567_v36 }
 0x1fa   : > { %v4575_v1 = vadd.f32 %v3019_v52, %v1729_v49 }
 0x1fb   : > { %v4577_v2 = vadd.f32 %v3021_v54, %v1731_v55  ;;  %1861 = vadd.xlane.f32.xlu0 %v1860_v62  ;;  %v1221_v8 = vpop.f32.mrb[40].mxu1 }
 0x1fc   : > { %v1735_v9 = vpop.f32.mrb[40].mxu0  ;;  %v3023_v12 = vadd.f32 %v1221_v8, %v4416_v43  ;;  %v1223_v13 = vpop.f32.mrb[41].mxu1 }
 0x1fd   : > { %v3025_v16 = vadd.f32 %v1223_v13, %v4419_v6  ;;  %v1737_v21 = vpop.f32.mrb[41].mxu0  ;;  %v1863_v22 = vadd.f32 %v4577_v2, %v4575_v1 }
 0x1fe   : > { %v4583_v27 = vadd.f32 %v3023_v12, %v1735_v9 }
 0x1ff   : > { %v4585_v30 = vadd.f32 %v3025_v16, %v1737_v21  ;;  %1864 = vadd.xlane.f32.xlu1 %v1863_v22  ;;  %v1227_v31 = vpop.f32.mrb[42].mxu1 }
 0x200   : > { %v1741_v34 = vpop.f32.mrb[42].mxu0  ;;  %v3027_v35 = vadd.f32 %v1227_v31, %v4416_v43  ;;  %v1229_v48 = vpop.f32.mrb[43].mxu1 }
 0x201   : > { %v3029_v49 = vadd.f32 %v1229_v48, %v4419_v6  ;;  %v1743_v52 = vpop.f32.mrb[43].mxu0  ;;  %v1866_v53 = vadd.f32 %v4585_v30, %v4583_v27 }
 0x202   : > { %v4591_v54 = vadd.f32 %v3027_v35, %v1741_v34 }
 0x203   : > { %v4593_v55 = vadd.f32 %v3029_v49, %v1743_v52  ;;  %1867 = vadd.xlane.f32.xlu0 %v1866_v53  ;;  %v1233_v62 = vpop.f32.mrb[44].mxu1 }
 0x204   : > { %v1747_v8 = vpop.f32.mrb[44].mxu0  ;;  %v3031_v9 = vadd.f32 %v1233_v62, %v4416_v43  ;;  %v1235_v12 = vpop.f32.mrb[45].mxu1 }
 0x205   : > { %v3033_v13 = vadd.f32 %v1235_v12, %v4419_v6  ;;  %v1749_v16 = vpop.f32.mrb[45].mxu0  ;;  %v1869_v21 = vadd.f32 %v4593_v55, %v4591_v54 }
 0x206   : > { %v4599_v22 = vadd.f32 %v3031_v9, %v1747_v8 }
 0x207   : > { %v4601_v31 = vadd.f32 %v3033_v13, %v1749_v16  ;;  %1870 = vadd.xlane.f32.xlu1 %v1869_v21  ;;  %v1239_v34 = vpop.f32.mrb[46].mxu1 }
 0x208   : > { %5444 = vst [vmem:[#allocation7_spill] sm:$0xff] %v4599_v22  ;;  %v1753_v35 = vpop.f32.mrb[46].mxu0  ;;  %v3035_v48 = vadd.f32 %v1239_v34, %v4416_v43  ;;  %v1241_v49 = vpop.f32.mrb[47].mxu1 }
 0x209   : > { %5445 = vst [vmem:[#allocation8_spill] sm:$0xff] %v4601_v31  ;;  %v3037_v52 = vadd.f32 %v1241_v49, %v4419_v6  ;;  %v1755_v53 = vpop.f32.mrb[47].mxu0  ;;  %v1872_v62 = vadd.f32 %v4601_v31, %v4599_v22 }
 0x20a   : > { %v4607_v12 = vadd.f32 %v3035_v48, %v1753_v35 }
 0x20b   : > { %v4609_v38 = vadd.f32 %v3037_v52, %v1755_v53  ;;  %1873 = vadd.xlane.f32.xlu0 %v1872_v62  ;;  %v1245_v8 = vpop.f32.mrb[48].mxu1 }
 0x20c   : > { %5446 = vst [vmem:[#allocation9_spill] sm:$0xff] %v4607_v12  ;;  %v1759_v9 = vpop.f32.mrb[48].mxu0  ;;  %v3039_v13 = vadd.f32 %v1245_v8, %v4416_v43  ;;  %v1247_v16 = vpop.f32.mrb[49].mxu1 }
 0x20d   : > { %5447 = vst [vmem:[#allocation10_spill] sm:$0xff] %v4609_v38  ;;  %v3041_v21 = vadd.f32 %v1247_v16, %v4419_v6  ;;  %v1761_v34 = vpop.f32.mrb[49].mxu0  ;;  %v1875_v49 = vadd.f32 %v4609_v38, %v4607_v12 }
 0x20e   : > { %v4615_v42 = vadd.f32 %v3039_v13, %v1759_v9 }
 0x20f   : > { %v4617_v40 = vadd.f32 %v3041_v21, %v1761_v34  ;;  %1876 = vadd.xlane.f32.xlu1 %v1875_v49  ;;  %v1251_v35 = vpop.f32.mrb[50].mxu1 }
 0x210   : > { %5448 = vst [vmem:[#allocation11_spill] sm:$0xff] %v4615_v42  ;;  %v1765_v48 = vpop.f32.mrb[50].mxu0  ;;  %v3043_v52 = vadd.f32 %v1251_v35, %v4416_v43  ;;  %v1253_v53 = vpop.f32.mrb[51].mxu1 }
 0x211   : > { %5449 = vst [vmem:[#allocation12_spill] sm:$0xff] %v4617_v40  ;;  %v3045_v62 = vadd.f32 %v1253_v53, %v4419_v6  ;;  %v1767_v8 = vpop.f32.mrb[51].mxu0  ;;  %v1878_v16 = vadd.f32 %v4617_v40, %v4615_v42 }
 0x212   : > { %v4623_v31 = vadd.f32 %v3043_v52, %v1765_v48 }
 0x213   : > { %v4625_v22 = vadd.f32 %v3045_v62, %v1767_v8  ;;  %1879 = vadd.xlane.f32.xlu0 %v1878_v16  ;;  %v1257_v9 = vpop.f32.mrb[52].mxu1 }
 0x214   : > { %5450 = vst [vmem:[#allocation13_spill] sm:$0xff] %v4623_v31  ;;  %v1771_v13 = vpop.f32.mrb[52].mxu0  ;;  %v3047_v21 = vadd.f32 %v1257_v9, %v4416_v43  ;;  %v1259_v34 = vpop.f32.mrb[53].mxu1 }
 0x215   : > { %5451 = vst [vmem:[#allocation14_spill] sm:$0xff] %v4625_v22  ;;  %v3049_v49 = vadd.f32 %v1259_v34, %v4419_v6  ;;  %v1773_v35 = vpop.f32.mrb[53].mxu0  ;;  %v1881_v53 = vadd.f32 %v4625_v22, %v4623_v31 }
 0x216   : > { %v4631_v38 = vadd.f32 %v3047_v21, %v1771_v13 }
 0x217   : > { %v4633_v12 = vadd.f32 %v3049_v49, %v1773_v35  ;;  %1882 = vadd.xlane.f32.xlu1 %v1881_v53  ;;  %v1263_v48 = vpop.f32.mrb[54].mxu1 }
 0x218   : > { %5452 = vst [vmem:[#allocation15_spill] sm:$0xff] %v4631_v38  ;;  %v1777_v52 = vpop.f32.mrb[54].mxu0  ;;  %v3051_v62 = vadd.f32 %v1263_v48, %v4416_v43  ;;  %v1265_v8 = vpop.f32.mrb[55].mxu1 }
 0x219   : > { %5453 = vst [vmem:[#allocation16_spill] sm:$0xff] %v4633_v12  ;;  %v3053_v16 = vadd.f32 %v1265_v8, %v4419_v6  ;;  %v1779_v9 = vpop.f32.mrb[55].mxu0  ;;  %v1884_v34 = vadd.f32 %v4633_v12, %v4631_v38 }
 0x21a   : > { %v4639_v40 = vadd.f32 %v3051_v62, %v1777_v52 }
 0x21b   : > { %v4641_v42 = vadd.f32 %v3053_v16, %v1779_v9  ;;  %1885 = vadd.xlane.f32.xlu0 %v1884_v34  ;;  %v1269_v13 = vpop.f32.mrb[56].mxu1 }
 0x21c   : > { %5454 = vst [vmem:[#allocation17_spill] sm:$0xff] %v4639_v40  ;;  %v1783_v21 = vpop.f32.mrb[56].mxu0  ;;  %v3055_v49 = vadd.f32 %v1269_v13, %v4416_v43  ;;  %v1271_v35 = vpop.f32.mrb[57].mxu1 }
 0x21d   : > { %5455 = vst [vmem:[#allocation18_spill] sm:$0xff] %v4641_v42  ;;  %v3057_v53 = vadd.f32 %v1271_v35, %v4419_v6  ;;  %v1785_v48 = vpop.f32.mrb[57].mxu0  ;;  %v1887_v8 = vadd.f32 %v4641_v42, %v4639_v40 }
 0x21e   : > { %v4647_v22 = vadd.f32 %v3055_v49, %v1783_v21 }
 0x21f   : > { %v4649_v31 = vadd.f32 %v3057_v53, %v1785_v48  ;;  %1888 = vadd.xlane.f32.xlu1 %v1887_v8  ;;  %v1275_v52 = vpop.f32.mrb[58].mxu1 }
 0x220   : > { %5456 = vst [vmem:[#allocation19_spill] sm:$0xff] %v4647_v22  ;;  %v1789_v62 = vpop.f32.mrb[58].mxu0  ;;  %v3059_v16 = vadd.f32 %v1275_v52, %v4416_v43  ;;  %v1277_v9 = vpop.f32.mrb[59].mxu1 }
 0x221   : > { %5457 = vst [vmem:[#allocation20_spill] sm:$0xff] %v4649_v31  ;;  %v3061_v34 = vadd.f32 %v1277_v9, %v4419_v6  ;;  %v1791_v13 = vpop.f32.mrb[59].mxu0  ;;  %v1890_v35 = vadd.f32 %v4649_v31, %v4647_v22 }
 0x222   : > { %v4655_v12 = vadd.f32 %v3059_v16, %v1789_v62 }
 0x223   : > { %v4657_v38 = vadd.f32 %v3061_v34, %v1791_v13  ;;  %1891 = vadd.xlane.f32.xlu0 %v1890_v35  ;;  %v1281_v21 = vpop.f32.mrb[60].mxu1 }
 0x224   : > { %v1795_v49 = vpop.f32.mrb[60].mxu0  ;;  %v3063_v53 = vadd.f32 %v1281_v21, %v4416_v43  ;;  %v1283_v48 = vpop.f32.mrb[61].mxu1 }
 0x225   : > { %v3065_v8 = vadd.f32 %v1283_v48, %v4419_v6  ;;  %v1797_v52 = vpop.f32.mrb[61].mxu0  ;;  %v1893_v9 = vadd.f32 %v4657_v38, %v4655_v12 }
 0x226   : > { %v4663_v42 = vadd.f32 %v3063_v53, %v1795_v49  ;;  %v5458_v53 = vlaneseq }
 0x227   : > { %v4665_v40 = vadd.f32 %v3065_v8, %v1797_v52  ;;  %1894 = vadd.xlane.f32.xlu1 %v1893_v9  ;;  %v1287_v62 = vpop.f32.mrb[62].mxu1 }
 0x228   : > { %v1801_v16 = vpop.f32.mrb[62].mxu0  ;;  %v3067_v34 = vadd.f32 %v1287_v62, %v4416_v43  ;;  %v1289_v13 = vpop.f32.mrb[63].mxu1  ;;  %v1999_v8 = vand.u32 127, %v5458_v53 }
 0x229   : > { %v3069_v35 = vadd.f32 %v1289_v13, %v4419_v6  ;;  %v1803_v21 = vpop.f32.mrb[63].mxu0  ;;  %v1896_v48 = vadd.f32 %v4665_v40, %v4663_v42 }
 0x22a   : > { %v4671_v31 = vadd.f32 %v3067_v34, %v1801_v16  ;;  %v4678_v52 = vadd.s32 128, %v1999_v8 }
 0x22b   : > { %v4673_v22 = vadd.f32 %v3069_v35, %v1803_v21  ;;  %1897 = vadd.xlane.f32.xlu0 %v1896_v48 }
 0x22c   : > { %vm2002_vm1 = vcmp.lt.s32.totalorder %v4678_v52, 198 }
 0x22d   : > { %v1899_v49 = vadd.f32 %v4673_v22, %v4671_v31 }
 0x22f   : > { %1900 = vadd.xlane.f32.xlu1 %v1899_v49 }
 0x240   : > { %v1808_v43 = vpop.xlane.xlu0 %1807 }
 0x241   : > { %v1902_v9 = vmul.f32 0.005050505, %v1808_v43 }
 0x243   : > { %v4682_v6 = vsub.f32 %v4423_v50, %v1902_v9  ;;  %v1935_v62 = vsub.f32 %v4425_v51, %v1902_v9 }
 0x244   : > { %v1811_v16 = vpop.xlane.xlu0 %1810 }
 0x245   : > { %v1903_v34 = vmul.f32 0.005050505, %v1811_v16  ;;  %v4687_v13 = vsel %vm2002_vm1, %v1935_v62, 0.0  ;;  %v2067_v35 = vmul.f32 %v4682_v6, %v4682_v6 }
 0x246   : > { %v2068_v21 = vmul.f32 %v4687_v13, %v4687_v13 }
 0x247   : > { %v4694_v48 = vsub.f32 %v4431_v59, %v1903_v34  ;;  %v1937_v50 = vsub.f32 %v4433_v60, %v1903_v34 }
 0x248   : > { %v1814_v49 = vpop.xlane.xlu1 %1813  ;;  %v2131_v53 = vadd.f32 %v2068_v21, %v2067_v35 }
 0x249   : > { %v1904_v51 = vmul.f32 0.005050505, %v1814_v49  ;;  %v4699_v8 = vsel %vm2002_vm1, %v1937_v50, 0.0  ;;  %v2069_v43 = vmul.f32 %v4694_v48, %v4694_v48 }
 0x24a   : > { %2132 = vadd.xlane.f32.xlu0 %v2131_v53  ;;  %v2070_v9 = vmul.f32 %v4699_v8, %v4699_v8 }
 0x24b   : > { %v4706_v62 = vsub.f32 %v4439_v4, %v1904_v51  ;;  %v1939_v59 = vsub.f32 %v4441_v5, %v1904_v51 }
 0x24c   : > { %v1817_v60 = vpop.xlane.xlu1 %1816  ;;  %v2134_v16 = vadd.f32 %v2070_v9, %v2069_v43 }
 0x24d   : > { %v1905_v34 = vmul.f32 0.005050505, %v1817_v60  ;;  %v4711_v35 = vsel %vm2002_vm1, %v1939_v59, 0.0  ;;  %v2071_v21 = vmul.f32 %v4706_v62, %v4706_v62 }
 0x24e   : > { %2135 = vadd.xlane.f32.xlu1 %v2134_v16  ;;  %v2072_v50 = vmul.f32 %v4711_v35, %v4711_v35 }
 0x24f   : > { %v4718_v49 = vsub.f32 %v4447_v14, %v1905_v34  ;;  %v1941_v4 = vsub.f32 %v4449_v15, %v1905_v34 }
 0x250   : > { %v1820_v5 = vpop.xlane.xlu0 %1819  ;;  %v2137_v53 = vadd.f32 %v2072_v50, %v2071_v21 }
 0x251   : > { %v1906_v51 = vmul.f32 0.005050505, %v1820_v5  ;;  %v4723_v43 = vsel %vm2002_vm1, %v1941_v4, 0.0  ;;  %v2073_v9 = vmul.f32 %v4718_v49, %v4718_v49 }
 0x252   : > { %2138 = vadd.xlane.f32.xlu0 %v2137_v53  ;;  %v2074_v59 = vmul.f32 %v4723_v43, %v4723_v43 }
 0x253   : > { %v4730_v60 = vsub.f32 %v4455_v23, %v1906_v51  ;;  %v1943_v14 = vsub.f32 %v4457_v24, %v1906_v51 }
 0x254   : > { %v1823_v15 = vpop.xlane.xlu1 %1822  ;;  %v2140_v16 = vadd.f32 %v2074_v59, %v2073_v9 }
 0x255   : > { %v1907_v34 = vmul.f32 0.005050505, %v1823_v15  ;;  %v4735_v21 = vsel %vm2002_vm1, %v1943_v14, 0.0  ;;  %v2075_v50 = vmul.f32 %v4730_v60, %v4730_v60 }
 0x256   : > { %2141 = vadd.xlane.f32.xlu1 %v2140_v16  ;;  %v2076_v4 = vmul.f32 %v4735_v21, %v4735_v21 }
 0x257   : > { %v4742_v5 = vsub.f32 %v4463_v32, %v1907_v34  ;;  %v1945_v23 = vsub.f32 %v4465_v33, %v1907_v34 }
 0x258   : > { %v1826_v24 = vpop.xlane.xlu0 %1825  ;;  %v2143_v53 = vadd.f32 %v2076_v4, %v2075_v50 }
 0x259   : > { %v1908_v51 = vmul.f32 0.005050505, %v1826_v24  ;;  %v4747_v9 = vsel %vm2002_vm1, %v1945_v23, 0.0  ;;  %v2077_v59 = vmul.f32 %v4742_v5, %v4742_v5 }
 0x25a   : > { %2144 = vadd.xlane.f32.xlu0 %v2143_v53  ;;  %v2078_v14 = vmul.f32 %v4747_v9, %v4747_v9 }
 0x25b   : > { %v4754_v15 = vsub.f32 %v4471_v45, %v1908_v51  ;;  %v1947_v32 = vsub.f32 %v4473_v46, %v1908_v51 }
 0x25c   : > { %v1829_v33 = vpop.xlane.xlu1 %1828  ;;  %v2146_v16 = vadd.f32 %v2078_v14, %v2077_v59 }
 0x25d   : > { %v1909_v34 = vmul.f32 0.005050505, %v1829_v33  ;;  %v4759_v50 = vsel %vm2002_vm1, %v1947_v32, 0.0  ;;  %v2079_v4 = vmul.f32 %v4754_v15, %v4754_v15 }
 0x25e   : > { %2147 = vadd.xlane.f32.xlu1 %v2146_v16  ;;  %v2080_v23 = vmul.f32 %v4759_v50, %v4759_v50 }
 0x25f   : > { %v4766_v24 = vsub.f32 %v4479_v56, %v1909_v34  ;;  %v1949_v45 = vsub.f32 %v4481_v57, %v1909_v34 }
 0x260   : > { %v1832_v46 = vpop.xlane.xlu0 %1831  ;;  %v2149_v53 = vadd.f32 %v2080_v23, %v2079_v4 }
 0x261   : > { %v1910_v51 = vmul.f32 0.005050505, %v1832_v46  ;;  %v4771_v59 = vsel %vm2002_vm1, %v1949_v45, 0.0  ;;  %v2081_v14 = vmul.f32 %v4766_v24, %v4766_v24 }
 0x262   : > { %2150 = vadd.xlane.f32.xlu0 %v2149_v53  ;;  %v2082_v32 = vmul.f32 %v4771_v59, %v4771_v59 }
 0x263   : > { %v4778_v33 = vsub.f32 %v4487_v3, %v1910_v51  ;;  %v1951_v56 = vsub.f32 %v4489_v7, %v1910_v51 }
 0x264   : > { %v1835_v57 = vpop.xlane.xlu1 %1834  ;;  %v2152_v16 = vadd.f32 %v2082_v32, %v2081_v14 }
 0x265   : > { %v1911_v34 = vmul.f32 0.005050505, %v1835_v57  ;;  %v4783_v4 = vsel %vm2002_vm1, %v1951_v56, 0.0  ;;  %v2083_v23 = vmul.f32 %v4778_v33, %v4778_v33 }
 0x266   : > { %2153 = vadd.xlane.f32.xlu1 %v2152_v16  ;;  %v2084_v45 = vmul.f32 %v4783_v4, %v4783_v4 }
 0x267   : > { %v4790_v46 = vsub.f32 %v4495_v17, %v1911_v34  ;;  %v1953_v3 = vsub.f32 %v4497_v18, %v1911_v34 }
 0x268   : > { %v1838_v7 = vpop.xlane.xlu0 %1837  ;;  %v2155_v53 = vadd.f32 %v2084_v45, %v2083_v23 }
 0x269   : > { %v1912_v51 = vmul.f32 0.005050505, %v1838_v7  ;;  %v4795_v14 = vsel %vm2002_vm1, %v1953_v3, 0.0  ;;  %v2085_v32 = vmul.f32 %v4790_v46, %v4790_v46 }
 0x26a   : > { %2156 = vadd.xlane.f32.xlu0 %v2155_v53  ;;  %v2086_v56 = vmul.f32 %v4795_v14, %v4795_v14 }
 0x26b   : > { %v4802_v57 = vsub.f32 %v4503_v28, %v1912_v51  ;;  %v1955_v17 = vsub.f32 %v4505_v29, %v1912_v51 }
 0x26c   : > { %v1841_v18 = vpop.xlane.xlu1 %1840  ;;  %v2158_v16 = vadd.f32 %v2086_v56, %v2085_v32 }
 0x26d   : > { %v1913_v34 = vmul.f32 0.005050505, %v1841_v18  ;;  %v4807_v23 = vsel %vm2002_vm1, %v1955_v17, 0.0  ;;  %v2087_v45 = vmul.f32 %v4802_v57, %v4802_v57 }
 0x26e   : > { %2159 = vadd.xlane.f32.xlu1 %v2158_v16  ;;  %v2088_v3 = vmul.f32 %v4807_v23, %v4807_v23 }
 0x26f   : > { %v4814_v7 = vsub.f32 %v4511_v41, %v1913_v34  ;;  %v1957_v28 = vsub.f32 %v4513_v44, %v1913_v34 }
 0x270   : > { %v1844_v29 = vpop.xlane.xlu0 %1843  ;;  %v2161_v53 = vadd.f32 %v2088_v3, %v2087_v45 }
 0x271   : > { %v1914_v51 = vmul.f32 0.005050505, %v1844_v29  ;;  %v4819_v32 = vsel %vm2002_vm1, %v1957_v28, 0.0  ;;  %v2089_v56 = vmul.f32 %v4814_v7, %v4814_v7 }
 0x272   : > { %2162 = vadd.xlane.f32.xlu0 %v2161_v53  ;;  %v2090_v17 = vmul.f32 %v4819_v32, %v4819_v32 }
 0x273   : > { %v4826_v18 = vsub.f32 %v4519_v58, %v1914_v51  ;;  %v1959_v41 = vsub.f32 %v4521_v61, %v1914_v51 }
 0x274   : > { %v1847_v44 = vpop.xlane.xlu1 %1846  ;;  %v2164_v16 = vadd.f32 %v2090_v17, %v2089_v56 }
 0x275   : > { %v1915_v34 = vmul.f32 0.005050505, %v1847_v44  ;;  %v4831_v45 = vsel %vm2002_vm1, %v1959_v41, 0.0  ;;  %v2091_v3 = vmul.f32 %v4826_v18, %v4826_v18 }
 0x276   : > { %2165 = vadd.xlane.f32.xlu1 %v2164_v16  ;;  %v2092_v28 = vmul.f32 %v4831_v45, %v4831_v45 }
 0x277   : > { %v4838_v29 = vsub.f32 %v4527_v10, %v1915_v34  ;;  %v1961_v58 = vsub.f32 %v4529_v11, %v1915_v34 }
 0x278   : > { %v1850_v61 = vpop.xlane.xlu0 %1849  ;;  %v2167_v53 = vadd.f32 %v2092_v28, %v2091_v3 }
 0x279   : > { %v1916_v51 = vmul.f32 0.005050505, %v1850_v61  ;;  %v4843_v56 = vsel %vm2002_vm1, %v1961_v58, 0.0  ;;  %v2093_v17 = vmul.f32 %v4838_v29, %v4838_v29 }
 0x27a   : > { %2168 = vadd.xlane.f32.xlu0 %v2167_v53  ;;  %v2094_v41 = vmul.f32 %v4843_v56, %v4843_v56 }
 0x27b   : > { %v4850_v44 = vsub.f32 %v4535_v25, %v1916_v51  ;;  %v1963_v10 = vsub.f32 %v4537_v26, %v1916_v51 }
 0x27c   : > { %v1853_v11 = vpop.xlane.xlu1 %1852  ;;  %v2170_v16 = vadd.f32 %v2094_v41, %v2093_v17 }
 0x27d   : > { %v1917_v34 = vmul.f32 0.005050505, %v1853_v11  ;;  %v4855_v3 = vsel %vm2002_vm1, %v1963_v10, 0.0  ;;  %v2095_v28 = vmul.f32 %v4850_v44, %v4850_v44 }
 0x27e   : > { %2171 = vadd.xlane.f32.xlu1 %v2170_v16  ;;  %v2096_v58 = vmul.f32 %v4855_v3, %v4855_v3 }
 0x27f   : > { %v4862_v61 = vsub.f32 %v4543_v39, %v1917_v34  ;;  %v1965_v25 = vsub.f32 %v4545_v47, %v1917_v34 }
 0x280   : > { %v1856_v26 = vpop.xlane.xlu0 %1855  ;;  %v2173_v53 = vadd.f32 %v2096_v58, %v2095_v28 }
 0x281   : > { %v1918_v51 = vmul.f32 0.005050505, %v1856_v26  ;;  %v4867_v17 = vsel %vm2002_vm1, %v1965_v25, 0.0  ;;  %v2097_v41 = vmul.f32 %v4862_v61, %v4862_v61 }
 0x282   : > { %2174 = vadd.xlane.f32.xlu0 %v2173_v53  ;;  %v2098_v10 = vmul.f32 %v4867_v17, %v4867_v17 }
 0x283   : > { %v4874_v11 = vsub.f32 %v4551_v63, %v1918_v51  ;;  %v1967_v39 = vsub.f32 %v4553_v0, %v1918_v51 }
 0x284   : > { %v1859_v47 = vpop.xlane.xlu1 %1858  ;;  %v2176_v16 = vadd.f32 %v2098_v10, %v2097_v41 }
 0x285   : > { %v1919_v34 = vmul.f32 0.005050505, %v1859_v47  ;;  %v4879_v28 = vsel %vm2002_vm1, %v1967_v39, 0.0  ;;  %v2099_v58 = vmul.f32 %v4874_v11, %v4874_v11 }
 0x286   : > { %2177 = vadd.xlane.f32.xlu1 %v2176_v16  ;;  %v2100_v25 = vmul.f32 %v4879_v28, %v4879_v28 }
 0x287   : > { %v4886_v26 = vsub.f32 %v4559_v19, %v1919_v34  ;;  %v1969_v63 = vsub.f32 %v4561_v20, %v1919_v34 }
 0x288   : > { %v1862_v0 = vpop.xlane.xlu0 %1861  ;;  %v2179_v53 = vadd.f32 %v2100_v25, %v2099_v58 }
 0x289   : > { %v1920_v51 = vmul.f32 0.005050505, %v1862_v0  ;;  %v4891_v41 = vsel %vm2002_vm1, %v1969_v63, 0.0  ;;  %v2101_v10 = vmul.f32 %v4886_v26, %v4886_v26 }
 0x28a   : > { %2180 = vadd.xlane.f32.xlu0 %v2179_v53  ;;  %v2102_v39 = vmul.f32 %v4891_v41, %v4891_v41 }
 0x28b   : > { %v4898_v47 = vsub.f32 %v4567_v36, %v1920_v51  ;;  %v1971_v19 = vsub.f32 %v4569_v37, %v1920_v51 }
 0x28c   : > { %v1865_v20 = vpop.xlane.xlu1 %1864  ;;  %v2182_v16 = vadd.f32 %v2102_v39, %v2101_v10 }
 0x28d   : > { %v1921_v34 = vmul.f32 0.005050505, %v1865_v20  ;;  %v4903_v58 = vsel %vm2002_vm1, %v1971_v19, 0.0  ;;  %v2103_v25 = vmul.f32 %v4898_v47, %v4898_v47 }
 0x28e   : > { %2183 = vadd.xlane.f32.xlu1 %v2182_v16  ;;  %v2104_v63 = vmul.f32 %v4903_v58, %v4903_v58 }
 0x28f   : > { %v4910_v0 = vsub.f32 %v4575_v1, %v1921_v34  ;;  %v1973_v36 = vsub.f32 %v4577_v2, %v1921_v34 }
 0x290   : > { %v1868_v37 = vpop.xlane.xlu0 %1867  ;;  %v2185_v53 = vadd.f32 %v2104_v63, %v2103_v25 }
 0x291   : > { %v1922_v51 = vmul.f32 0.005050505, %v1868_v37  ;;  %v4915_v10 = vsel %vm2002_vm1, %v1973_v36, 0.0  ;;  %v2105_v39 = vmul.f32 %v4910_v0, %v4910_v0 }
 0x292   : > { %2186 = vadd.xlane.f32.xlu0 %v2185_v53  ;;  %v2106_v19 = vmul.f32 %v4915_v10, %v4915_v10 }
 0x293   : > { %v4922_v20 = vsub.f32 %v4583_v27, %v1922_v51  ;;  %v1975_v1 = vsub.f32 %v4585_v30, %v1922_v51 }
 0x294   : > { %v1871_v2 = vpop.xlane.xlu1 %1870  ;;  %v2188_v16 = vadd.f32 %v2106_v19, %v2105_v39 }
 0x295   : > { %v1923_v34 = vmul.f32 0.005050505, %v1871_v2  ;;  %v4927_v25 = vsel %vm2002_vm1, %v1975_v1, 0.0  ;;  %v2107_v63 = vmul.f32 %v4922_v20, %v4922_v20  ;;  %v5462_v2 = vld [vmem:[#allocation7_spill] sm:$0xff] }
 0x296   : > { %5459 = vst [vmem:[#allocation21_spill] sm:$0xff] %v4927_v25  ;;  %2189 = vadd.xlane.f32.xlu1 %v2188_v16  ;;  %v2108_v36 = vmul.f32 %v4927_v25, %v4927_v25 }
 0x297   : > { %v4934_v37 = vsub.f32 %v4591_v54, %v1923_v34  ;;  %v1977_v27 = vsub.f32 %v4593_v55, %v1923_v34  ;;  %v5464_v54 = vld [vmem:[#allocation8_spill] sm:$0xff] }
 0x298   : > { %v1874_v30 = vpop.xlane.xlu0 %1873  ;;  %v2191_v53 = vadd.f32 %v2108_v36, %v2107_v63 }
 0x299   : > { %5460 = vst [vmem:[#allocation22_spill] sm:$0xff] %v4934_v37  ;;  %v1924_v51 = vmul.f32 0.005050505, %v1874_v30  ;;  %v4939_v39 = vsel %vm2002_vm1, %v1977_v27, 0.0  ;;  %v2109_v19 = vmul.f32 %v4934_v37, %v4934_v37 }
 0x29a   : > { %5461 = vst [vmem:[#allocation23_spill] sm:$0xff] %v4939_v39  ;;  %2192 = vadd.xlane.f32.xlu0 %v2191_v53  ;;  %v2110_v1 = vmul.f32 %v4939_v39, %v4939_v39  ;;  %v5466_v53 = vld [vmem:[#allocation9_spill] sm:$0xff] }
 0x29b   : > { %v4946_v16 = vsub.f32 %v5462_v2, %v1924_v51  ;;  %v1979_v25 = vsub.f32 %v5464_v54, %v1924_v51  ;;  %v5468_v2 = vld [vmem:[#allocation10_spill] sm:$0xff] }
 0x29c   : > { %v1877_v55 = vpop.xlane.xlu1 %1876  ;;  %v2194_v34 = vadd.f32 %v2110_v1, %v2109_v19 }
 0x29d   : > { %5463 = vst [vmem:[#allocation7_spill] sm:$0xff] %v4946_v16  ;;  %v1925_v63 = vmul.f32 0.005050505, %v1877_v55  ;;  %v4951_v36 = vsel %vm2002_vm1, %v1979_v25, 0.0  ;;  %v2111_v27 = vmul.f32 %v4946_v16, %v4946_v16 }
 0x29e   : > { %5465 = vst [vmem:[#allocation8_spill] sm:$0xff] %v4951_v36  ;;  %2195 = vadd.xlane.f32.xlu1 %v2194_v34  ;;  %v2112_v30 = vmul.f32 %v4951_v36, %v4951_v36  ;;  %v5470_v34 = vld [vmem:[#allocation11_spill] sm:$0xff] }
 0x29f   : > { %v4958_v39 = vsub.f32 %v5466_v53, %v1925_v63  ;;  %v1981_v37 = vsub.f32 %v5468_v2, %v1925_v63  ;;  %v5472_v53 = vld [vmem:[#allocation12_spill] sm:$0xff] }
 0x2a0   : > { %v1880_v51 = vpop.xlane.xlu0 %1879  ;;  %v2197_v54 = vadd.f32 %v2112_v30, %v2111_v27 }
 0x2a1   : > { %5467 = vst [vmem:[#allocation9_spill] sm:$0xff] %v4958_v39  ;;  %v1926_v19 = vmul.f32 0.005050505, %v1880_v51  ;;  %v4963_v1 = vsel %vm2002_vm1, %v1981_v37, 0.0  ;;  %v2113_v25 = vmul.f32 %v4958_v39, %v4958_v39 }
 0x2a2   : > { %5469 = vst [vmem:[#allocation10_spill] sm:$0xff] %v4963_v1  ;;  %2198 = vadd.xlane.f32.xlu0 %v2197_v54  ;;  %v2114_v55 = vmul.f32 %v4963_v1, %v4963_v1  ;;  %v5474_v54 = vld [vmem:[#allocation13_spill] sm:$0xff] }
 0x2a3   : > { %v4970_v36 = vsub.f32 %v5470_v34, %v1926_v19  ;;  %v1983_v16 = vsub.f32 %v5472_v53, %v1926_v19  ;;  %v5476_v34 = vld [vmem:[#allocation14_spill] sm:$0xff] }
 0x2a4   : > { %v1883_v63 = vpop.xlane.xlu1 %1882  ;;  %v2200_v2 = vadd.f32 %v2114_v55, %v2113_v25 }
 0x2a5   : > { %5471 = vst [vmem:[#allocation11_spill] sm:$0xff] %v4970_v36  ;;  %v1927_v27 = vmul.f32 0.005050505, %v1883_v63  ;;  %v4975_v30 = vsel %vm2002_vm1, %v1983_v16, 0.0  ;;  %v2115_v37 = vmul.f32 %v4970_v36, %v4970_v36 }
 0x2a6   : > { %5473 = vst [vmem:[#allocation12_spill] sm:$0xff] %v4975_v30  ;;  %2201 = vadd.xlane.f32.xlu1 %v2200_v2  ;;  %v2116_v51 = vmul.f32 %v4975_v30, %v4975_v30  ;;  %v5478_v2 = vld [vmem:[#allocation15_spill] sm:$0xff] }
 0x2a7   : > { %v4982_v1 = vsub.f32 %v5474_v54, %v1927_v27  ;;  %v1985_v39 = vsub.f32 %v5476_v34, %v1927_v27  ;;  %v5480_v54 = vld [vmem:[#allocation16_spill] sm:$0xff] }
 0x2a8   : > { %v1886_v19 = vpop.xlane.xlu0 %1885  ;;  %v2203_v53 = vadd.f32 %v2116_v51, %v2115_v37 }
 0x2a9   : > { %5475 = vst [vmem:[#allocation13_spill] sm:$0xff] %v4982_v1  ;;  %v1928_v25 = vmul.f32 0.005050505, %v1886_v19  ;;  %v4987_v55 = vsel %vm2002_vm1, %v1985_v39, 0.0  ;;  %v2117_v16 = vmul.f32 %v4982_v1, %v4982_v1 }
 0x2aa   : > { %5477 = vst [vmem:[#allocation14_spill] sm:$0xff] %v4987_v55  ;;  %2204 = vadd.xlane.f32.xlu0 %v2203_v53  ;;  %v2118_v63 = vmul.f32 %v4987_v55, %v4987_v55  ;;  %v5482_v53 = vld [vmem:[#allocation17_spill] sm:$0xff] }
 0x2ab   : > { %v4994_v30 = vsub.f32 %v5478_v2, %v1928_v25  ;;  %v1987_v36 = vsub.f32 %v5480_v54, %v1928_v25  ;;  %v5483_v2 = vld [vmem:[#allocation18_spill] sm:$0xff] }
 0x2ac   : > { %v1889_v27 = vpop.xlane.xlu1 %1888  ;;  %v2206_v34 = vadd.f32 %v2118_v63, %v2117_v16 }
 0x2ad   : > { %5479 = vst [vmem:[#allocation15_spill] sm:$0xff] %v4994_v30  ;;  %v1929_v37 = vmul.f32 0.005050505, %v1889_v27  ;;  %v4999_v51 = vsel %vm2002_vm1, %v1987_v36, 0.0  ;;  %v2119_v39 = vmul.f32 %v4994_v30, %v4994_v30 }
 0x2ae   : > { %5481 = vst [vmem:[#allocation16_spill] sm:$0xff] %v4999_v51  ;;  %2207 = vadd.xlane.f32.xlu1 %v2206_v34  ;;  %v2120_v19 = vmul.f32 %v4999_v51, %v4999_v51  ;;  %v5484_v34 = vld [vmem:[#allocation19_spill] sm:$0xff] }
 0x2af   : > { %v5006_v55 = vsub.f32 %v5482_v53, %v1929_v37  ;;  %v1989_v1 = vsub.f32 %v5483_v2, %v1929_v37  ;;  %v5485_v53 = vld [vmem:[#allocation20_spill] sm:$0xff] }
 0x2b0   : > { %v1892_v25 = vpop.xlane.xlu0 %1891  ;;  %v2209_v54 = vadd.f32 %v2120_v19, %v2119_v39 }
 0x2b1   : > { %v1930_v16 = vmul.f32 0.005050505, %v1892_v25  ;;  %v5011_v63 = vsel %vm2002_vm1, %v1989_v1, 0.0  ;;  %v2121_v36 = vmul.f32 %v5006_v55, %v5006_v55 }
 0x2b2   : > { %2210 = vadd.xlane.f32.xlu0 %v2209_v54  ;;  %v2122_v27 = vmul.f32 %v5011_v63, %v5011_v63 }
 0x2b3   : > { %v5018_v51 = vsub.f32 %v5484_v34, %v1930_v16  ;;  %v1991_v30 = vsub.f32 %v5485_v53, %v1930_v16 }
 0x2b4   : > { %v1895_v37 = vpop.xlane.xlu1 %1894  ;;  %v2212_v2 = vadd.f32 %v2122_v27, %v2121_v36 }
 0x2b5   : > { %v1931_v39 = vmul.f32 0.005050505, %v1895_v37  ;;  %v5023_v19 = vsel %vm2002_vm1, %v1991_v30, 0.0  ;;  %v2123_v1 = vmul.f32 %v5018_v51, %v5018_v51 }
 0x2b6   : > { %2213 = vadd.xlane.f32.xlu1 %v2212_v2  ;;  %v2124_v25 = vmul.f32 %v5023_v19, %v5023_v19 }
 0x2b7   : > { %v5030_v54 = vsub.f32 %v4655_v12, %v1931_v39  ;;  %v1993_v34 = vsub.f32 %v4657_v38, %v1931_v39 }
 0x2b8   : > { %v1898_v16 = vpop.xlane.xlu0 %1897  ;;  %v2215_v53 = vadd.f32 %v2124_v25, %v2123_v1 }
 0x2b9   : > { %v1932_v36 = vmul.f32 0.005050505, %v1898_v16  ;;  %v5035_v27 = vsel %vm2002_vm1, %v1993_v34, 0.0  ;;  %v2125_v30 = vmul.f32 %v5030_v54, %v5030_v54 }
 0x2ba   : > { %5486 = vst [vmem:[#allocation17_spill] sm:$0xff] %v5035_v27  ;;  %2216 = vadd.xlane.f32.xlu0 %v2215_v53  ;;  %v2126_v37 = vmul.f32 %v5035_v27, %v5035_v27 }
 0x2bb   : > { %v5042_v2 = vsub.f32 %v4663_v42, %v1932_v36  ;;  %v1995_v12 = vsub.f32 %v4665_v40, %v1932_v36 }
 0x2bc   : > { %v1901_v38 = vpop.xlane.xlu1 %1900  ;;  %v2218_v39 = vadd.f32 %v2126_v37, %v2125_v30 }
 0x2bd   : > { %5487 = vst [vmem:[#allocation18_spill] sm:$0xff] %v5042_v2  ;;  %v1933_v1 = vmul.f32 0.005050505, %v1901_v38  ;;  %v5047_v25 = vsel %vm2002_vm1, %v1995_v12, 0.0  ;;  %v2127_v34 = vmul.f32 %v5042_v2, %v5042_v2 }
 0x2be   : > { %5488 = vst [vmem:[#allocation19_spill] sm:$0xff] %v5047_v25  ;;  %2219 = vadd.xlane.f32.xlu1 %v2218_v39  ;;  %v2128_v16 = vmul.f32 %v5047_v25, %v5047_v25 }
 0x2bf   : > { %v5054_v53 = vsub.f32 %v4671_v31, %v1933_v1  ;;  %v1997_v42 = vsub.f32 %v4673_v22, %v1933_v1 }
 0x2c0   : > { %v2221_v40 = vadd.f32 %v2128_v16, %v2127_v34  ;;  %v2387_v16 = vld [vmem:[%s5399_s3] sm:$0x3] }
 0x2c1   : > { %5489 = vst [vmem:[#allocation20_spill] sm:$0xff] %v5054_v53  ;;  %v5059_v36 = vsel %vm2002_vm1, %v1997_v42, 0.0  ;;  %v2129_v30 = vmul.f32 %v5054_v53, %v5054_v53 }
 0x2c2   : > { %5490 = vst [vmem:[#allocation24_spill] sm:$0xff] %v5059_v36  ;;  %2222 = vadd.xlane.f32.xlu0 %v2221_v40  ;;  %v2130_v37 = vmul.f32 %v5059_v36, %v5059_v36 }
 0x2c4   : > { %v2224_v12 = vadd.f32 %v2130_v37, %v2129_v30  ;;  %v2463_v30 = vld [vmem:[%s5400_s4] sm:$0x3] }
 0x2c6   : > { %2225 = vadd.xlane.f32.xlu1 %v2224_v12  ;;  %v5491_v12 = vld [vmem:[#allocation5_spill] sm:$0xff] }
 0x2d7   : > { %v2133_v38 = vpop.xlane.xlu0 %2132 }
 0x2d8   : > { %v2227_v31 = vmul.f32 0.005050505, %v2133_v38  ;;  %v5492_v38 = vld [vmem:[#allocation6_spill] sm:$0xff] }
 0x2da   : > { %v2259_v39 = vadd.f32 1e-06, %v2227_v31  ;;  %v5076_v31 = vrot.slane %v2387_v16, %v5492_v38 }
 0x2db   : > { %v2136_v25 = vpop.xlane.xlu1 %2135 }
 0x2dc   : > { %3242 = vrsqrt.f32 %v2259_v39  ;;  %v2228_v22 = vmul.f32 0.005050505, %v2136_v25  ;;  %v5073_v25 = vrot.slane %v2387_v16, %v5491_v12 }
 0x2de   : > { %v2260_v1 = vadd.f32 1e-06, %v2228_v22 }
 0x2df   : > { %v2139_v52 = vpop.xlane.xlu0 %2138 }
 0x2e0   : > { %3244 = vrsqrt.f32 %v2260_v1  ;;  %v2229_v34 = vmul.f32 0.005050505, %v2139_v52  ;;  %v5079_v1 = vrot.slane %v2463_v30, %v5491_v12  ;;  %v5082_v52 = vrot.slane %v2463_v30, %v5492_v38 }
 0x2e2   : > { %v2261_v42 = vadd.f32 1e-06, %v2229_v34 }
 0x2e3   : > { %v2142_v40 = vpop.xlane.xlu1 %2141 }
 0x2e4   : > { %3246 = vrsqrt.f32 %v2261_v42  ;;  %v2230_v37 = vmul.f32 0.005050505, %v2142_v40 }
 0x2e6   : > { %v3243_v39 = vpop.eup %3242  ;;  %v2262_v22 = vadd.f32 1e-06, %v2230_v37 }
 0x2e7   : > { %v2323_v34 = vmul.f32 %v3243_v39, %v4682_v6  ;;  %v2324_v42 = vmul.f32 %v3243_v39, %v4687_v13  ;;  %v2145_v40 = vpop.xlane.xlu0 %2144 }
 0x2e8   : > { %3248 = vrsqrt.f32 %v2262_v22  ;;  %v2231_v36 = vmul.f32 0.005050505, %v2145_v40 }
 0x2e9   : > { %v2399_v16 = vmul.f32 %v5073_v25, %v2323_v34  ;;  %v2400_v53 = vmul.f32 %v5076_v31, %v2324_v42 }
 0x2ea   : > { %v3245_v37 = vpop.eup %3244  ;;  %v2263_v2 = vadd.f32 1e-06, %v2231_v36 }
 0x2eb   : > { %v2475_v12 = vadd.f32 %v5079_v1, %v2399_v16  ;;  %v2476_v30 = vadd.f32 %v5082_v52, %v2400_v53  ;;  %v2325_v38 = vmul.f32 %v3245_v37, %v4694_v48  ;;  %v2326_v27 = vmul.f32 %v3245_v37, %v4699_v8  ;;  %v2148_v6 = vpop.xlane.xlu1 %2147 }
 0x2ec   : > { %3250 = vrsqrt.f32 %v2263_v2  ;;  %v2232_v13 = vmul.f32 0.005050505, %v2148_v6 }
 0x2ed   : > { %2539 = vst [vmem:[%s5094_s15] sm:$0xff] %v2475_v12  ;;  %2540 = vst [vmem:[%s5094_s15 + $0x8] sm:$0xff] %v2476_v30  ;;  %v2401_v36 = vmul.f32 %v5073_v25, %v2325_v38  ;;  %v2402_v39 = vmul.f32 %v5076_v31, %v2326_v27 }
 0x2ee   : > { %v3247_v53 = vpop.eup %3246  ;;  %v2264_v22 = vadd.f32 1e-06, %v2232_v13 }
 0x2ef   : > { %v2477_v48 = vadd.f32 %v5079_v1, %v2401_v36  ;;  %v2478_v8 = vadd.f32 %v5082_v52, %v2402_v39  ;;  %v2327_v2 = vmul.f32 %v3247_v53, %v4706_v62  ;;  %v2328_v34 = vmul.f32 %v3247_v53, %v4711_v35  ;;  %v2151_v42 = vpop.xlane.xlu0 %2150 }
 0x2f0   : > { %3252 = vrsqrt.f32 %v2264_v22  ;;  %v2233_v40 = vmul.f32 0.005050505, %v2151_v42 }
 0x2f1   : > { %2541 = vst [vmem:[%s5094_s15 + $0x10] sm:$0xff] %v2477_v48  ;;  %2542 = vst [vmem:[%s5094_s15 + $0x18] sm:$0xff] %v2478_v8  ;;  %v2403_v16 = vmul.f32 %v5073_v25, %v2327_v2  ;;  %v2404_v27 = vmul.f32 %v5076_v31, %v2328_v34 }
 0x2f2   : > { %v3249_v37 = vpop.eup %3248  ;;  %v2265_v12 = vadd.f32 1e-06, %v2233_v40 }
 0x2f3   : > { %v2479_v30 = vadd.f32 %v5079_v1, %v2403_v16  ;;  %v2480_v38 = vadd.f32 %v5082_v52, %v2404_v27  ;;  %v2329_v62 = vmul.f32 %v3249_v37, %v4718_v49  ;;  %v2330_v35 = vmul.f32 %v3249_v37, %v4723_v43  ;;  %v2154_v6 = vpop.xlane.xlu1 %2153 }
 0x2f4   : > { %3254 = vrsqrt.f32 %v2265_v12  ;;  %v2234_v13 = vmul.f32 0.005050505, %v2154_v6 }
 0x2f5   : > { %2543 = vst [vmem:[%s5094_s15 + $0x20] sm:$0xff] %v2479_v30  ;;  %2544 = vst [vmem:[%s5094_s15 + $0x28] sm:$0xff] %v2480_v38  ;;  %v2405_v36 = vmul.f32 %v5073_v25, %v2329_v62  ;;  %v2406_v39 = vmul.f32 %v5076_v31, %v2330_v35 }
 0x2f6   : > { %v3251_v53 = vpop.eup %3250  ;;  %v2266_v22 = vadd.f32 1e-06, %v2234_v13 }
 0x2f7   : > { %v2481_v48 = vadd.f32 %v5079_v1, %v2405_v36  ;;  %v2482_v8 = vadd.f32 %v5082_v52, %v2406_v39  ;;  %v2331_v49 = vmul.f32 %v3251_v53, %v4730_v60  ;;  %v2332_v43 = vmul.f32 %v3251_v53, %v4735_v21  ;;  %v2157_v2 = vpop.xlane.xlu0 %2156 }
 0x2f8   : > { %3256 = vrsqrt.f32 %v2266_v22  ;;  %v2235_v34 = vmul.f32 0.005050505, %v2157_v2 }
 0x2f9   : > { %2545 = vst [vmem:[%s5094_s15 + $0x30] sm:$0xff] %v2481_v48  ;;  %2546 = vst [vmem:[%s5094_s15 + $0x38] sm:$0xff] %v2482_v8  ;;  %v2407_v42 = vmul.f32 %v5073_v25, %v2331_v49  ;;  %v2408_v40 = vmul.f32 %v5076_v31, %v2332_v43 }
 0x2fa   : > { %v3253_v16 = vpop.eup %3252  ;;  %v2267_v27 = vadd.f32 1e-06, %v2235_v34 }
 0x2fb   : > { %v2483_v37 = vadd.f32 %v5079_v1, %v2407_v42  ;;  %v2484_v12 = vadd.f32 %v5082_v52, %v2408_v40  ;;  %v2333_v60 = vmul.f32 %v3253_v16, %v4742_v5  ;;  %v2334_v21 = vmul.f32 %v3253_v16, %v4747_v9  ;;  %v2160_v30 = vpop.xlane.xlu1 %2159 }
 0x2fc   : > { %3258 = vrsqrt.f32 %v2267_v27  ;;  %v2236_v38 = vmul.f32 0.005050505, %v2160_v30 }
 0x2fd   : > { %2547 = vst [vmem:[%s5094_s15 + $0x40] sm:$0xff] %v2483_v37  ;;  %2548 = vst [vmem:[%s5094_s15 + $0x48] sm:$0xff] %v2484_v12  ;;  %v2409_v62 = vmul.f32 %v5073_v25, %v2333_v60  ;;  %v2410_v35 = vmul.f32 %v5076_v31, %v2334_v21 }
 0x2fe   : > { %v3255_v6 = vpop.eup %3254  ;;  %v2268_v13 = vadd.f32 1e-06, %v2236_v38 }
 0x2ff   : > { %v2485_v36 = vadd.f32 %v5079_v1, %v2409_v62  ;;  %v2486_v39 = vadd.f32 %v5082_v52, %v2410_v35  ;;  %v2335_v5 = vmul.f32 %v3255_v6, %v4754_v15  ;;  %v2336_v9 = vmul.f32 %v3255_v6, %v4759_v50  ;;  %v2163_v53 = vpop.xlane.xlu0 %2162 }
 0x300   : > { %3260 = vrsqrt.f32 %v2268_v13  ;;  %v2237_v22 = vmul.f32 0.005050505, %v2163_v53 }
 0x301   : > { %2549 = vst [vmem:[%s5094_s15 + $0x50] sm:$0xff] %v2485_v36  ;;  %2550 = vst [vmem:[%s5094_s15 + $0x58] sm:$0xff] %v2486_v39  ;;  %v2411_v48 = vmul.f32 %v5073_v25, %v2335_v5  ;;  %v2412_v8 = vmul.f32 %v5076_v31, %v2336_v9 }
 0x302   : > { %v3257_v49 = vpop.eup %3256  ;;  %v2269_v43 = vadd.f32 1e-06, %v2237_v22 }
 0x303   : > { %v2487_v2 = vadd.f32 %v5079_v1, %v2411_v48  ;;  %v2488_v34 = vadd.f32 %v5082_v52, %v2412_v8  ;;  %v2337_v15 = vmul.f32 %v3257_v49, %v4766_v24  ;;  %v2338_v50 = vmul.f32 %v3257_v49, %v4771_v59  ;;  %v2166_v42 = vpop.xlane.xlu1 %2165 }
 0x304   : > { %3262 = vrsqrt.f32 %v2269_v43  ;;  %v2238_v40 = vmul.f32 0.005050505, %v2166_v42 }
 0x305   : > { %2551 = vst [vmem:[%s5094_s15 + $0x60] sm:$0xff] %v2487_v2  ;;  %2552 = vst [vmem:[%s5094_s15 + $0x68] sm:$0xff] %v2488_v34  ;;  %v2413_v16 = vmul.f32 %v5073_v25, %v2337_v15  ;;  %v2414_v27 = vmul.f32 %v5076_v31, %v2338_v50 }
 0x306   : > { %v3259_v37 = vpop.eup %3258  ;;  %v2270_v12 = vadd.f32 1e-06, %v2238_v40 }
 0x307   : > { %v2489_v60 = vadd.f32 %v5079_v1, %v2413_v16  ;;  %v2490_v21 = vadd.f32 %v5082_v52, %v2414_v27  ;;  %v2339_v24 = vmul.f32 %v3259_v37, %v4778_v33  ;;  %v2340_v59 = vmul.f32 %v3259_v37, %v4783_v4  ;;  %v2169_v30 = vpop.xlane.xlu0 %2168 }
 0x308   : > { %3264 = vrsqrt.f32 %v2270_v12  ;;  %v2239_v38 = vmul.f32 0.005050505, %v2169_v30 }
 0x309   : > { %2553 = vst [vmem:[%s5094_s15 + $0x70] sm:$0xff] %v2489_v60  ;;  %2554 = vst [vmem:[%s5094_s15 + $0x78] sm:$0xff] %v2490_v21  ;;  %v2415_v62 = vmul.f32 %v5073_v25, %v2339_v24  ;;  %v2416_v35 = vmul.f32 %v5076_v31, %v2340_v59 }
 0x30a   : > { %v3261_v6 = vpop.eup %3260  ;;  %v2271_v13 = vadd.f32 1e-06, %v2239_v38 }
 0x30b   : > { %v2491_v36 = vadd.f32 %v5079_v1, %v2415_v62  ;;  %v2492_v39 = vadd.f32 %v5082_v52, %v2416_v35  ;;  %v2341_v33 = vmul.f32 %v3261_v6, %v4790_v46  ;;  %v2342_v4 = vmul.f32 %v3261_v6, %v4795_v14  ;;  %v2172_v5 = vpop.xlane.xlu1 %2171 }
 0x30c   : > { %3266 = vrsqrt.f32 %v2271_v13  ;;  %v2240_v9 = vmul.f32 0.005050505, %v2172_v5 }
 0x30d   : > { %2555 = vst [vmem:[%s5094_s15 + $0x80] sm:$0xff] %v2491_v36  ;;  %2556 = vst [vmem:[%s5094_s15 + $0x88] sm:$0xff] %v2492_v39  ;;  %v2417_v53 = vmul.f32 %v5073_v25, %v2341_v33  ;;  %v2418_v22 = vmul.f32 %v5076_v31, %v2342_v4 }
 0x30e   : > { %v3263_v48 = vpop.eup %3262  ;;  %v2272_v8 = vadd.f32 1e-06, %v2240_v9 }
 0x30f   : > { %v2493_v49 = vadd.f32 %v5079_v1, %v2417_v53  ;;  %v2494_v43 = vadd.f32 %v5082_v52, %v2418_v22  ;;  %v2343_v46 = vmul.f32 %v3263_v48, %v4802_v57  ;;  %v2344_v14 = vmul.f32 %v3263_v48, %v4807_v23  ;;  %v2175_v2 = vpop.xlane.xlu0 %2174 }
 0x310   : > { %3268 = vrsqrt.f32 %v2272_v8  ;;  %v2241_v34 = vmul.f32 0.005050505, %v2175_v2 }
 0x311   : > { %2557 = vst [vmem:[%s5094_s15 + $0x90] sm:$0xff] %v2493_v49  ;;  %2558 = vst [vmem:[%s5094_s15 + $0x98] sm:$0xff] %v2494_v43  ;;  %v2419_v15 = vmul.f32 %v5073_v25, %v2343_v46  ;;  %v2420_v50 = vmul.f32 %v5076_v31, %v2344_v14 }
 0x312   : > { %v3265_v42 = vpop.eup %3264  ;;  %v2273_v40 = vadd.f32 1e-06, %v2241_v34 }
 0x313   : > { %v2495_v16 = vadd.f32 %v5079_v1, %v2419_v15  ;;  %v2496_v27 = vadd.f32 %v5082_v52, %v2420_v50  ;;  %v2345_v57 = vmul.f32 %v3265_v42, %v4814_v7  ;;  %v2346_v23 = vmul.f32 %v3265_v42, %v4819_v32  ;;  %v2178_v37 = vpop.xlane.xlu1 %2177 }
 0x314   : > { %3270 = vrsqrt.f32 %v2273_v40  ;;  %v2242_v12 = vmul.f32 0.005050505, %v2178_v37 }
 0x315   : > { %2559 = vst [vmem:[%s5094_s15 + $0xa0] sm:$0xff] %v2495_v16  ;;  %2560 = vst [vmem:[%s5094_s15 + $0xa8] sm:$0xff] %v2496_v27  ;;  %v2421_v60 = vmul.f32 %v5073_v25, %v2345_v57  ;;  %v2422_v21 = vmul.f32 %v5076_v31, %v2346_v23 }
 0x316   : > { %v3267_v24 = vpop.eup %3266  ;;  %v2274_v59 = vadd.f32 1e-06, %v2242_v12 }
 0x317   : > { %v2497_v30 = vadd.f32 %v5079_v1, %v2421_v60  ;;  %v2498_v38 = vadd.f32 %v5082_v52, %v2422_v21  ;;  %v2347_v7 = vmul.f32 %v3267_v24, %v4826_v18  ;;  %v2348_v32 = vmul.f32 %v3267_v24, %v4831_v45  ;;  %v2181_v62 = vpop.xlane.xlu0 %2180 }
 0x318   : > { %3272 = vrsqrt.f32 %v2274_v59  ;;  %v2243_v35 = vmul.f32 0.005050505, %v2181_v62 }
 0x319   : > { %2561 = vst [vmem:[%s5094_s15 + $0xb0] sm:$0xff] %v2497_v30  ;;  %2562 = vst [vmem:[%s5094_s15 + $0xb8] sm:$0xff] %v2498_v38  ;;  %v2423_v6 = vmul.f32 %v5073_v25, %v2347_v7  ;;  %v2424_v13 = vmul.f32 %v5076_v31, %v2348_v32 }
 0x31a   : > { %v3269_v36 = vpop.eup %3268  ;;  %v2275_v39 = vadd.f32 1e-06, %v2243_v35 }
 0x31b   : > { %v2499_v33 = vadd.f32 %v5079_v1, %v2423_v6  ;;  %v2500_v4 = vadd.f32 %v5082_v52, %v2424_v13  ;;  %v2349_v18 = vmul.f32 %v3269_v36, %v4838_v29  ;;  %v2350_v45 = vmul.f32 %v3269_v36, %v4843_v56  ;;  %v2184_v5 = vpop.xlane.xlu1 %2183 }
 0x31c   : > { %3274 = vrsqrt.f32 %v2275_v39  ;;  %v2244_v9 = vmul.f32 0.005050505, %v2184_v5 }
 0x31d   : > { %2563 = vst [vmem:[%s5094_s15 + $0xc0] sm:$0xff] %v2499_v33  ;;  %2564 = vst [vmem:[%s5094_s15 + $0xc8] sm:$0xff] %v2500_v4  ;;  %v2425_v53 = vmul.f32 %v5073_v25, %v2349_v18  ;;  %v2426_v22 = vmul.f32 %v5076_v31, %v2350_v45 }
 0x31e   : > { %v3271_v48 = vpop.eup %3270  ;;  %v2276_v8 = vadd.f32 1e-06, %v2244_v9 }
 0x31f   : > { %v2501_v49 = vadd.f32 %v5079_v1, %v2425_v53  ;;  %v2502_v43 = vadd.f32 %v5082_v52, %v2426_v22  ;;  %v2351_v29 = vmul.f32 %v3271_v48, %v4850_v44  ;;  %v2352_v56 = vmul.f32 %v3271_v48, %v4855_v3  ;;  %v2187_v46 = vpop.xlane.xlu0 %2186 }
 0x320   : > { %3276 = vrsqrt.f32 %v2276_v8  ;;  %v2245_v14 = vmul.f32 0.005050505, %v2187_v46 }
 0x321   : > { %2565 = vst [vmem:[%s5094_s15 + $0xd0] sm:$0xff] %v2501_v49  ;;  %2566 = vst [vmem:[%s5094_s15 + $0xd8] sm:$0xff] %v2502_v43  ;;  %v2427_v2 = vmul.f32 %v5073_v25, %v2351_v29  ;;  %v2428_v34 = vmul.f32 %v5076_v31, %v2352_v56 }
 0x322   : > { %v3273_v15 = vpop.eup %3272  ;;  %v2277_v50 = vadd.f32 1e-06, %v2245_v14 }
 0x323   : > { %v2503_v42 = vadd.f32 %v5079_v1, %v2427_v2  ;;  %v2504_v40 = vadd.f32 %v5082_v52, %v2428_v34  ;;  %v2353_v44 = vmul.f32 %v3273_v15, %v4862_v61  ;;  %v2354_v3 = vmul.f32 %v3273_v15, %v4867_v17  ;;  %v2190_v16 = vpop.xlane.xlu1 %2189 }
 0x324   : > { %3278 = vrsqrt.f32 %v2277_v50  ;;  %v2246_v27 = vmul.f32 0.005050505, %v2190_v16 }
 0x325   : > { %2567 = vst [vmem:[%s5094_s15 + $0xe0] sm:$0xff] %v2503_v42  ;;  %2568 = vst [vmem:[%s5094_s15 + $0xe8] sm:$0xff] %v2504_v40  ;;  %v2429_v57 = vmul.f32 %v5073_v25, %v2353_v44  ;;  %v2430_v23 = vmul.f32 %v5076_v31, %v2354_v3 }
 0x326   : > { %v3275_v37 = vpop.eup %3274  ;;  %v2278_v12 = vadd.f32 1e-06, %v2246_v27 }
 0x327   : > { %v2505_v60 = vadd.f32 %v5079_v1, %v2429_v57  ;;  %v2506_v21 = vadd.f32 %v5082_v52, %v2430_v23  ;;  %v2355_v61 = vmul.f32 %v3275_v37, %v4874_v11  ;;  %v2356_v17 = vmul.f32 %v3275_v37, %v4879_v28  ;;  %v2193_v24 = vpop.xlane.xlu0 %2192 }
 0x328   : > { %3280 = vrsqrt.f32 %v2278_v12  ;;  %v2247_v59 = vmul.f32 0.005050505, %v2193_v24 }
 0x329   : > { %2569 = vst [vmem:[%s5094_s15 + $0xf0] sm:$0xff] %v2505_v60  ;;  %2570 = vst [vmem:[%s5094_s15 + $0xf8] sm:$0xff] %v2506_v21  ;;  %v2431_v30 = vmul.f32 %v5073_v25, %v2355_v61  ;;  %v2432_v38 = vmul.f32 %v5076_v31, %v2356_v17  ;;  %v5495_v60 = vld [vmem:[#allocation23_spill] sm:$0xff] }
 0x32a   : > { %v3277_v7 = vpop.eup %3276  ;;  %v2279_v32 = vadd.f32 1e-06, %v2247_v59 }
 0x32b   : > { %v2507_v62 = vadd.f32 %v5079_v1, %v2431_v30  ;;  %v2508_v35 = vadd.f32 %v5082_v52, %v2432_v38  ;;  %v2357_v11 = vmul.f32 %v3277_v7, %v4886_v26  ;;  %v2358_v28 = vmul.f32 %v3277_v7, %v4891_v41  ;;  %v2196_v6 = vpop.xlane.xlu1 %2195 }
 0x32c   : > { %3282 = vrsqrt.f32 %v2279_v32  ;;  %v2248_v13 = vmul.f32 0.005050505, %v2196_v6 }
 0x32d   : > { %2571 = vst [vmem:[%s5094_s15 + $0x100] sm:$0xff] %v2507_v62  ;;  %2572 = vst [vmem:[%s5094_s15 + $0x108] sm:$0xff] %v2508_v35  ;;  %v2433_v36 = vmul.f32 %v5073_v25, %v2357_v11  ;;  %v2434_v39 = vmul.f32 %v5076_v31, %v2358_v28  ;;  %v5496_v62 = vld [vmem:[#allocation7_spill] sm:$0xff]  ;;  %v5497_v11 = vld [vmem:[#allocation8_spill] sm:$0xff] }
 0x32e   : > { %v3279_v33 = vpop.eup %3278  ;;  %v2280_v4 = vadd.f32 1e-06, %v2248_v13 }
 0x32f   : > { %v2509_v18 = vadd.f32 %v5079_v1, %v2433_v36  ;;  %v2510_v45 = vadd.f32 %v5082_v52, %v2434_v39  ;;  %v2359_v26 = vmul.f32 %v3279_v33, %v4898_v47  ;;  %v2360_v41 = vmul.f32 %v3279_v33, %v4903_v58  ;;  %v2199_v5 = vpop.xlane.xlu0 %2198 }
 0x330   : > { %3284 = vrsqrt.f32 %v2280_v4  ;;  %v2249_v9 = vmul.f32 0.005050505, %v2199_v5  ;;  %v5499_v5 = vld [vmem:[#allocation10_spill] sm:$0xff] }
 0x331   : > { %2573 = vst [vmem:[%s5094_s15 + $0x110] sm:$0xff] %v2509_v18  ;;  %2574 = vst [vmem:[%s5094_s15 + $0x118] sm:$0xff] %v2510_v45  ;;  %v2435_v53 = vmul.f32 %v5073_v25, %v2359_v26  ;;  %v2436_v22 = vmul.f32 %v5076_v31, %v2360_v41  ;;  %v5498_v26 = vld [vmem:[#allocation9_spill] sm:$0xff] }
 0x332   : > { %v3281_v48 = vpop.eup %3280  ;;  %v2281_v8 = vadd.f32 1e-06, %v2249_v9 }
 0x333   : > { %v2511_v49 = vadd.f32 %v5079_v1, %v2435_v53  ;;  %v2512_v43 = vadd.f32 %v5082_v52, %v2436_v22  ;;  %v2361_v47 = vmul.f32 %v3281_v48, %v4910_v0  ;;  %v2362_v58 = vmul.f32 %v3281_v48, %v4915_v10  ;;  %v2202_v29 = vpop.xlane.xlu1 %2201  ;;  %v5493_v10 = vld [vmem:[#allocation21_spill] sm:$0xff] }
 0x334   : > { %3286 = vrsqrt.f32 %v2281_v8  ;;  %v2250_v56 = vmul.f32 0.005050505, %v2202_v29  ;;  %v5500_v29 = vld [vmem:[#allocation11_spill] sm:$0xff] }
 0x335   : > { %2575 = vst [vmem:[%s5094_s15 + $0x120] sm:$0xff] %v2511_v49  ;;  %2576 = vst [vmem:[%s5094_s15 + $0x128] sm:$0xff] %v2512_v43  ;;  %v2437_v46 = vmul.f32 %v5073_v25, %v2361_v47  ;;  %v2438_v14 = vmul.f32 %v5076_v31, %v2362_v58 }
 0x336   : > { %v3283_v2 = vpop.eup %3282  ;;  %v2282_v34 = vadd.f32 1e-06, %v2250_v56 }
 0x337   : > { %v2513_v15 = vadd.f32 %v5079_v1, %v2437_v46  ;;  %v2514_v50 = vadd.f32 %v5082_v52, %v2438_v14  ;;  %v2363_v0 = vmul.f32 %v3283_v2, %v4922_v20  ;;  %v2364_v42 = vmul.f32 %v3283_v2, %v5493_v10  ;;  %v2205_v40 = vpop.xlane.xlu0 %2204  ;;  %v5494_v20 = vld [vmem:[#allocation22_spill] sm:$0xff]  ;;  %v5501_v46 = vld [vmem:[#allocation12_spill] sm:$0xff] }
 0x338   : > { %3288 = vrsqrt.f32 %v2282_v34  ;;  %v2251_v44 = vmul.f32 0.005050505, %v2205_v40 }
 0x339   : > { %2577 = vst [vmem:[%s5094_s15 + $0x130] sm:$0xff] %v2513_v15  ;;  %2578 = vst [vmem:[%s5094_s15 + $0x138] sm:$0xff] %v2514_v50  ;;  %v2439_v3 = vmul.f32 %v5073_v25, %v2363_v0  ;;  %v2440_v16 = vmul.f32 %v5076_v31, %v2364_v42 }
 0x33a   : > { %v3285_v27 = vpop.eup %3284  ;;  %v2283_v57 = vadd.f32 1e-06, %v2251_v44  ;;  %v5502_v44 = vld [vmem:[#allocation13_spill] sm:$0xff] }
 0x33b   : > { %v2515_v23 = vadd.f32 %v5079_v1, %v2439_v3  ;;  %v2516_v37 = vadd.f32 %v5082_v52, %v2440_v16  ;;  %v2365_v12 = vmul.f32 %v3285_v27, %v5494_v20  ;;  %v2366_v21 = vmul.f32 %v3285_v27, %v5495_v60  ;;  %v2208_v61 = vpop.xlane.xlu1 %2207  ;;  %v5503_v16 = vld [vmem:[#allocation14_spill] sm:$0xff] }
 0x33c   : > { %3290 = vrsqrt.f32 %v2283_v57  ;;  %v2252_v17 = vmul.f32 0.005050505, %v2208_v61 }
 0x33d   : > { %2579 = vst [vmem:[%s5094_s15 + $0x140] sm:$0xff] %v2515_v23  ;;  %2580 = vst [vmem:[%s5094_s15 + $0x148] sm:$0xff] %v2516_v37  ;;  %v2441_v24 = vmul.f32 %v5073_v25, %v2365_v12  ;;  %v2442_v59 = vmul.f32 %v5076_v31, %v2366_v21 }
 0x33e   : > { %v3287_v30 = vpop.eup %3286  ;;  %v2284_v38 = vadd.f32 1e-06, %v2252_v17  ;;  %v5504_v17 = vld [vmem:[#allocation15_spill] sm:$0xff] }
 0x33f   : > { %v2517_v7 = vadd.f32 %v5079_v1, %v2441_v24  ;;  %v2518_v32 = vadd.f32 %v5082_v52, %v2442_v59  ;;  %v2367_v35 = vmul.f32 %v3287_v30, %v5496_v62  ;;  %v2368_v28 = vmul.f32 %v3287_v30, %v5497_v11  ;;  %v2211_v6 = vpop.xlane.xlu0 %2210  ;;  %v5505_v59 = vld [vmem:[#allocation16_spill] sm:$0xff] }
 0x340   : > { %3292 = vrsqrt.f32 %v2284_v38  ;;  %v2253_v13 = vmul.f32 0.005050505, %v2211_v6 }
 0x341   : > { %2581 = vst [vmem:[%s5094_s15 + $0x150] sm:$0xff] %v2517_v7  ;;  %2582 = vst [vmem:[%s5094_s15 + $0x158] sm:$0xff] %v2518_v32  ;;  %v2443_v36 = vmul.f32 %v5073_v25, %v2367_v35  ;;  %v2444_v39 = vmul.f32 %v5076_v31, %v2368_v28 }
 0x342   : > { %v3289_v33 = vpop.eup %3288  ;;  %v2285_v4 = vadd.f32 1e-06, %v2253_v13 }
 0x343   : > { %v2519_v18 = vadd.f32 %v5079_v1, %v2443_v36  ;;  %v2520_v45 = vadd.f32 %v5082_v52, %v2444_v39  ;;  %v2369_v41 = vmul.f32 %v3289_v33, %v5498_v26  ;;  %v2370_v9 = vmul.f32 %v3289_v33, %v5499_v5  ;;  %v2214_v53 = vpop.xlane.xlu1 %2213 }
 0x344   : > { %3294 = vrsqrt.f32 %v2285_v4  ;;  %v2254_v22 = vmul.f32 0.005050505, %v2214_v53 }
 0x345   : > { %2583 = vst [vmem:[%s5094_s15 + $0x160] sm:$0xff] %v2519_v18  ;;  %2584 = vst [vmem:[%s5094_s15 + $0x168] sm:$0xff] %v2520_v45  ;;  %v2445_v48 = vmul.f32 %v5073_v25, %v2369_v41  ;;  %v2446_v8 = vmul.f32 %v5076_v31, %v2370_v9 }
 0x346   : > { %v3291_v49 = vpop.eup %3290  ;;  %v2286_v43 = vadd.f32 1e-06, %v2254_v22 }
 0x347   : > { %v2521_v47 = vadd.f32 %v5079_v1, %v2445_v48  ;;  %v2522_v58 = vadd.f32 %v5082_v52, %v2446_v8  ;;  %v2371_v56 = vmul.f32 %v3291_v49, %v5500_v29  ;;  %v2372_v14 = vmul.f32 %v3291_v49, %v5501_v46  ;;  %v2217_v2 = vpop.xlane.xlu0 %2216  ;;  %v5507_v46 = vld [vmem:[#allocation18_spill] sm:$0xff] }
 0x348   : > { %3296 = vrsqrt.f32 %v2286_v43  ;;  %v2255_v34 = vmul.f32 0.005050505, %v2217_v2  ;;  %v5506_v43 = vld [vmem:[#allocation17_spill] sm:$0xff] }
 0x349   : > { %2585 = vst [vmem:[%s5094_s15 + $0x170] sm:$0xff] %v2521_v47  ;;  %2586 = vst [vmem:[%s5094_s15 + $0x178] sm:$0xff] %v2522_v58  ;;  %v2447_v15 = vmul.f32 %v5073_v25, %v2371_v56  ;;  %v2448_v50 = vmul.f32 %v5076_v31, %v2372_v14 }
 0x34a   : > { %v3293_v0 = vpop.eup %3292  ;;  %v2287_v10 = vadd.f32 1e-06, %v2255_v34 }
 0x34b   : > { %v2523_v42 = vadd.f32 %v5079_v1, %v2447_v15  ;;  %v2524_v40 = vadd.f32 %v5082_v52, %v2448_v50  ;;  %v2373_v3 = vmul.f32 %v3293_v0, %v5502_v44  ;;  %v2374_v27 = vmul.f32 %v3293_v0, %v5503_v16  ;;  %v2220_v57 = vpop.xlane.xlu1 %2219  ;;  %v5510_v44 = vld [vmem:[#allocation24_spill] sm:$0xff] }
 0x34c   : > { %3298 = vrsqrt.f32 %v2287_v10  ;;  %v2256_v23 = vmul.f32 0.005050505, %v2220_v57 }
 0x34d   : > { %2587 = vst [vmem:[%s5094_s15 + $0x180] sm:$0xff] %v2523_v42  ;;  %2588 = vst [vmem:[%s5094_s15 + $0x188] sm:$0xff] %v2524_v40  ;;  %v2449_v37 = vmul.f32 %v5073_v25, %v2373_v3  ;;  %v2450_v20 = vmul.f32 %v5076_v31, %v2374_v27  ;;  %v5509_v42 = vld [vmem:[#allocation20_spill] sm:$0xff] }
 0x34e   : > { %v3295_v12 = vpop.eup %3294  ;;  %v2288_v60 = vadd.f32 1e-06, %v2256_v23 }
 0x34f   : > { %v2525_v21 = vadd.f32 %v5079_v1, %v2449_v37  ;;  %v2526_v61 = vadd.f32 %v5082_v52, %v2450_v20  ;;  %v2375_v24 = vmul.f32 %v3295_v12, %v5504_v17  ;;  %v2376_v30 = vmul.f32 %v3295_v12, %v5505_v59  ;;  %v2223_v38 = vpop.xlane.xlu0 %2222 }
 0x350   : > { %3300 = vrsqrt.f32 %v2288_v60  ;;  %v2257_v7 = vmul.f32 0.005050505, %v2223_v38 }
 0x351   : > { %2589 = vst [vmem:[%s5094_s15 + $0x190] sm:$0xff] %v2525_v21  ;;  %2590 = vst [vmem:[%s5094_s15 + $0x198] sm:$0xff] %v2526_v61  ;;  %v2451_v32 = vmul.f32 %v5073_v25, %v2375_v24  ;;  %v2452_v62 = vmul.f32 %v5076_v31, %v2376_v30 }
 0x352   : > { %v3297_v35 = vpop.eup %3296  ;;  %v2289_v11 = vadd.f32 1e-06, %v2257_v7 }
 0x353   : > { %v2527_v28 = vadd.f32 %v5079_v1, %v2451_v32  ;;  %v2528_v6 = vadd.f32 %v5082_v52, %v2452_v62  ;;  %v2377_v13 = vmul.f32 %v3297_v35, %v5006_v55  ;;  %v2378_v36 = vmul.f32 %v3297_v35, %v5011_v63  ;;  %v2226_v39 = vpop.xlane.xlu1 %2225 }
 0x354   : > { %3302 = vrsqrt.f32 %v2289_v11  ;;  %v2258_v33 = vmul.f32 0.005050505, %v2226_v39 }
 0x355   : > { %2591 = vst [vmem:[%s5094_s15 + $0x1a0] sm:$0xff] %v2527_v28  ;;  %2592 = vst [vmem:[%s5094_s15 + $0x1a8] sm:$0xff] %v2528_v6  ;;  %v2453_v4 = vmul.f32 %v5073_v25, %v2377_v13  ;;  %v2454_v18 = vmul.f32 %v5076_v31, %v2378_v36 }
 0x356   : > { %v3299_v45 = vpop.eup %3298  ;;  %v2290_v26 = vadd.f32 1e-06, %v2258_v33 }
 0x357   : > { %v2529_v41 = vadd.f32 %v5079_v1, %v2453_v4  ;;  %v2530_v55 = vadd.f32 %v5082_v52, %v2454_v18  ;;  %v2379_v63 = vmul.f32 %v3299_v45, %v5018_v51  ;;  %v2380_v5 = vmul.f32 %v3299_v45, %v5023_v19 }
 0x358   : > { %3304 = vrsqrt.f32 %v2290_v26 }
 0x359   : > { %2593 = vst [vmem:[%s5094_s15 + $0x1b0] sm:$0xff] %v2529_v41  ;;  %2594 = vst [vmem:[%s5094_s15 + $0x1b8] sm:$0xff] %v2530_v55  ;;  %v2455_v9 = vmul.f32 %v5073_v25, %v2379_v63  ;;  %v2456_v53 = vmul.f32 %v5076_v31, %v2380_v5 }
 0x35a   : > { %v3301_v22 = vpop.eup %3300 }
 0x35b   : > { %v2531_v48 = vadd.f32 %v5079_v1, %v2455_v9  ;;  %v2532_v8 = vadd.f32 %v5082_v52, %v2456_v53  ;;  %v2381_v49 = vmul.f32 %v3301_v22, %v5030_v54  ;;  %v2382_v51 = vmul.f32 %v3301_v22, %v5506_v43  ;;  %v5508_v54 = vld [vmem:[#allocation19_spill] sm:$0xff] }
 0x35d   : > { %2595 = vst [vmem:[%s5094_s15 + $0x1c0] sm:$0xff] %v2531_v48  ;;  %2596 = vst [vmem:[%s5094_s15 + $0x1c8] sm:$0xff] %v2532_v8  ;;  %v2457_v19 = vmul.f32 %v5073_v25, %v2381_v49  ;;  %v2458_v47 = vmul.f32 %v5076_v31, %v2382_v51 }
 0x35e   : > { %v3303_v58 = vpop.eup %3302 }
 0x35f   : > { %v2533_v29 = vadd.f32 %v5079_v1, %v2457_v19  ;;  %v2534_v56 = vadd.f32 %v5082_v52, %v2458_v47  ;;  %v2383_v14 = vmul.f32 %v3303_v58, %v5507_v46  ;;  %v2384_v2 = vmul.f32 %v3303_v58, %v5508_v54 }
 0x361   : > { %2597 = vst [vmem:[%s5094_s15 + $0x1d0] sm:$0xff] %v2533_v29  ;;  %2598 = vst [vmem:[%s5094_s15 + $0x1d8] sm:$0xff] %v2534_v56  ;;  %v2459_v34 = vmul.f32 %v5073_v25, %v2383_v14  ;;  %v2460_v15 = vmul.f32 %v5076_v31, %v2384_v2 }
 0x362   : > { %v3305_v50 = vpop.eup %3304 }
 0x363   : > { %v2535_v0 = vadd.f32 %v5079_v1, %v2459_v34  ;;  %v2536_v10 = vadd.f32 %v5082_v52, %v2460_v15  ;;  %v2385_v40 = vmul.f32 %v3305_v50, %v5509_v42  ;;  %v2386_v3 = vmul.f32 %v3305_v50, %v5510_v44 }
 0x365   : > { %2599 = vst [vmem:[%s5094_s15 + $0x1e0] sm:$0xff] %v2535_v0  ;;  %2600 = vst [vmem:[%s5094_s15 + $0x1e8] sm:$0xff] %v2536_v10  ;;  %v2461_v16 = vmul.f32 %v5073_v25, %v2385_v40  ;;  %v2462_v27 = vmul.f32 %v5076_v31, %v2386_v3 }
 0x367   : > { %v2537_v57 = vadd.f32 %v5079_v1, %v2461_v16  ;;  %v2538_v23 = vadd.f32 %v5082_v52, %v2462_v27 }
 0x369   : > { %2601 = vst [vmem:[%s5094_s15 + $0x1f0] sm:$0xff] %v2537_v57  ;;  %2602 = vst [vmem:[%s5094_s15 + $0x1f8] sm:$0xff] %v2538_v23 }
 0x36a   : > { %3319 = shalt.err (!%p3316_p3)
}
 0x36b   : > { %s3320_s7 = scalar_lea.hbm %s5345_s11, 8192  ;;  %s3324_s26 = scalar_lea.hbm %s5401_s5, 16384 }
 0x36c   : > { %p3321_p4 = scmp.ne.s32.totalorder %s5345_s11, %s3320_s7  ;;  %p3325_p9 = scmp.lt.u32.totalorder %s5345_s11, %s5401_s5 }
 0x36d   : > { %p3326_p10 = scmp.lt.u32.totalorder %s3324_s26, %s3320_s7  ;;  %p3328_p12 = scmp.lt.u32.totalorder %s3320_s7, %s5345_s11 }
 0x36e   : > { %p3322_p7 = pnand %p3321_p4, %p3442_p5 }
 0x36f   : > { %p3327_p11 = por %p3326_p10, %p3325_p9 }
 0x370   : > { %p3323_p8 = pneg %p3322_p7 }
 0x371   : > { %p3329_p13 = por %p3328_p12, %p3327_p11 }
 0x373   : > { %p3330_p0 = pnand %p3329_p13, %p3323_p8 }
 0x375   : > { %3333 = shalt.err (!%p3330_p0)
}
 0x376   : > { %s3372_s15 = smov 256   ;;  %s3373_s8 = smov 16  }
 0x377   : > { %3200 = dma.vmem_to_hbm [thread:$0]  (%p3442_p5), %s5347_s13, 8192, %s5345_s11, %s5355_s22, %s3372_s15, %s3372_s15, %s3373_s8  }
 0x378 PF: > { %p3206_p1 = scmp.ge.s32.totalorder %s3368_s21, 2  ;;  %s2633_s9 = sand.u32 1, %s3356_s18  }
 0x379   : > { %s2634_s10 = scalar_lea.sflag [#allocation3], %s2633_s9 }
 0x37a   : > { %p3203_p2 = pnand %p3206_p1, %p3446_p6 }
 0x37c   : > { %3351 = dma.done.wait (!%p3203_p2), %s2634_s10, 8192  }
 0x37d   : > { %3353 = vsyncadd (!%p3203_p2), %s2634_s10, 4294959104  ;;  %p15_p3 = scmp.ge.s32.totalorder %s3429_s24, 4   ;;  %s5511_s18 = smov %s3360_s19 }
 0x37e   : > { %s5512_s19 = smov %s3364_s20  ;;  %s5513_s20 = smov %s3440_s27 }
 0x37f   : > { %s5514_s21 = smov %s3429_s24  ;;  %17 = sbr.rel (!%p15_p3) target bundleno = 3 (0x3), region = 75 }
 0x386   :  { %2639 = vsyncpa [#allocation3], 1 }
 0x387   :  { %2641 = vsyncpa [#allocation3 + $0x1], 1 }

</bundles_post_ra>
